<compile_context>
chip_gen: v7x
topology: tpu7x:2x2x1
jax: 0.10.0
libtpu: 0.0.40
codegen_flags: <defaults>
</compile_context>

<pallas_src>
import functools
import math

import jax
import jax.numpy as jnp
from jax import lax
from jax.experimental import pallas as pl
from jax.experimental.pallas import tpu as pltpu

LANE = 128  # classifier output padded to full lane width -> dense (unmasked) stores


def _layernorm(x, gamma, beta, eps=1e-5):
    mean = jnp.mean(x, axis=-1, keepdims=True)
    var = jnp.mean((x - mean) ** 2, axis=-1, keepdims=True)
    return (x - mean) * lax.rsqrt(var + eps) * gamma + beta


def ner_kernel(ids_ref,                             # SMEM (B, S) int32  (scalar prefetch)
               embed_ref,                           # (V, E)        f32
               wq_ref, wk_ref, wv_ref,              # (L, H, E, Dh) bf16 (wq pre-scaled by 1/sqrt(Dh))
               bq_ref, bk_ref, bv_ref,              # (L, H, 1, Dh) f32  (bq pre-scaled)
               wo_ref, bo_ref,                      # (L, H, Dh, E) bf16 / (L, 1, E) f32
               ln1g_ref, ln1b_ref,                  # (L, 1, E) f32
               w1_ref, b1_ref,                      # (L, E, F) bf16 / (L, 1, F) f32
               w2_ref, b2_ref,                      # (L, F, E) bf16 / (L, 1, E) f32
               ln2g_ref, ln2b_ref,                  # (L, 1, E) f32
               fcw_ref, fcb_ref,                    # (E, LANE) bf16 / (1, LANE) f32
               o_ref,                               # (S, LANE) f32
               *, seq, n_head, num_layers):
    b = pl.program_id(0)
    S = seq
    H = n_head
    V, E = embed_ref.shape

    # ---- Embedding lookup fused as a one-hot matmul (embed_dropout: identity) ----
    # TODO(synk): one-hot gather is appropriate for small vocabularies only; a
    #             large vocab would need a DMA gather / pl.Element row-gather.
    col = lax.broadcasted_iota(jnp.int32, (S, V), 1)
    row = lax.broadcasted_iota(jnp.int32, (S, V), 0)
    onehot = jnp.zeros((S, V), jnp.float32)
    for s in range(S):                              # S is small & static (SMEM scalar reads)
        onehot = jnp.where(
            jnp.logical_and(row == s, col == ids_ref[b, s]), 1.0, onehot)
    x = jnp.dot(onehot, embed_ref[...], preferred_element_type=jnp.float32)   # (S, E) f32

    # ---- num_layers x post-norm TransformerEncoderLayer (static unroll) ----
    for l in range(num_layers):
        xb = jnp.broadcast_to(x.astype(jnp.bfloat16)[None], (H, S, E))        # (H, S, E)

        # Head-batched projections: one batched MXU op each, leading batch dim,
        # no per-head lane slicing, no reshapes, no concat.
        q = jnp.einsum('hse,hed->hsd', xb, wq_ref[l],
                       preferred_element_type=jnp.float32) + bq_ref[l]        # (H, S, Dh)
        k = jnp.einsum('hse,hed->hsd', xb, wk_ref[l],
                       preferred_element_type=jnp.float32) + bk_ref[l]
        v = jnp.einsum('hse,hed->hsd', xb, wv_ref[l],
                       preferred_element_type=jnp.float32) + bv_ref[l]

        # Scaled dot-product attention (1/sqrt(Dh) already folded into Q proj).
        s_hqk = jnp.einsum('hqd,hkd->hqk', q.astype(jnp.bfloat16),
                           k.astype(jnp.bfloat16),
                           preferred_element_type=jnp.float32)                # (H, S, S)
        s_hqk = s_hqk - jnp.max(s_hqk, axis=-1, keepdims=True)
        p = jnp.exp(s_hqk)
        p = p * pl.reciprocal(jnp.sum(p, axis=-1, keepdims=True), approx=True)
        ctx = jnp.einsum('hqk,hkd->hqd', p.astype(jnp.bfloat16),
                         v.astype(jnp.bfloat16),
                         preferred_element_type=jnp.float32)                  # (H, S, Dh)

        # Output projection: head-batched (Dh, E) blocks of W_o summed over the
        # leading head axis == concat(heads) @ W_o, without the lane concat.
        attn = jnp.sum(
            jnp.einsum('hsd,hde->hse', ctx.astype(jnp.bfloat16), wo_ref[l],
                       preferred_element_type=jnp.float32),
            axis=0) + bo_ref[l]                                               # (S, E)

        # Add & Norm 1
        y = _layernorm(x + attn, ln1g_ref[l], ln1b_ref[l])

        # Feed-forward (relu, dim_feedforward=512)
        h1 = jnp.dot(y.astype(jnp.bfloat16), w1_ref[l],
                     preferred_element_type=jnp.float32) + b1_ref[l]
        h1 = jnp.maximum(h1, 0.0)
        ff = jnp.dot(h1.astype(jnp.bfloat16), w2_ref[l],
                     preferred_element_type=jnp.float32) + b2_ref[l]

        # Add & Norm 2
        x = _layernorm(y + ff, ln2g_ref[l], ln2b_ref[l])

    # ---- Classifier, lane-padded to 128 output columns (fc_dropout: identity) ----
    o_ref[...] = jnp.dot(x.astype(jnp.bfloat16), fcw_ref[...],
                         preferred_element_type=jnp.float32) + fcb_ref[...]


# ----------------------------------------------------------------------------
# Wrapper around pallas_call
# ----------------------------------------------------------------------------
def ner_transformer_forward(token_ids, params, n_head):
    B, S = token_ids.shape
    L = params["wq"].shape[0]
    C = params["num_classes"]

    kernel = functools.partial(ner_kernel, seq=S, n_head=n_head, num_layers=L)

    weight_args = (params["embed"],
                   params["wq"], params["wk"], params["wv"],
                   params["bq"], params["bk"], params["bv"],
                   params["wo"], params["bo"],
                   params["ln1g"], params["ln1b"],
                   params["w1"], params["b1"],
                   params["w2"], params["b2"],
                   params["ln2g"], params["ln2b"],
                   params["fc_w_pad"], params["fc_b_pad"])

    def resident(arr):
        nd = arr.ndim
        return pl.BlockSpec(arr.shape, lambda *_: (0,) * nd)   # constant block index

    grid_spec = pltpu.PrefetchScalarGridSpec(
        num_scalar_prefetch=1,                       # token ids -> SMEM
        grid=(B,),                                   # one batch element per grid step
        in_specs=[resident(w) for w in weight_args],
        out_specs=pl.BlockSpec((None, S, LANE), lambda b, ids: (b, 0, 0)),
    )

    logits_pad = pl.pallas_call(
        kernel,
        out_shape=jax.ShapeDtypeStruct((B, S, LANE), jnp.float32),
        grid_spec=grid_spec,
        compiler_params=pltpu.CompilerParams(
            dimension_semantics=("parallel",)),      # megacore: batch split across TCs (v7x)
    )(token_ids.astype(jnp.int32), *weight_args)

    # Drop lane padding; fc_dropout == identity; nn.Softmax unused in forward().
    return logits_pad[:, :, :C]


# ----------------------------------------------------------------------------
# Parameter construction (deterministic; per-head / bf16 weight layouts)
# ----------------------------------------------------------------------------
def init_params(key, vocab_size, embed_dim, num_layers, num_classes, n_head,
                dim_feedforward=512):
    E, F, L, C, H = embed_dim, dim_feedforward, num_layers, num_classes, n_head
    Dh = E // H
    scale = 1.0 / math.sqrt(Dh)
    s_e = 1.0 / math.sqrt(E)
    s_f = 1.0 / math.sqrt(F)
    keys = jax.random.split(key, 8)

    def per_head_in(w):        # (L, E, E) -> (L, H, E, Dh): w_r[l,h,e,d] = w[l,e,h*Dh+d]
        return w.reshape(L, E, H, Dh).transpose(0, 2, 1, 3)

    p = {}
    p["embed"] = 0.02 * jax.random.normal(keys[0], (vocab_size, E), jnp.float32)

    wq = s_e * jax.random.normal(keys[1], (L, E, E), jnp.float32)
    wk = s_e * jax.random.normal(keys[2], (L, E, E), jnp.float32)
    wv = s_e * jax.random.normal(keys[3], (L, E, E), jnp.float32)
    wo = s_e * jax.random.normal(keys[4], (L, E, E), jnp.float32)

    # Attention scale 1/sqrt(Dh) folded into the whole Q projection (W and bias).
    p["wq"] = per_head_in(wq * scale).astype(jnp.bfloat16)
    p["wk"] = per_head_in(wk).astype(jnp.bfloat16)
    p["wv"] = per_head_in(wv).astype(jnp.bfloat16)
    p["bq"] = jnp.zeros((L, H, 1, Dh), jnp.float32)           # (scale-fold is a no-op on zeros)
    p["bk"] = jnp.zeros((L, H, 1, Dh), jnp.float32)
    p["bv"] = jnp.zeros((L, H, 1, Dh), jnp.float32)
    p["wo"] = wo.reshape(L, H, Dh, E).astype(jnp.bfloat16)    # per-head (Dh, E) blocks
    p["bo"] = jnp.zeros((L, 1, E), jnp.float32)

    p["ln1g"] = jnp.ones((L, 1, E), jnp.float32)
    p["ln1b"] = jnp.zeros((L, 1, E), jnp.float32)
    p["w1"] = (s_e * jax.random.normal(keys[5], (L, E, F), jnp.float32)).astype(jnp.bfloat16)
    p["b1"] = jnp.zeros((L, 1, F), jnp.float32)
    p["w2"] = (s_f * jax.random.normal(keys[6], (L, F, E), jnp.float32)).astype(jnp.bfloat16)
    p["b2"] = jnp.zeros((L, 1, E), jnp.float32)
    p["ln2g"] = jnp.ones((L, 1, E), jnp.float32)
    p["ln2b"] = jnp.zeros((L, 1, E), jnp.float32)

    fc_w = s_e * jax.random.normal(keys[7], (E, C), jnp.float32)
    p["fc_w_pad"] = (jnp.zeros((E, LANE), jnp.float32).at[:, :C].set(fc_w)).astype(jnp.bfloat16)
    p["fc_b_pad"] = jnp.zeros((1, LANE), jnp.float32)
    p["num_classes"] = C
    return p


if __name__ == "__main__":
    # Small config consistent with the module's constructor.
    vocab_size, embed_dim, num_layers, num_classes, n_head = 50, 32, 2, 8, 4
    B, S = 2, 8

    key = jax.random.PRNGKey(0)
    pkey, dkey = jax.random.split(key)
    params = init_params(pkey, vocab_size, embed_dim, num_layers, num_classes, n_head)

    token_ids = jax.random.randint(dkey, (B, S), 0, vocab_size, dtype=jnp.int32)

    out = ner_transformer_forward(token_ids, params, n_head)
    out = jax.block_until_ready(out)
    assert out.shape == (B, S, num_classes)
    assert out.dtype == jnp.float32
    print("KERNEL_OK")
</pallas_src>

<mosaic_0001>
module attributes {stable_mosaic.version = 11 : i64} {
  func.func @ner_kernel(%arg0: i32, %arg1: memref<2x8xi32, #tpu.memory_space<smem>>, %arg2: memref<50x32xf32, #tpu.memory_space<vmem>>, %arg3: memref<2x4x32x8xbf16, #tpu.memory_space<vmem>>, %arg4: memref<2x4x32x8xbf16, #tpu.memory_space<vmem>>, %arg5: memref<2x4x32x8xbf16, #tpu.memory_space<vmem>>, %arg6: memref<2x4x1x8xf32, #tpu.memory_space<vmem>>, %arg7: memref<2x4x1x8xf32, #tpu.memory_space<vmem>>, %arg8: memref<2x4x1x8xf32, #tpu.memory_space<vmem>>, %arg9: memref<2x4x8x32xbf16, #tpu.memory_space<vmem>>, %arg10: memref<2x1x32xf32, #tpu.memory_space<vmem>>, %arg11: memref<2x1x32xf32, #tpu.memory_space<vmem>>, %arg12: memref<2x1x32xf32, #tpu.memory_space<vmem>>, %arg13: memref<2x32x512xbf16, #tpu.memory_space<vmem>>, %arg14: memref<2x1x512xf32, #tpu.memory_space<vmem>>, %arg15: memref<2x512x32xbf16, #tpu.memory_space<vmem>>, %arg16: memref<2x1x32xf32, #tpu.memory_space<vmem>>, %arg17: memref<2x1x32xf32, #tpu.memory_space<vmem>>, %arg18: memref<2x1x32xf32, #tpu.memory_space<vmem>>, %arg19: memref<32x128xbf16, #tpu.memory_space<vmem>>, %arg20: memref<1x128xf32, #tpu.memory_space<vmem>>, %arg21: memref<1x8x128xf32, #tpu.memory_space<vmem>>) attributes {dimension_semantics = [#tpu.dimension_semantics<parallel>], iteration_bounds = array<i64: 2>, scalar_prefetch = 1 : i64, scratch_operands = 0 : i64, tpu.core_type = #tpu.core_type<tc>, window_params = [{pipeline_mode = #tpu.pipeline_mode<synchronous>, transform_indices = @transform_0, window_bounds = array<i64: 50, 32>}, {pipeline_mode = #tpu.pipeline_mode<synchronous>, transform_indices = @transform_1, window_bounds = array<i64: 2, 4, 32, 8>}, {pipeline_mode = #tpu.pipeline_mode<synchronous>, transform_indices = @transform_2, window_bounds = array<i64: 2, 4, 32, 8>}, {pipeline_mode = #tpu.pipeline_mode<synchronous>, transform_indices = @transform_3, window_bounds = array<i64: 2, 4, 32, 8>}, {pipeline_mode = #tpu.pipeline_mode<synchronous>, transform_indices = @transform_4, window_bounds = array<i64: 2, 4, 1, 8>}, {pipeline_mode = #tpu.pipeline_mode<synchronous>, transform_indices = @transform_5, window_bounds = array<i64: 2, 4, 1, 8>}, {pipeline_mode = #tpu.pipeline_mode<synchronous>, transform_indices = @transform_6, window_bounds = array<i64: 2, 4, 1, 8>}, {pipeline_mode = #tpu.pipeline_mode<synchronous>, transform_indices = @transform_7, window_bounds = array<i64: 2, 4, 8, 32>}, {pipeline_mode = #tpu.pipeline_mode<synchronous>, transform_indices = @transform_8, window_bounds = array<i64: 2, 1, 32>}, {pipeline_mode = #tpu.pipeline_mode<synchronous>, transform_indices = @transform_9, window_bounds = array<i64: 2, 1, 32>}, {pipeline_mode = #tpu.pipeline_mode<synchronous>, transform_indices = @transform_10, window_bounds = array<i64: 2, 1, 32>}, {pipeline_mode = #tpu.pipeline_mode<synchronous>, transform_indices = @transform_11, window_bounds = array<i64: 2, 32, 512>}, {pipeline_mode = #tpu.pipeline_mode<synchronous>, transform_indices = @transform_12, window_bounds = array<i64: 2, 1, 512>}, {pipeline_mode = #tpu.pipeline_mode<synchronous>, transform_indices = @transform_13, window_bounds = array<i64: 2, 512, 32>}, {pipeline_mode = #tpu.pipeline_mode<synchronous>, transform_indices = @transform_14, window_bounds = array<i64: 2, 1, 32>}, {pipeline_mode = #tpu.pipeline_mode<synchronous>, transform_indices = @transform_15, window_bounds = array<i64: 2, 1, 32>}, {pipeline_mode = #tpu.pipeline_mode<synchronous>, transform_indices = @transform_16, window_bounds = array<i64: 2, 1, 32>}, {pipeline_mode = #tpu.pipeline_mode<synchronous>, transform_indices = @transform_17, window_bounds = array<i64: 32, 128>}, {pipeline_mode = #tpu.pipeline_mode<synchronous>, transform_indices = @transform_18, window_bounds = array<i64: 1, 128>}, {transform_indices = @transform_19, window_bounds = array<i64: 1, 8, 128>}]} {
    %0 = tpu.iota {dimensions = array<i32: 1>} : vector<8x50xi32>
    %1 = tpu.iota {dimensions = array<i32: 0>} : vector<8x50xi32>
    %cst = arith.constant 0.000000e+00 : f32
    %2 = vector.broadcast %cst : f32 to vector<8x50xf32>
    %c0_i32 = arith.constant 0 : i32
    %3 = vector.broadcast %c0_i32 : i32 to vector<8x50xi32>
    %4 = arith.cmpi eq, %1, %3 : vector<8x50xi32>
    %5 = arith.index_cast %arg0 : i32 to index
    %c0 = arith.constant 0 : index
    %6 = memref.load %arg1[%5, %c0] : memref<2x8xi32, #tpu.memory_space<smem>>
    %7 = vector.broadcast %6 : i32 to vector<8x50xi32>
    %8 = arith.cmpi eq, %0, %7 : vector<8x50xi32>
    %9 = arith.andi %4, %8 : vector<8x50xi1>
    %cst_0 = arith.constant 1.000000e+00 : f32
    %10 = vector.broadcast %cst_0 : f32 to vector<8x50xf32>
    %11 = arith.select %9, %10, %2 : vector<8x50xi1>, vector<8x50xf32>
    %c1_i32 = arith.constant 1 : i32
    %12 = vector.broadcast %c1_i32 : i32 to vector<8x50xi32>
    %13 = arith.cmpi eq, %1, %12 : vector<8x50xi32>
    %14 = arith.index_cast %arg0 : i32 to index
    %c1 = arith.constant 1 : index
    %15 = memref.load %arg1[%14, %c1] : memref<2x8xi32, #tpu.memory_space<smem>>
    %16 = vector.broadcast %15 : i32 to vector<8x50xi32>
    %17 = arith.cmpi eq, %0, %16 : vector<8x50xi32>
    %18 = arith.andi %13, %17 : vector<8x50xi1>
    %cst_1 = arith.constant 1.000000e+00 : f32
    %19 = vector.broadcast %cst_1 : f32 to vector<8x50xf32>
    %20 = arith.select %18, %19, %11 : vector<8x50xi1>, vector<8x50xf32>
    %c2_i32 = arith.constant 2 : i32
    %21 = vector.broadcast %c2_i32 : i32 to vector<8x50xi32>
    %22 = arith.cmpi eq, %1, %21 : vector<8x50xi32>
    %23 = arith.index_cast %arg0 : i32 to index
    %c2 = arith.constant 2 : index
    %24 = memref.load %arg1[%23, %c2] : memref<2x8xi32, #tpu.memory_space<smem>>
    %25 = vector.broadcast %24 : i32 to vector<8x50xi32>
    %26 = arith.cmpi eq, %0, %25 : vector<8x50xi32>
    %27 = arith.andi %22, %26 : vector<8x50xi1>
    %cst_2 = arith.constant 1.000000e+00 : f32
    %28 = vector.broadcast %cst_2 : f32 to vector<8x50xf32>
    %29 = arith.select %27, %28, %20 : vector<8x50xi1>, vector<8x50xf32>
    %c3_i32 = arith.constant 3 : i32
    %30 = vector.broadcast %c3_i32 : i32 to vector<8x50xi32>
    %31 = arith.cmpi eq, %1, %30 : vector<8x50xi32>
    %32 = arith.index_cast %arg0 : i32 to index
    %c3 = arith.constant 3 : index
    %33 = memref.load %arg1[%32, %c3] : memref<2x8xi32, #tpu.memory_space<smem>>
    %34 = vector.broadcast %33 : i32 to vector<8x50xi32>
    %35 = arith.cmpi eq, %0, %34 : vector<8x50xi32>
    %36 = arith.andi %31, %35 : vector<8x50xi1>
    %cst_3 = arith.constant 1.000000e+00 : f32
    %37 = vector.broadcast %cst_3 : f32 to vector<8x50xf32>
    %38 = arith.select %36, %37, %29 : vector<8x50xi1>, vector<8x50xf32>
    %c4_i32 = arith.constant 4 : i32
    %39 = vector.broadcast %c4_i32 : i32 to vector<8x50xi32>
    %40 = arith.cmpi eq, %1, %39 : vector<8x50xi32>
    %41 = arith.index_cast %arg0 : i32 to index
    %c4 = arith.constant 4 : index
    %42 = memref.load %arg1[%41, %c4] : memref<2x8xi32, #tpu.memory_space<smem>>
    %43 = vector.broadcast %42 : i32 to vector<8x50xi32>
    %44 = arith.cmpi eq, %0, %43 : vector<8x50xi32>
    %45 = arith.andi %40, %44 : vector<8x50xi1>
    %cst_4 = arith.constant 1.000000e+00 : f32
    %46 = vector.broadcast %cst_4 : f32 to vector<8x50xf32>
    %47 = arith.select %45, %46, %38 : vector<8x50xi1>, vector<8x50xf32>
    %c5_i32 = arith.constant 5 : i32
    %48 = vector.broadcast %c5_i32 : i32 to vector<8x50xi32>
    %49 = arith.cmpi eq, %1, %48 : vector<8x50xi32>
    %50 = arith.index_cast %arg0 : i32 to index
    %c5 = arith.constant 5 : index
    %51 = memref.load %arg1[%50, %c5] : memref<2x8xi32, #tpu.memory_space<smem>>
    %52 = vector.broadcast %51 : i32 to vector<8x50xi32>
    %53 = arith.cmpi eq, %0, %52 : vector<8x50xi32>
    %54 = arith.andi %49, %53 : vector<8x50xi1>
    %cst_5 = arith.constant 1.000000e+00 : f32
    %55 = vector.broadcast %cst_5 : f32 to vector<8x50xf32>
    %56 = arith.select %54, %55, %47 : vector<8x50xi1>, vector<8x50xf32>
    %c6_i32 = arith.constant 6 : i32
    %57 = vector.broadcast %c6_i32 : i32 to vector<8x50xi32>
    %58 = arith.cmpi eq, %1, %57 : vector<8x50xi32>
    %59 = arith.index_cast %arg0 : i32 to index
    %c6 = arith.constant 6 : index
    %60 = memref.load %arg1[%59, %c6] : memref<2x8xi32, #tpu.memory_space<smem>>
    %61 = vector.broadcast %60 : i32 to vector<8x50xi32>
    %62 = arith.cmpi eq, %0, %61 : vector<8x50xi32>
    %63 = arith.andi %58, %62 : vector<8x50xi1>
    %cst_6 = arith.constant 1.000000e+00 : f32
    %64 = vector.broadcast %cst_6 : f32 to vector<8x50xf32>
    %65 = arith.select %63, %64, %56 : vector<8x50xi1>, vector<8x50xf32>
    %c7_i32 = arith.constant 7 : i32
    %66 = vector.broadcast %c7_i32 : i32 to vector<8x50xi32>
    %67 = arith.cmpi eq, %1, %66 : vector<8x50xi32>
    %68 = arith.index_cast %arg0 : i32 to index
    %c7 = arith.constant 7 : index
    %69 = memref.load %arg1[%68, %c7] : memref<2x8xi32, #tpu.memory_space<smem>>
    %70 = vector.broadcast %69 : i32 to vector<8x50xi32>
    %71 = arith.cmpi eq, %0, %70 : vector<8x50xi32>
    %72 = arith.andi %67, %71 : vector<8x50xi1>
    %cst_7 = arith.constant 1.000000e+00 : f32
    %73 = vector.broadcast %cst_7 : f32 to vector<8x50xf32>
    %74 = arith.select %72, %73, %65 : vector<8x50xi1>, vector<8x50xf32>
    %c0_8 = arith.constant 0 : index
    %c0_9 = arith.constant 0 : index
    %75 = vector.load %arg2[%c0_8, %c0_9] : memref<50x32xf32, #tpu.memory_space<vmem>>, vector<50x32xf32>
    %cst_10 = arith.constant dense<0.000000e+00> : vector<8x32xf32>
    %76 = tpu.matmul %74, %75, %cst_10 {dimension_numbers = #tpu.dot_dimension_numbers<[1], [0], [0], [1], [0, 0, 1, 1], [], []>} : vector<8x50xf32>, vector<50x32xf32>, vector<8x32xf32> -> vector<8x32xf32>
    %77 = arith.truncf %76 : vector<8x32xf32> to vector<8x32xbf16>
    %78 = vector.shape_cast %77 : vector<8x32xbf16> to vector<1x8x32xbf16>
    %79 = vector.shape_cast %78 : vector<1x8x32xbf16> to vector<1x8x32xbf16>
    %80 = vector.broadcast %79 : vector<1x8x32xbf16> to vector<4x8x32xbf16>
    %c0_11 = arith.constant 0 : index
    %c0_12 = arith.constant 0 : index
    %c0_13 = arith.constant 0 : index
    %c0_14 = arith.constant 0 : index
    %81 = vector.load %arg3[%c0_11, %c0_12, %c0_13, %c0_14] : memref<2x4x32x8xbf16, #tpu.memory_space<vmem>>, vector<1x4x32x8xbf16>
    %82 = vector.shape_cast %81 : vector<1x4x32x8xbf16> to vector<4x32x8xbf16>
    "tpu.trace_start"() <{level = 10 : i32, message = "hse,hed->hsd"}> : () -> ()
    %cst_15 = arith.constant dense<0.000000e+00> : vector<4x8x8xf32>
    %83 = tpu.matmul %80, %82, %cst_15 {dimension_numbers = #tpu.dot_dimension_numbers<[2], [1], [1], [2], [0, 0, 0, 1, 1, 2], [0], [0]>} : vector<4x8x32xbf16>, vector<4x32x8xbf16>, vector<4x8x8xf32> -> vector<4x8x8xf32>
    "tpu.trace_stop"() : () -> ()
    %c0_16 = arith.constant 0 : index
    %c0_17 = arith.constant 0 : index
    %c0_18 = arith.constant 0 : index
    %c0_19 = arith.constant 0 : index
    %84 = vector.load %arg6[%c0_16, %c0_17, %c0_18, %c0_19] : memref<2x4x1x8xf32, #tpu.memory_space<vmem>>, vector<1x4x1x8xf32>
    %85 = vector.shape_cast %84 : vector<1x4x1x8xf32> to vector<4x1x8xf32>
    %86 = vector.broadcast %85 : vector<4x1x8xf32> to vector<4x8x8xf32>
    %87 = arith.addf %83, %86 : vector<4x8x8xf32>
    %c0_20 = arith.constant 0 : index
    %c0_21 = arith.constant 0 : index
    %c0_22 = arith.constant 0 : index
    %c0_23 = arith.constant 0 : index
    %88 = vector.load %arg4[%c0_20, %c0_21, %c0_22, %c0_23] : memref<2x4x32x8xbf16, #tpu.memory_space<vmem>>, vector<1x4x32x8xbf16>
    %89 = vector.shape_cast %88 : vector<1x4x32x8xbf16> to vector<4x32x8xbf16>
    "tpu.trace_start"() <{level = 10 : i32, message = "hse,hed->hsd"}> : () -> ()
    %cst_24 = arith.constant dense<0.000000e+00> : vector<4x8x8xf32>
    %90 = tpu.matmul %80, %89, %cst_24 {dimension_numbers = #tpu.dot_dimension_numbers<[2], [1], [1], [2], [0, 0, 0, 1, 1, 2], [0], [0]>} : vector<4x8x32xbf16>, vector<4x32x8xbf16>, vector<4x8x8xf32> -> vector<4x8x8xf32>
    "tpu.trace_stop"() : () -> ()
    %c0_25 = arith.constant 0 : index
    %c0_26 = arith.constant 0 : index
    %c0_27 = arith.constant 0 : index
    %c0_28 = arith.constant 0 : index
    %91 = vector.load %arg7[%c0_25, %c0_26, %c0_27, %c0_28] : memref<2x4x1x8xf32, #tpu.memory_space<vmem>>, vector<1x4x1x8xf32>
    %92 = vector.shape_cast %91 : vector<1x4x1x8xf32> to vector<4x1x8xf32>
    %93 = vector.broadcast %92 : vector<4x1x8xf32> to vector<4x8x8xf32>
    %94 = arith.addf %90, %93 : vector<4x8x8xf32>
    %c0_29 = arith.constant 0 : index
    %c0_30 = arith.constant 0 : index
    %c0_31 = arith.constant 0 : index
    %c0_32 = arith.constant 0 : index
    %95 = vector.load %arg5[%c0_29, %c0_30, %c0_31, %c0_32] : memref<2x4x32x8xbf16, #tpu.memory_space<vmem>>, vector<1x4x32x8xbf16>
    %96 = vector.shape_cast %95 : vector<1x4x32x8xbf16> to vector<4x32x8xbf16>
    "tpu.trace_start"() <{level = 10 : i32, message = "hse,hed->hsd"}> : () -> ()
    %cst_33 = arith.constant dense<0.000000e+00> : vector<4x8x8xf32>
    %97 = tpu.matmul %80, %96, %cst_33 {dimension_numbers = #tpu.dot_dimension_numbers<[2], [1], [1], [2], [0, 0, 0, 1, 1, 2], [0], [0]>} : vector<4x8x32xbf16>, vector<4x32x8xbf16>, vector<4x8x8xf32> -> vector<4x8x8xf32>
    "tpu.trace_stop"() : () -> ()
    %c0_34 = arith.constant 0 : index
    %c0_35 = arith.constant 0 : index
    %c0_36 = arith.constant 0 : index
    %c0_37 = arith.constant 0 : index
    %98 = vector.load %arg8[%c0_34, %c0_35, %c0_36, %c0_37] : memref<2x4x1x8xf32, #tpu.memory_space<vmem>>, vector<1x4x1x8xf32>
    %99 = vector.shape_cast %98 : vector<1x4x1x8xf32> to vector<4x1x8xf32>
    %100 = vector.broadcast %99 : vector<4x1x8xf32> to vector<4x8x8xf32>
    %101 = arith.addf %97, %100 : vector<4x8x8xf32>
    %102 = arith.truncf %87 : vector<4x8x8xf32> to vector<4x8x8xbf16>
    %103 = arith.truncf %94 : vector<4x8x8xf32> to vector<4x8x8xbf16>
    "tpu.trace_start"() <{level = 10 : i32, message = "hqd,hkd->hqk"}> : () -> ()
    %cst_38 = arith.constant dense<0.000000e+00> : vector<4x8x8xf32>
    %104 = tpu.matmul %102, %103, %cst_38 {dimension_numbers = #tpu.dot_dimension_numbers<[2], [2], [1], [1], [0, 0, 0, 1, 1, 1], [0], [0]>} : vector<4x8x8xbf16>, vector<4x8x8xbf16>, vector<4x8x8xf32> -> vector<4x8x8xf32>
    "tpu.trace_stop"() : () -> ()
    %cst_39 = arith.constant dense<0xFF800000> : vector<4x8xf32>
    %105 = vector.multi_reduction <maximumf>, %104, %cst_39 [2] : vector<4x8x8xf32> to vector<4x8xf32>
    %106 = vector.shape_cast %105 : vector<4x8xf32> to vector<4x8x1xf32>
    %107 = vector.broadcast %106 : vector<4x8x1xf32> to vector<4x8x8xf32>
    %108 = arith.subf %104, %107 : vector<4x8x8xf32>
    %109 = math.exp %108 : vector<4x8x8xf32>
    %cst_40 = arith.constant dense<0.000000e+00> : vector<4x8xf32>
    %110 = vector.multi_reduction <add>, %109, %cst_40 [2] : vector<4x8x8xf32> to vector<4x8xf32>
    %111 = vector.shape_cast %110 : vector<4x8xf32> to vector<4x8x1xf32>
    %112 = tpu.reciprocal %111 {approx = true} : vector<4x8x1xf32> -> vector<4x8x1xf32>
    %113 = vector.broadcast %112 : vector<4x8x1xf32> to vector<4x8x8xf32>
    %114 = arith.mulf %109, %113 : vector<4x8x8xf32>
    %115 = arith.truncf %114 : vector<4x8x8xf32> to vector<4x8x8xbf16>
    %116 = arith.truncf %101 : vector<4x8x8xf32> to vector<4x8x8xbf16>
    "tpu.trace_start"() <{level = 10 : i32, message = "hqk,hkd->hqd"}> : () -> ()
    %cst_41 = arith.constant dense<0.000000e+00> : vector<4x8x8xf32>
    %117 = tpu.matmul %115, %116, %cst_41 {dimension_numbers = #tpu.dot_dimension_numbers<[2], [1], [1], [2], [0, 0, 0, 1, 1, 2], [0], [0]>} : vector<4x8x8xbf16>, vector<4x8x8xbf16>, vector<4x8x8xf32> -> vector<4x8x8xf32>
    "tpu.trace_stop"() : () -> ()
    %118 = arith.truncf %117 : vector<4x8x8xf32> to vector<4x8x8xbf16>
    %c0_42 = arith.constant 0 : index
    %c0_43 = arith.constant 0 : index
    %c0_44 = arith.constant 0 : index
    %c0_45 = arith.constant 0 : index
    %119 = vector.load %arg9[%c0_42, %c0_43, %c0_44, %c0_45] : memref<2x4x8x32xbf16, #tpu.memory_space<vmem>>, vector<1x4x8x32xbf16>
    %120 = vector.shape_cast %119 : vector<1x4x8x32xbf16> to vector<4x8x32xbf16>
    "tpu.trace_start"() <{level = 10 : i32, message = "hsd,hde->hse"}> : () -> ()
    %cst_46 = arith.constant dense<0.000000e+00> : vector<4x8x32xf32>
    %121 = tpu.matmul %118, %120, %cst_46 {dimension_numbers = #tpu.dot_dimension_numbers<[2], [1], [1], [2], [0, 0, 0, 1, 1, 2], [0], [0]>} : vector<4x8x8xbf16>, vector<4x8x32xbf16>, vector<4x8x32xf32> -> vector<4x8x32xf32>
    "tpu.trace_stop"() : () -> ()
    %cst_47 = arith.constant dense<0.000000e+00> : vector<8x32xf32>
    %122 = vector.multi_reduction <add>, %121, %cst_47 [0] : vector<4x8x32xf32> to vector<8x32xf32>
    %c0_48 = arith.constant 0 : index
    %c0_49 = arith.constant 0 : index
    %c0_50 = arith.constant 0 : index
    %123 = vector.load %arg10[%c0_48, %c0_49, %c0_50] : memref<2x1x32xf32, #tpu.memory_space<vmem>>, vector<1x1x32xf32>
    %124 = vector.shape_cast %123 : vector<1x1x32xf32> to vector<1x32xf32>
    %125 = vector.broadcast %124 : vector<1x32xf32> to vector<8x32xf32>
    %126 = arith.addf %122, %125 : vector<8x32xf32>
    %127 = arith.addf %76, %126 : vector<8x32xf32>
    %c0_51 = arith.constant 0 : index
    %c0_52 = arith.constant 0 : index
    %c0_53 = arith.constant 0 : index
    %128 = vector.load %arg11[%c0_51, %c0_52, %c0_53] : memref<2x1x32xf32, #tpu.memory_space<vmem>>, vector<1x1x32xf32>
    %129 = vector.shape_cast %128 : vector<1x1x32xf32> to vector<1x32xf32>
    %c0_54 = arith.constant 0 : index
    %c0_55 = arith.constant 0 : index
    %c0_56 = arith.constant 0 : index
    %130 = vector.load %arg12[%c0_54, %c0_55, %c0_56] : memref<2x1x32xf32, #tpu.memory_space<vmem>>, vector<1x1x32xf32>
    %131 = vector.shape_cast %130 : vector<1x1x32xf32> to vector<1x32xf32>
    %cst_57 = arith.constant dense<0.000000e+00> : vector<8xf32>
    %132 = vector.multi_reduction <add>, %127, %cst_57 [1] : vector<8x32xf32> to vector<8xf32>
    %133 = vector.shape_cast %132 : vector<8xf32> to vector<8x1xf32>
    %cst_58 = arith.constant 3.200000e+01 : f32
    %134 = vector.broadcast %cst_58 : f32 to vector<8x1xf32>
    %135 = arith.divf %133, %134 : vector<8x1xf32>
    %136 = vector.broadcast %135 : vector<8x1xf32> to vector<8x32xf32>
    %137 = arith.subf %127, %136 : vector<8x32xf32>
    %138 = arith.mulf %137, %137 : vector<8x32xf32>
    %cst_59 = arith.constant dense<0.000000e+00> : vector<8xf32>
    %139 = vector.multi_reduction <add>, %138, %cst_59 [1] : vector<8x32xf32> to vector<8xf32>
    %140 = vector.shape_cast %139 : vector<8xf32> to vector<8x1xf32>
    %cst_60 = arith.constant 3.200000e+01 : f32
    %141 = vector.broadcast %cst_60 : f32 to vector<8x1xf32>
    %142 = arith.divf %140, %141 : vector<8x1xf32>
    %143 = vector.broadcast %135 : vector<8x1xf32> to vector<8x32xf32>
    %144 = arith.subf %127, %143 : vector<8x32xf32>
    %cst_61 = arith.constant 9.99999974E-6 : f32
    %145 = vector.broadcast %cst_61 : f32 to vector<8x1xf32>
    %146 = arith.addf %142, %145 : vector<8x1xf32>
    %147 = math.rsqrt %146 : vector<8x1xf32>
    %148 = vector.broadcast %147 : vector<8x1xf32> to vector<8x32xf32>
    %149 = arith.mulf %144, %148 : vector<8x32xf32>
    %150 = vector.broadcast %129 : vector<1x32xf32> to vector<8x32xf32>
    %151 = arith.mulf %149, %150 : vector<8x32xf32>
    %152 = vector.broadcast %131 : vector<1x32xf32> to vector<8x32xf32>
    %153 = arith.addf %151, %152 : vector<8x32xf32>
    %154 = arith.truncf %153 : vector<8x32xf32> to vector<8x32xbf16>
    %c0_62 = arith.constant 0 : index
    %c0_63 = arith.constant 0 : index
    %c0_64 = arith.constant 0 : index
    %155 = vector.load %arg13[%c0_62, %c0_63, %c0_64] : memref<2x32x512xbf16, #tpu.memory_space<vmem>>, vector<1x32x512xbf16>
    %156 = vector.shape_cast %155 : vector<1x32x512xbf16> to vector<32x512xbf16>
    %cst_65 = arith.constant dense<0.000000e+00> : vector<8x512xf32>
    %157 = tpu.matmul %154, %156, %cst_65 {dimension_numbers = #tpu.dot_dimension_numbers<[1], [0], [0], [1], [0, 0, 1, 1], [], []>} : vector<8x32xbf16>, vector<32x512xbf16>, vector<8x512xf32> -> vector<8x512xf32>
    %c0_66 = arith.constant 0 : index
    %c0_67 = arith.constant 0 : index
    %c0_68 = arith.constant 0 : index
    %158 = vector.load %arg14[%c0_66, %c0_67, %c0_68] : memref<2x1x512xf32, #tpu.memory_space<vmem>>, vector<1x1x512xf32>
    %159 = vector.shape_cast %158 : vector<1x1x512xf32> to vector<1x512xf32>
    %160 = vector.broadcast %159 : vector<1x512xf32> to vector<8x512xf32>
    %161 = arith.addf %157, %160 : vector<8x512xf32>
    %cst_69 = arith.constant 0.000000e+00 : f32
    %162 = vector.broadcast %cst_69 : f32 to vector<8x512xf32>
    %163 = arith.maximumf %161, %162 : vector<8x512xf32>
    %164 = arith.truncf %163 : vector<8x512xf32> to vector<8x512xbf16>
    %c0_70 = arith.constant 0 : index
    %c0_71 = arith.constant 0 : index
    %c0_72 = arith.constant 0 : index
    %165 = vector.load %arg15[%c0_70, %c0_71, %c0_72] : memref<2x512x32xbf16, #tpu.memory_space<vmem>>, vector<1x512x32xbf16>
    %166 = vector.shape_cast %165 : vector<1x512x32xbf16> to vector<512x32xbf16>
    %cst_73 = arith.constant dense<0.000000e+00> : vector<8x32xf32>
    %167 = tpu.matmul %164, %166, %cst_73 {dimension_numbers = #tpu.dot_dimension_numbers<[1], [0], [0], [1], [0, 0, 1, 1], [], []>} : vector<8x512xbf16>, vector<512x32xbf16>, vector<8x32xf32> -> vector<8x32xf32>
    %c0_74 = arith.constant 0 : index
    %c0_75 = arith.constant 0 : index
    %c0_76 = arith.constant 0 : index
    %168 = vector.load %arg16[%c0_74, %c0_75, %c0_76] : memref<2x1x32xf32, #tpu.memory_space<vmem>>, vector<1x1x32xf32>
    %169 = vector.shape_cast %168 : vector<1x1x32xf32> to vector<1x32xf32>
    %170 = vector.broadcast %169 : vector<1x32xf32> to vector<8x32xf32>
    %171 = arith.addf %167, %170 : vector<8x32xf32>
    %172 = arith.addf %153, %171 : vector<8x32xf32>
    %c0_77 = arith.constant 0 : index
    %c0_78 = arith.constant 0 : index
    %c0_79 = arith.constant 0 : index
    %173 = vector.load %arg17[%c0_77, %c0_78, %c0_79] : memref<2x1x32xf32, #tpu.memory_space<vmem>>, vector<1x1x32xf32>
    %174 = vector.shape_cast %173 : vector<1x1x32xf32> to vector<1x32xf32>
    %c0_80 = arith.constant 0 : index
    %c0_81 = arith.constant 0 : index
    %c0_82 = arith.constant 0 : index
    %175 = vector.load %arg18[%c0_80, %c0_81, %c0_82] : memref<2x1x32xf32, #tpu.memory_space<vmem>>, vector<1x1x32xf32>
    %176 = vector.shape_cast %175 : vector<1x1x32xf32> to vector<1x32xf32>
    %cst_83 = arith.constant dense<0.000000e+00> : vector<8xf32>
    %177 = vector.multi_reduction <add>, %172, %cst_83 [1] : vector<8x32xf32> to vector<8xf32>
    %178 = vector.shape_cast %177 : vector<8xf32> to vector<8x1xf32>
    %cst_84 = arith.constant 3.200000e+01 : f32
    %179 = vector.broadcast %cst_84 : f32 to vector<8x1xf32>
    %180 = arith.divf %178, %179 : vector<8x1xf32>
    %181 = vector.broadcast %180 : vector<8x1xf32> to vector<8x32xf32>
    %182 = arith.subf %172, %181 : vector<8x32xf32>
    %183 = arith.mulf %182, %182 : vector<8x32xf32>
    %cst_85 = arith.constant dense<0.000000e+00> : vector<8xf32>
    %184 = vector.multi_reduction <add>, %183, %cst_85 [1] : vector<8x32xf32> to vector<8xf32>
    %185 = vector.shape_cast %184 : vector<8xf32> to vector<8x1xf32>
    %cst_86 = arith.constant 3.200000e+01 : f32
    %186 = vector.broadcast %cst_86 : f32 to vector<8x1xf32>
    %187 = arith.divf %185, %186 : vector<8x1xf32>
    %188 = vector.broadcast %180 : vector<8x1xf32> to vector<8x32xf32>
    %189 = arith.subf %172, %188 : vector<8x32xf32>
    %cst_87 = arith.constant 9.99999974E-6 : f32
    %190 = vector.broadcast %cst_87 : f32 to vector<8x1xf32>
    %191 = arith.addf %187, %190 : vector<8x1xf32>
    %192 = math.rsqrt %191 : vector<8x1xf32>
    %193 = vector.broadcast %192 : vector<8x1xf32> to vector<8x32xf32>
    %194 = arith.mulf %189, %193 : vector<8x32xf32>
    %195 = vector.broadcast %174 : vector<1x32xf32> to vector<8x32xf32>
    %196 = arith.mulf %194, %195 : vector<8x32xf32>
    %197 = vector.broadcast %176 : vector<1x32xf32> to vector<8x32xf32>
    %198 = arith.addf %196, %197 : vector<8x32xf32>
    %199 = arith.truncf %198 : vector<8x32xf32> to vector<8x32xbf16>
    %200 = vector.shape_cast %199 : vector<8x32xbf16> to vector<1x8x32xbf16>
    %201 = vector.shape_cast %200 : vector<1x8x32xbf16> to vector<1x8x32xbf16>
    %202 = vector.broadcast %201 : vector<1x8x32xbf16> to vector<4x8x32xbf16>
    %c1_88 = arith.constant 1 : index
    %c0_89 = arith.constant 0 : index
    %c0_90 = arith.constant 0 : index
    %c0_91 = arith.constant 0 : index
    %203 = vector.load %arg3[%c1_88, %c0_89, %c0_90, %c0_91] : memref<2x4x32x8xbf16, #tpu.memory_space<vmem>>, vector<1x4x32x8xbf16>
    %204 = vector.shape_cast %203 : vector<1x4x32x8xbf16> to vector<4x32x8xbf16>
    "tpu.trace_start"() <{level = 10 : i32, message = "hse,hed->hsd"}> : () -> ()
    %cst_92 = arith.constant dense<0.000000e+00> : vector<4x8x8xf32>
    %205 = tpu.matmul %202, %204, %cst_92 {dimension_numbers = #tpu.dot_dimension_numbers<[2], [1], [1], [2], [0, 0, 0, 1, 1, 2], [0], [0]>} : vector<4x8x32xbf16>, vector<4x32x8xbf16>, vector<4x8x8xf32> -> vector<4x8x8xf32>
    "tpu.trace_stop"() : () -> ()
    %c1_93 = arith.constant 1 : index
    %c0_94 = arith.constant 0 : index
    %c0_95 = arith.constant 0 : index
    %c0_96 = arith.constant 0 : index
    %206 = vector.load %arg6[%c1_93, %c0_94, %c0_95, %c0_96] : memref<2x4x1x8xf32, #tpu.memory_space<vmem>>, vector<1x4x1x8xf32>
    %207 = vector.shape_cast %206 : vector<1x4x1x8xf32> to vector<4x1x8xf32>
    %208 = vector.broadcast %207 : vector<4x1x8xf32> to vector<4x8x8xf32>
    %209 = arith.addf %205, %208 : vector<4x8x8xf32>
    %c1_97 = arith.constant 1 : index
    %c0_98 = arith.constant 0 : index
    %c0_99 = arith.constant 0 : index
    %c0_100 = arith.constant 0 : index
    %210 = vector.load %arg4[%c1_97, %c0_98, %c0_99, %c0_100] : memref<2x4x32x8xbf16, #tpu.memory_space<vmem>>, vector<1x4x32x8xbf16>
    %211 = vector.shape_cast %210 : vector<1x4x32x8xbf16> to vector<4x32x8xbf16>
    "tpu.trace_start"() <{level = 10 : i32, message = "hse,hed->hsd"}> : () -> ()
    %cst_101 = arith.constant dense<0.000000e+00> : vector<4x8x8xf32>
    %212 = tpu.matmul %202, %211, %cst_101 {dimension_numbers = #tpu.dot_dimension_numbers<[2], [1], [1], [2], [0, 0, 0, 1, 1, 2], [0], [0]>} : vector<4x8x32xbf16>, vector<4x32x8xbf16>, vector<4x8x8xf32> -> vector<4x8x8xf32>
    "tpu.trace_stop"() : () -> ()
    %c1_102 = arith.constant 1 : index
    %c0_103 = arith.constant 0 : index
    %c0_104 = arith.constant 0 : index
    %c0_105 = arith.constant 0 : index
    %213 = vector.load %arg7[%c1_102, %c0_103, %c0_104, %c0_105] : memref<2x4x1x8xf32, #tpu.memory_space<vmem>>, vector<1x4x1x8xf32>
    %214 = vector.shape_cast %213 : vector<1x4x1x8xf32> to vector<4x1x8xf32>
    %215 = vector.broadcast %214 : vector<4x1x8xf32> to vector<4x8x8xf32>
    %216 = arith.addf %212, %215 : vector<4x8x8xf32>
    %c1_106 = arith.constant 1 : index
    %c0_107 = arith.constant 0 : index
    %c0_108 = arith.constant 0 : index
    %c0_109 = arith.constant 0 : index
    %217 = vector.load %arg5[%c1_106, %c0_107, %c0_108, %c0_109] : memref<2x4x32x8xbf16, #tpu.memory_space<vmem>>, vector<1x4x32x8xbf16>
    %218 = vector.shape_cast %217 : vector<1x4x32x8xbf16> to vector<4x32x8xbf16>
    "tpu.trace_start"() <{level = 10 : i32, message = "hse,hed->hsd"}> : () -> ()
    %cst_110 = arith.constant dense<0.000000e+00> : vector<4x8x8xf32>
    %219 = tpu.matmul %202, %218, %cst_110 {dimension_numbers = #tpu.dot_dimension_numbers<[2], [1], [1], [2], [0, 0, 0, 1, 1, 2], [0], [0]>} : vector<4x8x32xbf16>, vector<4x32x8xbf16>, vector<4x8x8xf32> -> vector<4x8x8xf32>
    "tpu.trace_stop"() : () -> ()
    %c1_111 = arith.constant 1 : index
    %c0_112 = arith.constant 0 : index
    %c0_113 = arith.constant 0 : index
    %c0_114 = arith.constant 0 : index
    %220 = vector.load %arg8[%c1_111, %c0_112, %c0_113, %c0_114] : memref<2x4x1x8xf32, #tpu.memory_space<vmem>>, vector<1x4x1x8xf32>
    %221 = vector.shape_cast %220 : vector<1x4x1x8xf32> to vector<4x1x8xf32>
    %222 = vector.broadcast %221 : vector<4x1x8xf32> to vector<4x8x8xf32>
    %223 = arith.addf %219, %222 : vector<4x8x8xf32>
    %224 = arith.truncf %209 : vector<4x8x8xf32> to vector<4x8x8xbf16>
    %225 = arith.truncf %216 : vector<4x8x8xf32> to vector<4x8x8xbf16>
    "tpu.trace_start"() <{level = 10 : i32, message = "hqd,hkd->hqk"}> : () -> ()
    %cst_115 = arith.constant dense<0.000000e+00> : vector<4x8x8xf32>
    %226 = tpu.matmul %224, %225, %cst_115 {dimension_numbers = #tpu.dot_dimension_numbers<[2], [2], [1], [1], [0, 0, 0, 1, 1, 1], [0], [0]>} : vector<4x8x8xbf16>, vector<4x8x8xbf16>, vector<4x8x8xf32> -> vector<4x8x8xf32>
    "tpu.trace_stop"() : () -> ()
    %cst_116 = arith.constant dense<0xFF800000> : vector<4x8xf32>
    %227 = vector.multi_reduction <maximumf>, %226, %cst_116 [2] : vector<4x8x8xf32> to vector<4x8xf32>
    %228 = vector.shape_cast %227 : vector<4x8xf32> to vector<4x8x1xf32>
    %229 = vector.broadcast %228 : vector<4x8x1xf32> to vector<4x8x8xf32>
    %230 = arith.subf %226, %229 : vector<4x8x8xf32>
    %231 = math.exp %230 : vector<4x8x8xf32>
    %cst_117 = arith.constant dense<0.000000e+00> : vector<4x8xf32>
    %232 = vector.multi_reduction <add>, %231, %cst_117 [2] : vector<4x8x8xf32> to vector<4x8xf32>
    %233 = vector.shape_cast %232 : vector<4x8xf32> to vector<4x8x1xf32>
    %234 = tpu.reciprocal %233 {approx = true} : vector<4x8x1xf32> -> vector<4x8x1xf32>
    %235 = vector.broadcast %234 : vector<4x8x1xf32> to vector<4x8x8xf32>
    %236 = arith.mulf %231, %235 : vector<4x8x8xf32>
    %237 = arith.truncf %236 : vector<4x8x8xf32> to vector<4x8x8xbf16>
    %238 = arith.truncf %223 : vector<4x8x8xf32> to vector<4x8x8xbf16>
    "tpu.trace_start"() <{level = 10 : i32, message = "hqk,hkd->hqd"}> : () -> ()
    %cst_118 = arith.constant dense<0.000000e+00> : vector<4x8x8xf32>
    %239 = tpu.matmul %237, %238, %cst_118 {dimension_numbers = #tpu.dot_dimension_numbers<[2], [1], [1], [2], [0, 0, 0, 1, 1, 2], [0], [0]>} : vector<4x8x8xbf16>, vector<4x8x8xbf16>, vector<4x8x8xf32> -> vector<4x8x8xf32>
    "tpu.trace_stop"() : () -> ()
    %240 = arith.truncf %239 : vector<4x8x8xf32> to vector<4x8x8xbf16>
    %c1_119 = arith.constant 1 : index
    %c0_120 = arith.constant 0 : index
    %c0_121 = arith.constant 0 : index
    %c0_122 = arith.constant 0 : index
    %241 = vector.load %arg9[%c1_119, %c0_120, %c0_121, %c0_122] : memref<2x4x8x32xbf16, #tpu.memory_space<vmem>>, vector<1x4x8x32xbf16>
    %242 = vector.shape_cast %241 : vector<1x4x8x32xbf16> to vector<4x8x32xbf16>
    "tpu.trace_start"() <{level = 10 : i32, message = "hsd,hde->hse"}> : () -> ()
    %cst_123 = arith.constant dense<0.000000e+00> : vector<4x8x32xf32>
    %243 = tpu.matmul %240, %242, %cst_123 {dimension_numbers = #tpu.dot_dimension_numbers<[2], [1], [1], [2], [0, 0, 0, 1, 1, 2], [0], [0]>} : vector<4x8x8xbf16>, vector<4x8x32xbf16>, vector<4x8x32xf32> -> vector<4x8x32xf32>
    "tpu.trace_stop"() : () -> ()
    %cst_124 = arith.constant dense<0.000000e+00> : vector<8x32xf32>
    %244 = vector.multi_reduction <add>, %243, %cst_124 [0] : vector<4x8x32xf32> to vector<8x32xf32>
    %c1_125 = arith.constant 1 : index
    %c0_126 = arith.constant 0 : index
    %c0_127 = arith.constant 0 : index
    %245 = vector.load %arg10[%c1_125, %c0_126, %c0_127] : memref<2x1x32xf32, #tpu.memory_space<vmem>>, vector<1x1x32xf32>
    %246 = vector.shape_cast %245 : vector<1x1x32xf32> to vector<1x32xf32>
    %247 = vector.broadcast %246 : vector<1x32xf32> to vector<8x32xf32>
    %248 = arith.addf %244, %247 : vector<8x32xf32>
    %249 = arith.addf %198, %248 : vector<8x32xf32>
    %c1_128 = arith.constant 1 : index
    %c0_129 = arith.constant 0 : index
    %c0_130 = arith.constant 0 : index
    %250 = vector.load %arg11[%c1_128, %c0_129, %c0_130] : memref<2x1x32xf32, #tpu.memory_space<vmem>>, vector<1x1x32xf32>
    %251 = vector.shape_cast %250 : vector<1x1x32xf32> to vector<1x32xf32>
    %c1_131 = arith.constant 1 : index
    %c0_132 = arith.constant 0 : index
    %c0_133 = arith.constant 0 : index
    %252 = vector.load %arg12[%c1_131, %c0_132, %c0_133] : memref<2x1x32xf32, #tpu.memory_space<vmem>>, vector<1x1x32xf32>
    %253 = vector.shape_cast %252 : vector<1x1x32xf32> to vector<1x32xf32>
    %cst_134 = arith.constant dense<0.000000e+00> : vector<8xf32>
    %254 = vector.multi_reduction <add>, %249, %cst_134 [1] : vector<8x32xf32> to vector<8xf32>
    %255 = vector.shape_cast %254 : vector<8xf32> to vector<8x1xf32>
    %cst_135 = arith.constant 3.200000e+01 : f32
    %256 = vector.broadcast %cst_135 : f32 to vector<8x1xf32>
    %257 = arith.divf %255, %256 : vector<8x1xf32>
    %258 = vector.broadcast %257 : vector<8x1xf32> to vector<8x32xf32>
    %259 = arith.subf %249, %258 : vector<8x32xf32>
    %260 = arith.mulf %259, %259 : vector<8x32xf32>
    %cst_136 = arith.constant dense<0.000000e+00> : vector<8xf32>
    %261 = vector.multi_reduction <add>, %260, %cst_136 [1] : vector<8x32xf32> to vector<8xf32>
    %262 = vector.shape_cast %261 : vector<8xf32> to vector<8x1xf32>
    %cst_137 = arith.constant 3.200000e+01 : f32
    %263 = vector.broadcast %cst_137 : f32 to vector<8x1xf32>
    %264 = arith.divf %262, %263 : vector<8x1xf32>
    %265 = vector.broadcast %257 : vector<8x1xf32> to vector<8x32xf32>
    %266 = arith.subf %249, %265 : vector<8x32xf32>
    %cst_138 = arith.constant 9.99999974E-6 : f32
    %267 = vector.broadcast %cst_138 : f32 to vector<8x1xf32>
    %268 = arith.addf %264, %267 : vector<8x1xf32>
    %269 = math.rsqrt %268 : vector<8x1xf32>
    %270 = vector.broadcast %269 : vector<8x1xf32> to vector<8x32xf32>
    %271 = arith.mulf %266, %270 : vector<8x32xf32>
    %272 = vector.broadcast %251 : vector<1x32xf32> to vector<8x32xf32>
    %273 = arith.mulf %271, %272 : vector<8x32xf32>
    %274 = vector.broadcast %253 : vector<1x32xf32> to vector<8x32xf32>
    %275 = arith.addf %273, %274 : vector<8x32xf32>
    %276 = arith.truncf %275 : vector<8x32xf32> to vector<8x32xbf16>
    %c1_139 = arith.constant 1 : index
    %c0_140 = arith.constant 0 : index
    %c0_141 = arith.constant 0 : index
    %277 = vector.load %arg13[%c1_139, %c0_140, %c0_141] : memref<2x32x512xbf16, #tpu.memory_space<vmem>>, vector<1x32x512xbf16>
    %278 = vector.shape_cast %277 : vector<1x32x512xbf16> to vector<32x512xbf16>
    %cst_142 = arith.constant dense<0.000000e+00> : vector<8x512xf32>
    %279 = tpu.matmul %276, %278, %cst_142 {dimension_numbers = #tpu.dot_dimension_numbers<[1], [0], [0], [1], [0, 0, 1, 1], [], []>} : vector<8x32xbf16>, vector<32x512xbf16>, vector<8x512xf32> -> vector<8x512xf32>
    %c1_143 = arith.constant 1 : index
    %c0_144 = arith.constant 0 : index
    %c0_145 = arith.constant 0 : index
    %280 = vector.load %arg14[%c1_143, %c0_144, %c0_145] : memref<2x1x512xf32, #tpu.memory_space<vmem>>, vector<1x1x512xf32>
    %281 = vector.shape_cast %280 : vector<1x1x512xf32> to vector<1x512xf32>
    %282 = vector.broadcast %281 : vector<1x512xf32> to vector<8x512xf32>
    %283 = arith.addf %279, %282 : vector<8x512xf32>
    %cst_146 = arith.constant 0.000000e+00 : f32
    %284 = vector.broadcast %cst_146 : f32 to vector<8x512xf32>
    %285 = arith.maximumf %283, %284 : vector<8x512xf32>
    %286 = arith.truncf %285 : vector<8x512xf32> to vector<8x512xbf16>
    %c1_147 = arith.constant 1 : index
    %c0_148 = arith.constant 0 : index
    %c0_149 = arith.constant 0 : index
    %287 = vector.load %arg15[%c1_147, %c0_148, %c0_149] : memref<2x512x32xbf16, #tpu.memory_space<vmem>>, vector<1x512x32xbf16>
    %288 = vector.shape_cast %287 : vector<1x512x32xbf16> to vector<512x32xbf16>
    %cst_150 = arith.constant dense<0.000000e+00> : vector<8x32xf32>
    %289 = tpu.matmul %286, %288, %cst_150 {dimension_numbers = #tpu.dot_dimension_numbers<[1], [0], [0], [1], [0, 0, 1, 1], [], []>} : vector<8x512xbf16>, vector<512x32xbf16>, vector<8x32xf32> -> vector<8x32xf32>
    %c1_151 = arith.constant 1 : index
    %c0_152 = arith.constant 0 : index
    %c0_153 = arith.constant 0 : index
    %290 = vector.load %arg16[%c1_151, %c0_152, %c0_153] : memref<2x1x32xf32, #tpu.memory_space<vmem>>, vector<1x1x32xf32>
    %291 = vector.shape_cast %290 : vector<1x1x32xf32> to vector<1x32xf32>
    %292 = vector.broadcast %291 : vector<1x32xf32> to vector<8x32xf32>
    %293 = arith.addf %289, %292 : vector<8x32xf32>
    %294 = arith.addf %275, %293 : vector<8x32xf32>
    %c1_154 = arith.constant 1 : index
    %c0_155 = arith.constant 0 : index
    %c0_156 = arith.constant 0 : index
    %295 = vector.load %arg17[%c1_154, %c0_155, %c0_156] : memref<2x1x32xf32, #tpu.memory_space<vmem>>, vector<1x1x32xf32>
    %296 = vector.shape_cast %295 : vector<1x1x32xf32> to vector<1x32xf32>
    %c1_157 = arith.constant 1 : index
    %c0_158 = arith.constant 0 : index
    %c0_159 = arith.constant 0 : index
    %297 = vector.load %arg18[%c1_157, %c0_158, %c0_159] : memref<2x1x32xf32, #tpu.memory_space<vmem>>, vector<1x1x32xf32>
    %298 = vector.shape_cast %297 : vector<1x1x32xf32> to vector<1x32xf32>
    %cst_160 = arith.constant dense<0.000000e+00> : vector<8xf32>
    %299 = vector.multi_reduction <add>, %294, %cst_160 [1] : vector<8x32xf32> to vector<8xf32>
    %300 = vector.shape_cast %299 : vector<8xf32> to vector<8x1xf32>
    %cst_161 = arith.constant 3.200000e+01 : f32
    %301 = vector.broadcast %cst_161 : f32 to vector<8x1xf32>
    %302 = arith.divf %300, %301 : vector<8x1xf32>
    %303 = vector.broadcast %302 : vector<8x1xf32> to vector<8x32xf32>
    %304 = arith.subf %294, %303 : vector<8x32xf32>
    %305 = arith.mulf %304, %304 : vector<8x32xf32>
    %cst_162 = arith.constant dense<0.000000e+00> : vector<8xf32>
    %306 = vector.multi_reduction <add>, %305, %cst_162 [1] : vector<8x32xf32> to vector<8xf32>
    %307 = vector.shape_cast %306 : vector<8xf32> to vector<8x1xf32>
    %cst_163 = arith.constant 3.200000e+01 : f32
    %308 = vector.broadcast %cst_163 : f32 to vector<8x1xf32>
    %309 = arith.divf %307, %308 : vector<8x1xf32>
    %310 = vector.broadcast %302 : vector<8x1xf32> to vector<8x32xf32>
    %311 = arith.subf %294, %310 : vector<8x32xf32>
    %cst_164 = arith.constant 9.99999974E-6 : f32
    %312 = vector.broadcast %cst_164 : f32 to vector<8x1xf32>
    %313 = arith.addf %309, %312 : vector<8x1xf32>
    %314 = math.rsqrt %313 : vector<8x1xf32>
    %315 = vector.broadcast %314 : vector<8x1xf32> to vector<8x32xf32>
    %316 = arith.mulf %311, %315 : vector<8x32xf32>
    %317 = vector.broadcast %296 : vector<1x32xf32> to vector<8x32xf32>
    %318 = arith.mulf %316, %317 : vector<8x32xf32>
    %319 = vector.broadcast %298 : vector<1x32xf32> to vector<8x32xf32>
    %320 = arith.addf %318, %319 : vector<8x32xf32>
    %321 = arith.truncf %320 : vector<8x32xf32> to vector<8x32xbf16>
    %c0_165 = arith.constant 0 : index
    %c0_166 = arith.constant 0 : index
    %322 = vector.load %arg19[%c0_165, %c0_166] : memref<32x128xbf16, #tpu.memory_space<vmem>>, vector<32x128xbf16>
    %cst_167 = arith.constant dense<0.000000e+00> : vector<8x128xf32>
    %323 = tpu.matmul %321, %322, %cst_167 {dimension_numbers = #tpu.dot_dimension_numbers<[1], [0], [0], [1], [0, 0, 1, 1], [], []>} : vector<8x32xbf16>, vector<32x128xbf16>, vector<8x128xf32> -> vector<8x128xf32>
    %c0_168 = arith.constant 0 : index
    %c0_169 = arith.constant 0 : index
    %324 = vector.load %arg20[%c0_168, %c0_169] : memref<1x128xf32, #tpu.memory_space<vmem>>, vector<1x128xf32>
    %325 = vector.broadcast %324 : vector<1x128xf32> to vector<8x128xf32>
    %326 = arith.addf %323, %325 : vector<8x128xf32>
    %c0_170 = arith.constant 0 : index
    %c0_171 = arith.constant 0 : index
    %c0_172 = arith.constant 0 : index
    %327 = vector.load %arg21[%c0_170, %c0_171, %c0_172] : memref<1x8x128xf32, #tpu.memory_space<vmem>>, vector<1x8x128xf32>
    %328 = vector.shape_cast %327 : vector<1x8x128xf32> to vector<8x128xf32>
    %329 = vector.shape_cast %326 : vector<8x128xf32> to vector<1x8x128xf32>
    tpu.vector_store %arg21[%c0_170, %c0_171, %c0_172], %329 {strides = array<i32>} : memref<1x8x128xf32, #tpu.memory_space<vmem>>, vector<1x8x128xf32>,
    return
  }
  func.func @transform_0(%arg0: i32, %arg1: memref<2x8xi32, #tpu.memory_space<smem>>) -> (i32, i32) {
    %c0_i32 = arith.constant 0 : i32
    %c0_i32_0 = arith.constant 0 : i32
    %c0_i32_1 = arith.constant 0 : i32
    return %c0_i32, %c0_i32_0 : i32, i32
  }
  func.func @transform_1(%arg0: i32, %arg1: memref<2x8xi32, #tpu.memory_space<smem>>) -> (i32, i32, i32, i32) {
    %c0_i32 = arith.constant 0 : i32
    %c0_i32_0 = arith.constant 0 : i32
    %c0_i32_1 = arith.constant 0 : i32
    %c0_i32_2 = arith.constant 0 : i32
    %c0_i32_3 = arith.constant 0 : i32
    return %c0_i32, %c0_i32_0, %c0_i32_1, %c0_i32_2 : i32, i32, i32, i32
  }
  func.func @transform_2(%arg0: i32, %arg1: memref<2x8xi32, #tpu.memory_space<smem>>) -> (i32, i32, i32, i32) {
    %c0_i32 = arith.constant 0 : i32
    %c0_i32_0 = arith.constant 0 : i32
    %c0_i32_1 = arith.constant 0 : i32
    %c0_i32_2 = arith.constant 0 : i32
    %c0_i32_3 = arith.constant 0 : i32
    return %c0_i32, %c0_i32_0, %c0_i32_1, %c0_i32_2 : i32, i32, i32, i32
  }
  func.func @transform_3(%arg0: i32, %arg1: memref<2x8xi32, #tpu.memory_space<smem>>) -> (i32, i32, i32, i32) {
    %c0_i32 = arith.constant 0 : i32
    %c0_i32_0 = arith.constant 0 : i32
    %c0_i32_1 = arith.constant 0 : i32
    %c0_i32_2 = arith.constant 0 : i32
    %c0_i32_3 = arith.constant 0 : i32
    return %c0_i32, %c0_i32_0, %c0_i32_1, %c0_i32_2 : i32, i32, i32, i32
  }
  func.func @transform_4(%arg0: i32, %arg1: memref<2x8xi32, #tpu.memory_space<smem>>) -> (i32, i32, i32, i32) {
    %c0_i32 = arith.constant 0 : i32
    %c0_i32_0 = arith.constant 0 : i32
    %c0_i32_1 = arith.constant 0 : i32
    %c0_i32_2 = arith.constant 0 : i32
    %c0_i32_3 = arith.constant 0 : i32
    return %c0_i32, %c0_i32_0, %c0_i32_1, %c0_i32_2 : i32, i32, i32, i32
  }
  func.func @transform_5(%arg0: i32, %arg1: memref<2x8xi32, #tpu.memory_space<smem>>) -> (i32, i32, i32, i32) {
    %c0_i32 = arith.constant 0 : i32
    %c0_i32_0 = arith.constant 0 : i32
    %c0_i32_1 = arith.constant 0 : i32
    %c0_i32_2 = arith.constant 0 : i32
    %c0_i32_3 = arith.constant 0 : i32
    return %c0_i32, %c0_i32_0, %c0_i32_1, %c0_i32_2 : i32, i32, i32, i32
  }
  func.func @transform_6(%arg0: i32, %arg1: memref<2x8xi32, #tpu.memory_space<smem>>) -> (i32, i32, i32, i32) {
    %c0_i32 = arith.constant 0 : i32
    %c0_i32_0 = arith.constant 0 : i32
    %c0_i32_1 = arith.constant 0 : i32
    %c0_i32_2 = arith.constant 0 : i32
    %c0_i32_3 = arith.constant 0 : i32
    return %c0_i32, %c0_i32_0, %c0_i32_1, %c0_i32_2 : i32, i32, i32, i32
  }
  func.func @transform_7(%arg0: i32, %arg1: memref<2x8xi32, #tpu.memory_space<smem>>) -> (i32, i32, i32, i32) {
    %c0_i32 = arith.constant 0 : i32
    %c0_i32_0 = arith.constant 0 : i32
    %c0_i32_1 = arith.constant 0 : i32
    %c0_i32_2 = arith.constant 0 : i32
    %c0_i32_3 = arith.constant 0 : i32
    return %c0_i32, %c0_i32_0, %c0_i32_1, %c0_i32_2 : i32, i32, i32, i32
  }
  func.func @transform_8(%arg0: i32, %arg1: memref<2x8xi32, #tpu.memory_space<smem>>) -> (i32, i32, i32) {
    %c0_i32 = arith.constant 0 : i32
    %c0_i32_0 = arith.constant 0 : i32
    %c0_i32_1 = arith.constant 0 : i32
    %c0_i32_2 = arith.constant 0 : i32
    return %c0_i32, %c0_i32_0, %c0_i32_1 : i32, i32, i32
  }
  func.func @transform_9(%arg0: i32, %arg1: memref<2x8xi32, #tpu.memory_space<smem>>) -> (i32, i32, i32) {
    %c0_i32 = arith.constant 0 : i32
    %c0_i32_0 = arith.constant 0 : i32
    %c0_i32_1 = arith.constant 0 : i32
    %c0_i32_2 = arith.constant 0 : i32
    return %c0_i32, %c0_i32_0, %c0_i32_1 : i32, i32, i32
  }
  func.func @transform_10(%arg0: i32, %arg1: memref<2x8xi32, #tpu.memory_space<smem>>) -> (i32, i32, i32) {
    %c0_i32 = arith.constant 0 : i32
    %c0_i32_0 = arith.constant 0 : i32
    %c0_i32_1 = arith.constant 0 : i32
    %c0_i32_2 = arith.constant 0 : i32
    return %c0_i32, %c0_i32_0, %c0_i32_1 : i32, i32, i32
  }
  func.func @transform_11(%arg0: i32, %arg1: memref<2x8xi32, #tpu.memory_space<smem>>) -> (i32, i32, i32) {
    %c0_i32 = arith.constant 0 : i32
    %c0_i32_0 = arith.constant 0 : i32
    %c0_i32_1 = arith.constant 0 : i32
    %c0_i32_2 = arith.constant 0 : i32
    return %c0_i32, %c0_i32_0, %c0_i32_1 : i32, i32, i32
  }
  func.func @transform_12(%arg0: i32, %arg1: memref<2x8xi32, #tpu.memory_space<smem>>) -> (i32, i32, i32) {
    %c0_i32 = arith.constant 0 : i32
    %c0_i32_0 = arith.constant 0 : i32
    %c0_i32_1 = arith.constant 0 : i32
    %c0_i32_2 = arith.constant 0 : i32
    return %c0_i32, %c0_i32_0, %c0_i32_1 : i32, i32, i32
  }
  func.func @transform_13(%arg0: i32, %arg1: memref<2x8xi32, #tpu.memory_space<smem>>) -> (i32, i32, i32) {
    %c0_i32 = arith.constant 0 : i32
    %c0_i32_0 = arith.constant 0 : i32
    %c0_i32_1 = arith.constant 0 : i32
    %c0_i32_2 = arith.constant 0 : i32
    return %c0_i32, %c0_i32_0, %c0_i32_1 : i32, i32, i32
  }
  func.func @transform_14(%arg0: i32, %arg1: memref<2x8xi32, #tpu.memory_space<smem>>) -> (i32, i32, i32) {
    %c0_i32 = arith.constant 0 : i32
    %c0_i32_0 = arith.constant 0 : i32
    %c0_i32_1 = arith.constant 0 : i32
    %c0_i32_2 = arith.constant 0 : i32
    return %c0_i32, %c0_i32_0, %c0_i32_1 : i32, i32, i32
  }
  func.func @transform_15(%arg0: i32, %arg1: memref<2x8xi32, #tpu.memory_space<smem>>) -> (i32, i32, i32) {
    %c0_i32 = arith.constant 0 : i32
    %c0_i32_0 = arith.constant 0 : i32
    %c0_i32_1 = arith.constant 0 : i32
    %c0_i32_2 = arith.constant 0 : i32
    return %c0_i32, %c0_i32_0, %c0_i32_1 : i32, i32, i32
  }
  func.func @transform_16(%arg0: i32, %arg1: memref<2x8xi32, #tpu.memory_space<smem>>) -> (i32, i32, i32) {
    %c0_i32 = arith.constant 0 : i32
    %c0_i32_0 = arith.constant 0 : i32
    %c0_i32_1 = arith.constant 0 : i32
    %c0_i32_2 = arith.constant 0 : i32
    return %c0_i32, %c0_i32_0, %c0_i32_1 : i32, i32, i32
  }
  func.func @transform_17(%arg0: i32, %arg1: memref<2x8xi32, #tpu.memory_space<smem>>) -> (i32, i32) {
    %c0_i32 = arith.constant 0 : i32
    %c0_i32_0 = arith.constant 0 : i32
    %c0_i32_1 = arith.constant 0 : i32
    return %c0_i32, %c0_i32_0 : i32, i32
  }
  func.func @transform_18(%arg0: i32, %arg1: memref<2x8xi32, #tpu.memory_space<smem>>) -> (i32, i32) {
    %c0_i32 = arith.constant 0 : i32
    %c0_i32_0 = arith.constant 0 : i32
    %c0_i32_1 = arith.constant 0 : i32
    return %c0_i32, %c0_i32_0 : i32, i32
  }
  func.func @transform_19(%arg0: i32, %arg1: memref<2x8xi32, #tpu.memory_space<smem>>) -> (i32, i32, i32) {
    %c0_i32 = arith.constant 0 : i32
    %c0_i32_0 = arith.constant 0 : i32
    %c0_i32_1 = arith.constant 0 : i32
    return %arg0, %c0_i32, %c0_i32_0 : i32, i32, i32
  }
}

</mosaic_0001>

<bundles_post_ra>
// kernel: tpu_custom_call.1
= control target key start
LH: loop header
LB: loop body
LE: loop exit
PB: predicated region body
PF: predicated region fallthrough
CT: control target
= control target key end

     0   :  { %s7245_s0 = inlined_call_operand.vmem [shape: s32[2,8], index: 0, kind: input, shape index: {}]   ;;  %s7246_s1 = inlined_call_operand.vmem [shape: f32[50,32], index: 1, kind: input, shape index: {}]   ;;  %s7247_s2 = inlined_call_operand.vmem [shape: bf16[2,4,32,8], index: 2, kind: input, shape index: {}]   ;;  %s7248_s3 = inlined_call_operand.vmem [shape: bf16[2,4,32,8], index: 3, kind: input, shape index: {}]   ;;  %s7249_s4 = inlined_call_operand.vmem [shape: bf16[2,4,32,8], index: 4, kind: input, shape index: {}]   ;;  %s7250_s5 = inlined_call_operand.vmem [shape: f32[2,4,1,8], index: 5, kind: input, shape index: {}]   ;;  %s7251_s6 = inlined_call_operand.vmem [shape: f32[2,4,1,8], index: 6, kind: input, shape index: {}]   ;;  %s7252_s7 = inlined_call_operand.vmem [shape: f32[2,4,1,8], index: 7, kind: input, shape index: {}]   ;;  %s7253_s8 = inlined_call_operand.vmem [shape: bf16[2,4,8,32], index: 8, kind: input, shape index: {}]   ;;  %s7254_s9 = inlined_call_operand.vmem [shape: f32[2,1,32], index: 9, kind: input, shape index: {}]   ;;  %s7255_s10 = inlined_call_operand.vmem [shape: f32[2,1,32], index: 10, kind: input, shape index: {}]   ;;  %s7256_s11 = inlined_call_operand.vmem [shape: f32[2,1,32], index: 11, kind: input, shape index: {}]   ;;  %s7257_s12 = inlined_call_operand.vmem [shape: bf16[2,32,512], index: 12, kind: input, shape index: {}]   ;;  %s7258_s13 = inlined_call_operand.vmem [shape: f32[2,1,512], index: 13, kind: input, shape index: {}]   ;;  %s7259_s14 = inlined_call_operand.vmem [shape: bf16[2,512,32], index: 14, kind: input, shape index: {}]   ;;  %s7260_s15 = inlined_call_operand.vmem [shape: f32[2,1,32], index: 15, kind: input, shape index: {}]   ;;  %s7261_s16 = inlined_call_operand.vmem [shape: f32[2,1,32], index: 16, kind: input, shape index: {}]   ;;  %s7262_s17 = inlined_call_operand.vmem [shape: f32[2,1,32], index: 17, kind: input, shape index: {}]   ;;  %s7263_s18 = inlined_call_operand.vmem [shape: bf16[32,128], index: 18, kind: input, shape index: {}]   ;;  %s7264_s19 = inlined_call_operand.vmem [shape: f32[1,128], index: 19, kind: input, shape index: {}]   ;;  %s7265_s20 = inlined_call_operand.hbm [shape: f32[2,8,128], index: 20, kind: output, shape index: {}]  }
   0x1   :  { %7278 = sst [smem:[#allocation14_spill]] %s7245_s0 }
   0x2   :  { %7279 = sst [smem:[#allocation15_spill]] %s7246_s1  ;;  %s7287_s23 = sld [smem:[#allocation14_spill]] }
   0x3   :  { %7280 = sst [smem:[#allocation16_spill]] %s7247_s2 }
   0x4   :  { %7281 = sst [smem:[#allocation17_spill]] %s7248_s3 }
   0x5   :  { %7282 = sst [smem:[#allocation18_spill]] %s7249_s4 }
   0x6   :  { %7283 = sst [smem:[#allocation19_spill]] %s7250_s5 }
   0x7   :  { %7284 = sst [smem:[#allocation20_spill]] %s7258_s13 }
   0x8   :  { %7285 = sst [smem:[#allocation21_spill]] %s7264_s19  ;;  %s25_s13 = sshll.u32 %s7287_s23, 4  ;;  %s26_s13 = int_to_ptr.vmem [resolvable:$true] %s25_s13 }
   0x9   :  { %7286 = sst [smem:[#allocation22_spill]] %s7265_s20  ;;  %s5992_s24 = scalar_lea.vmem %s26_s13, 32 }
   0xa   :  { %p5993_p0 = scmp.ne.s32.totalorder %s26_s13, %s5992_s24  ;;  %p5997_p1 = scmp.lt.s32.totalorder %s26_s13, %s26_s13 }
   0xb   :  { %p5998_p2 = scmp.lt.s32.totalorder %s5992_s24, %s5992_s24 }
   0xd   :  { %p5999_p3 = por %p5998_p2, %p5997_p1 }
   0xf   :  { %p6000_p4 = pnand %p5999_p3, %p5993_p0 }
  0x11   :  { %6003 = shalt.err (!%p6000_p4)  }
  0x12   :  { %s6070_s2 = smov [#allocation3]  }
  0x13   :  { %28 = dma.vmem_to_smem %s26_s13, 32, %s6070_s2, [#allocation2] }
  0x14   :  { %6048 = dma.done.wait [#allocation2], 32 }
  0x15   :  { %6049 = vsyncadd [#allocation2], 4294967264 }
  0x16   :  { %30 = sfence }
  0x17   :  { %31 = vsyncpa [#allocation5], 0 }
  0x18   :  { %33 = vsyncpa [#allocation5 + $0x1], 0  ;;  %s6184_s25 = smov 0   ;;  %s6186_s3 = smov 0  }
  0x19   :  { %s6188_s26 = smov 0   ;;  %s6190_s27 = smov 0  }
  0x1a LB: > { %7288 = sst [smem:[#allocation8_spill]] %s6056_s25  ;;  %s4806_s13 = sadd.s32 4294967295, %s6068_s27   ;;  %s6068_s27 = sphi %s6190_s27, %s7308_s27   ;;  %s6064_s26 = sphi %s6188_s26, %s7310_s26   ;;  %s6060_s3 = sphi %s6186_s3, %s7312_s3   ;;  %s6056_s25 = sphi %s6184_s25, %s7311_s25  }
  0x1b   : > { %7289 = sst [smem:[#allocation9_spill]] %s6064_s26  ;;  %s4807_s28 = sadd.s32 4294967294, %s6068_s27  }
  0x1c   : > { %7290 = sst [smem:[#allocation10_spill]] %s6068_s27  ;;  %s6207_s4 = sadd.s32 1, %s6068_s27  }
  0x1d   : > { %7291 = sst [smem:[#allocation11_spill]] %s6207_s4  ;;  %s445_s29 = sadd.s32 1, %s6064_s26 }
  0x1e   : > { %s442_s30 = ssub.s32 %s6068_s27, %s6207_s4  ;;  %p455_p5 = scmp.ne.s32.totalorder %s6064_s26, %s6060_s3 }
  0x1f   : > { %p443_p6 = scmp.eq.s32.totalorder %s442_s30, 0  ;;  %p456_p7 = scmp.eq.s32.totalorder %s4806_s13, 1 }
  0x20   : > { %p461_p8 = scmp.ne.s32.totalorder %s6060_s3, %s6056_s25  ;;  %p462_p9 = scmp.eq.s32.totalorder %s4807_s28, 1 }
  0x21   : > { %s6217_s0 = scalar_select %p443_p6, %s6064_s26, %s445_s29  }
  0x22   : > { %p6219_p10 = por %p456_p7, %p455_p5  ;;  %p6223_p11 = por %p462_p9, %p461_p8 }
  0x23   : > { %7292 = sst [smem:[#allocation12_spill]] %s6217_s0  ;;  %p4809_p12 = scmp.ge.s32.totalorder %s6068_s27, 1 }
  0x24   : > { %s7294_s1 = scalar_select %p6223_p11, 1, 0 }
  0x25   : > { %p537_p13 = scmp.lt.s32.totalorder %s6068_s27, 3 }
  0x26   : > { %7295 = sst [smem:[#allocation13_spill]] %s7294_s1 }
  0x27   : > { %p538_p0 = pnand %p4809_p12, %p537_p13 }
  0x28   : > { %s7296_s24 = sld [smem:[#allocation15_spill]] (!%p538_p0)  ;;  %v589_v3 = vlaneseq (!%p538_p0)  ;;  %v6071_v4 = vmov (!%p538_p0), 0.0|0.0   ;;  %s6241_s4 = sshll.u32 (!%p538_p0), %s4806_s13, 7  ;;  %v6072_v7 = vmov (!%p538_p0), 0.0   ;;  %vm6073_vm0 = vmmov (!%p538_p0), 0  }
  0x29   : > { %541 = sbr.rel (%p538_p0) target bundleno = 5075 (0x13d3), region = 96  ;;  %5761 = vmatprep.subr.bf16.mxu0 (!%p538_p0), %v6071_v4  ;;  %5417 = vmatprep.subr.bf16.mxu1 (!%p538_p0), %v6072_v7  ;;  %s595_s22 = sld [smem:[#allocation3 + %s6241_s4]] (!%p538_p0)  ;;  %vm660_vm5 = vcmask (!%p538_p0), 1041408  }
  0x2a   : > { %5414 = vmatprep.mubr.msk.f32.mxu0 (!%p538_p0), %vm6073_vm0, %v6072_v7  ;;  %v6246_v8 = vshrl.u32 (!%p538_p0), %v589_v3, 7  ;;  %s601_s23 = sadd.s32 (!%p538_p0), 1, %s6241_s4  ;;  %5421 = vmatprep.mubr.msk.bf16.mxu1 (!%p538_p0), %vm6073_vm0, %v6072_v7  ;;  %s608_s13 = sadd.s32 (!%p538_p0), 2, %s6241_s4  ;;  %v590_v12 = vand.u32 (!%p538_p0), 127, %v589_v3 }
  0x2b   : > { %s6252_s26 = sld [smem:[#allocation3 + %s601_s23]] (!%p538_p0)  ;;  %s615_s1 = sadd.s32 (!%p538_p0), 3, %s6241_s4 }
  0x2c   : > { %s6261_s30 = sld [smem:[#allocation3 + %s608_s13]] (!%p538_p0)  ;;  %vm593_vm1 = vcmp.eq.s32.totalorder (!%p538_p0), %v6246_v8, 0  ;;  %vm600_vm2 = vcmp.eq.s32.totalorder (!%p538_p0), %v6246_v8, 1  ;;  %s622_s25 = sadd.s32 (!%p538_p0), 4, %s6241_s4  ;;  %vm607_vm3 = vcmp.eq.s32.totalorder (!%p538_p0), %v6246_v8, 2  ;;  %vm614_vm8 = vcmp.eq.s32.totalorder (!%p538_p0), %v6246_v8, 3 }
  0x2d   : > { %s6266_s23 = sld [smem:[#allocation3 + %s615_s1]] (!%p538_p0)  ;;  %s629_s2 = sadd.s32 (!%p538_p0), 5, %s6241_s4  ;;  %vm621_vm11 = vcmp.eq.s32.totalorder (!%p538_p0), %v6246_v8, 4  ;;  %vm628_vm14 = vcmp.eq.s32.totalorder (!%p538_p0), %v6246_v8, 5 }
  0x2e   : > { %v649_v0 = vld [vmem:[%s7296_s24] sm:$0xff] (!%p538_p0)  ;;  %v650_v1 = vld [vmem:[%s7296_s24 + $0x8] sm:$0xff] (!%p538_p0)  ;;  %v651_v2 = vld [vmem:[%s7296_s24 + $0x10] sm:$0xff] (!%p538_p0)  ;;  %s6270_s0 = sld [smem:[#allocation3 + %s622_s25]] (!%p538_p0)  ;;  %s636_s20 = sadd.s32 (!%p538_p0), 6, %s6241_s4 }
  0x2f   : > { %v5762_v5 = vpack.c.bf16 (!%p538_p0), %v650_v1, %v649_v0  ;;  %v652_v6 = vld [vmem:[%s7296_s24 + $0x18] sm:$0xff] (!%p538_p0)  ;;  %v653_v10 = vld [vmem:[%s7296_s24 + $0x20] sm:$0xff] (!%p538_p0)  ;;  %v654_v11 = vld [vmem:[%s7296_s24 + $0x28] sm:$0xff] (!%p538_p0)  ;;  %s7297_s13 = sld [smem:[#allocation16_spill]] (!%p538_p0)  ;;  %v596_v15 = vstv (!%p538_p0), %s595_s22  ;;  %s643_s19 = sadd.s32 (!%p538_p0), 7, %s6241_s4 }
  0x30   : > { %v5765_v9 = vpack.c.bf16 %v652_v6, %v651_v2  ;;  %v5768_v14 = vpack.c.bf16 %v654_v11, %v653_v10  ;;  %s6276_s27 = sld [smem:[#allocation3 + %s629_s2]]  ;;  %vm597_vm4 = vcmp.eq.s32.totalorder %v590_v12, %v596_v15  ;;  %v655_v17 = vld [vmem:[%s7296_s24 + $0x30] sm:$0x3]  ;;  %v4830_v2 = vld [vmem:[%s7251_s6] ss:$0 sm:$0xff] }
  0x31   : > { %5763 = vmatpush3.bf16.msra.mxu0 %v5762_v5  ;;  %s6279_s1 = sld [smem:[#allocation3 + %s636_s20]]  ;;  %v603_v16 = vstv %s6252_s26  ;;  %vm598_vm6 = vmand %vm593_vm1, %vm597_vm4 }
  0x32   : > { %5764 = vmatprep.subr.bf16.mxu0 %v6071_v4  ;;  %s6283_s25 = sld [smem:[#allocation3 + %s643_s19]]  ;;  %vm604_vm7 = vcmp.eq.s32.totalorder %v590_v12, %v603_v16  ;;  %v610_v18 = vstv %s6261_s30  ;;  %v599_v19 = vsel %vm598_vm6, 1.0, %v6072_v7 }
  0x33   : > { %vm605_vm9 = vmand %vm600_vm2, %vm604_vm7  ;;  %vm611_vm10 = vcmp.eq.s32.totalorder %v590_v12, %v610_v18  ;;  %v617_v20 = vstv %s6266_s23  ;;  %vm635_vm2 = vcmp.eq.s32.totalorder %v6246_v8, 6  ;;  %vm642_vm7 = vcmp.eq.s32.totalorder %v6246_v8, 7  ;;  %s7300_s22 = sld [smem:[#allocation18_spill]]  ;;  %s7301_s5 = sld [smem:[#allocation19_spill]] }
  0x34   : > { %v606_v21 = vsel %vm605_vm9, 1.0, %v599_v19  ;;  %vm612_vm12 = vmand %vm607_vm3, %vm611_vm10  ;;  %vm618_vm13 = vcmp.eq.s32.totalorder %v590_v12, %v617_v20  ;;  %v624_v22 = vstv %s6270_s0  ;;  %s7302_s19 = sld [smem:[#allocation20_spill]]  ;;  %s585_s23 = sand.u32 1, %s6060_s3  }
  0x35   : > { %v5814_v13 = vld [vmem:[%s7297_s13] sm:$0xff]   ;;  %5766 = vmatpush3.bf16.msra.mxu0 %v5765_v9  ;;  %v613_v23 = vsel %vm612_vm12, 1.0, %v606_v21  ;;  %vm619_vm15 = vmand %vm614_vm8, %vm618_vm13  ;;  %vm625_vm1 = vcmp.eq.s32.totalorder %v590_v12, %v624_v22  ;;  %vm656_vm12 = vcmask 408576   ;;  %v5816_v33 = vld [vmem:[%s7297_s13 + $0x8] sm:$0xff]   ;;  %vm1503_vm13 = vcmask 64512   ;;  %s4810_s0 = sshll.u32 %s585_s23, 3 }
  0x36   : > { %5767 = vmatprep.subr.bf16.mxu0 %v6071_v4  ;;  %5418 = vmatpush3.bf16.msra.mxu1 %v5814_v13  ;;  %v631_v24 = vstv %s6276_s27  ;;  %v620_v25 = vsel %vm619_vm15, 1.0, %v613_v23  ;;  %vm626_vm4 = vmand %vm621_vm11, %vm625_vm1  ;;  %v5815_v27 = vld [vmem:[%s7297_s13 + $0x20] sm:$0xff]   ;;  %v5817_v34 = vld [vmem:[%s7297_s13 + $0x28] sm:$0xff]   ;;  %s587_s29 = scalar_lea.vmem [#allocation4], %s4810_s0  ;;  %s7304_s30 = sld [smem:[#allocation22_spill]] }
  0x37   : > { %5419 = vmatprep.subr.bf16.mxu1 %v6072_v7  ;;  %vm632_vm6 = vcmp.eq.s32.totalorder %v590_v12, %v631_v24  ;;  %v638_v26 = vstv %s6279_s1  ;;  %v627_v28 = vsel %vm626_vm4, 1.0, %v620_v25  ;;  %v5818_v36 = vld [vmem:[%s7297_s13 + $0x10] sm:$0xff]   ;;  %v5820_v40 = vld [vmem:[%s7297_s13 + $0x18] sm:$0xff]   ;;  %s4760_s20 = sshll.u32 %s587_s29, 4  ;;  %s4747_s2 = scalar_lea.sflag [#allocation5], %s585_s23  ;;  %s7205_s20 = int_to_ptr.vmem [resolvable:$true] %s4760_s20 }
  0x38   : > { %vm633_vm3 = vmand %vm628_vm14, %vm632_vm6  ;;  %vm639_vm9 = vcmp.eq.s32.totalorder %v590_v12, %v638_v26  ;;  %v645_v29 = vstv %s6283_s25  ;;  %s7298_s25 = sld [smem:[#allocation17_spill]]  ;;  %v5822_v42 = vld [vmem:[%s7297_s13 + $0x30] sm:$0xff]   ;;  %v5824_v44 = vld [vmem:[%s7297_s13 + $0x38] sm:$0xff]   ;;  %vm1743_vm14 = vcmask 1043456   ;;  %s6004_s1 = scalar_lea.vmem %s7205_s20, 128 }
  0x39   : > { %5769 = vmatpush3.bf16.msra.mxu0 %v5768_v14  ;;  %v634_v30 = vsel %vm633_vm3, 1.0, %v627_v28  ;;  %vm640_vm8 = vmand %vm635_vm2, %vm639_vm9  ;;  %vm646_vm10 = vcmp.eq.s32.totalorder %v590_v12, %v645_v29  ;;  %v5827_v47 = vld [vmem:[%s7300_s22] sm:$0xff]   ;;  %v5829_v49 = vld [vmem:[%s7300_s22 + $0x8] sm:$0xff]   ;;  %p6005_p1 = scmp.ne.s32.totalorder %s7205_s20, %s6004_s1  ;;  %s6075_s0 = smov [#allocation4]  }
  0x3a   : > { %5412 = vmatprep.subr.mxu0 %v6072_v7  ;;  %v641_v31 = vsel %vm640_vm8, 1.0, %v634_v30  ;;  %vm647_vm11 = vmand %vm642_vm7, %vm646_vm10  ;;  %5420 = vmatpush3.bf16.msra.mxu1 %v5816_v33  ;;  %v5831_v51 = vld [vmem:[%s7300_s22 + $0x20] sm:$0xff]   ;;  %v5833_v53 = vld [vmem:[%s7300_s22 + $0x28] sm:$0xff]  }
  0x3b   : > { %v648_v32 = vsel %vm647_vm11, 1.0, %v641_v31  ;;  %5425 = vmatprep.subr.bf16.mxu1 %v6072_v7  ;;  %v5834_v54 = vld [vmem:[%s7300_s22 + $0x10] sm:$0xff]   ;;  %v5835_v55 = vld [vmem:[%s7300_s22 + $0x18] sm:$0xff]   ;;  %v4814_v15 = vld [vmem:[%s7301_s5] ss:$0 sm:$0xff]  ;;  %p6006_p2 = pnand %p6005_p1, %p6219_p10 }
  0x3c   : > { %v5836_v56 = vld [vmem:[%s7300_s22 + $0x30] sm:$0xff]   ;;  %v5837_v57 = vld [vmem:[%s7300_s22 + $0x38] sm:$0xff]   ;;  %v4816_v30 = vld [vmem:[%s7301_s5 + $0x2] ss:$0 sm:$0xff] }
  0x3d   : > { %5413 = vmatpush3.msk.msra.mxu0 %vm660_vm5, %v655_v17  ;;  %vm791_vm5 = vcmask 261120   ;;  %v4832_v17 = vld [vmem:[%s7251_s6 + $0x2] ss:$0 sm:$0xff]  ;;  %v4846_v33 = vld [vmem:[%s7252_s7] ss:$0 sm:$0xff]  ;;  %p6007_p3 = pneg %p6006_p2 }
  0x3e   : > { %5433 = vmatprep.subr.bf16.mxu0 %v6072_v7  ;;  %5415 = vmatmul.mubr.msk.f32.vlgmr.msra.gmra.mrb[0].mxu0 %vm656_vm12, %v648_v32  ;;  %s7299_s28 = smov %s7298_s25  ;;  %v5819_v37 = vld [vmem:[%s7298_s25] sm:$0xff]   ;;  %s7303_s25 = sld [smem:[#allocation21_spill]] }
  0x3f   : > { %5434 = vmatpush3.bf16.msra.mxu0 %v5815_v27  ;;  %5437 = vmatprep.mubr.msk.bf16.mxu0 %vm6073_vm0, %v6072_v7  ;;  %v5821_v41 = vld [vmem:[%s7299_s28 + $0x8] sm:$0xff]   ;;  %v5823_v43 = vld [vmem:[%s7299_s28 + $0x20] sm:$0xff]   ;;  %v5826_v46 = vld [vmem:[%s7299_s28 + $0x10] sm:$0xff]  }
  0x40   : > { %5435 = vmatprep.subr.bf16.mxu0 %v6072_v7  ;;  %v5825_v45 = vld [vmem:[%s7299_s28 + $0x28] sm:$0xff]   ;;  %v5828_v48 = vld [vmem:[%s7299_s28 + $0x18] sm:$0xff]   ;;  %v5830_v50 = vld [vmem:[%s7299_s28 + $0x30] sm:$0xff]  }
  0x41   : > { %v5832_v52 = vld [vmem:[%s7299_s28 + $0x38] sm:$0xff]   ;;  %v4831_v32 = vld [vmem:[%s7251_s6 + $0x1] ss:$0 sm:$0xff] }
  0x43   : > { %5436 = vmatpush3.bf16.msra.mxu0 %v5817_v34 }
  0x44   : > { %5449 = vmatprep.subr.bf16.mxu0 %v6072_v7 }
 0x111   : > { %v6324_v35 = vpop.f32.mrb[0].mxu0 }
 0x112   : > { %v6334_v38 = vpack.c.bf16 %v6324_v35, %v6324_v35  ;;  %v5416_v39 = vpop.f32.mrb[1].mxu0 }
 0x114   : > { %5422 = vmatmul.mubr.msk.bf16.vlgmr.msra.gmra.mrb[0].mxu1 %vm791_vm5, %v6334_v38  ;;  %5438 = vmatmul.mubr.msk.bf16.vlgmr.msra.gmra.mrb[4].mxu0 %vm791_vm5, %v6334_v38 }
 0x115   : > { %5426 = vmatpush3.bf16.msra.mxu1 %v5818_v36  ;;  %5450 = vmatpush3.bf16.msra.mxu0 %v5819_v37 }
 0x116   : > { %5427 = vmatprep.subr.bf16.mxu1 %v6072_v7  ;;  %5451 = vmatprep.subr.bf16.mxu0 %v6072_v7 }
 0x117   : > { %5429 = vmatprep.mubr.msk.bf16.mxu1 %vm6073_vm0, %v6072_v7  ;;  %5453 = vmatprep.mubr.msk.bf16.mxu0 %vm6073_vm0, %v6072_v7 }
 0x119   : > { %5428 = vmatpush3.bf16.msra.mxu1 %v5820_v40  ;;  %5452 = vmatpush3.bf16.msra.mxu0 %v5821_v41 }
 0x11a   : > { %5441 = vmatprep.subr.bf16.mxu1 %v6072_v7  ;;  %5465 = vmatprep.subr.bf16.mxu0 %v6072_v7 }
 0x11c   : > { %5430 = vmatmul.mubr.msk.bf16.vlgmr.msra.gmra.mrb[4].mxu1 %vm791_vm5, %v6334_v38  ;;  %5454 = vmatmul.mubr.msk.bf16.vlgmr.msra.gmra.mrb[8].mxu0 %vm791_vm5, %v6334_v38 }
 0x11d   : > { %5442 = vmatpush3.bf16.msra.mxu1 %v5822_v42  ;;  %5466 = vmatpush3.bf16.msra.mxu0 %v5823_v43 }
 0x11e   : > { %5443 = vmatprep.subr.bf16.mxu1 %v6072_v7  ;;  %5467 = vmatprep.subr.bf16.mxu0 %v6072_v7 }
 0x11f   : > { %5445 = vmatprep.mubr.msk.bf16.mxu1 %vm6073_vm0, %v6072_v7  ;;  %5469 = vmatprep.mubr.msk.bf16.mxu0 %vm6073_vm0, %v6072_v7 }
 0x121   : > { %5444 = vmatpush3.bf16.msra.mxu1 %v5824_v44  ;;  %5468 = vmatpush3.bf16.msra.mxu0 %v5825_v45 }
 0x122   : > { %5457 = vmatprep.subr.bf16.mxu1 %v6072_v7  ;;  %5481 = vmatprep.subr.bf16.mxu0 %v6072_v7 }
 0x124   : > { %5446 = vmatmul.mubr.msk.bf16.vlgmr.msra.gmra.mrb[8].mxu1 %vm791_vm5, %v6334_v38  ;;  %5470 = vmatmul.mubr.msk.bf16.vlgmr.msra.gmra.mrb[12].mxu0 %vm791_vm5, %v6334_v38 }
 0x125   : > { %5458 = vmatpush3.bf16.msra.mxu1 %v5826_v46  ;;  %5482 = vmatpush3.bf16.msra.mxu0 %v5827_v47 }
 0x126   : > { %5459 = vmatprep.subr.bf16.mxu1 %v6072_v7  ;;  %5483 = vmatprep.subr.bf16.mxu0 %v6072_v7 }
 0x127   : > { %5461 = vmatprep.mubr.msk.bf16.mxu1 %vm6073_vm0, %v6072_v7  ;;  %5485 = vmatprep.mubr.msk.bf16.mxu0 %vm6073_vm0, %v6072_v7 }
 0x129   : > { %5460 = vmatpush3.bf16.msra.mxu1 %v5828_v48  ;;  %5484 = vmatpush3.bf16.msra.mxu0 %v5829_v49  ;;  %v4815_v49 = vld [vmem:[%s7301_s5 + $0x1] ss:$0 sm:$0xff] }
 0x12a   : > { %5473 = vmatprep.subr.bf16.mxu1 %v6072_v7  ;;  %5497 = vmatprep.subr.bf16.mxu0 %v6072_v7 }
 0x12c   : > { %5462 = vmatmul.mubr.msk.bf16.vlgmr.msra.gmra.mrb[12].mxu1 %vm791_vm5, %v6334_v38  ;;  %5486 = vmatmul.mubr.msk.bf16.vlgmr.msra.gmra.mrb[16].mxu0 %vm791_vm5, %v6334_v38 }
 0x12d   : > { %5474 = vmatpush3.bf16.msra.mxu1 %v5830_v50  ;;  %5498 = vmatpush3.bf16.msra.mxu0 %v5831_v51 }
 0x12e   : > { %5475 = vmatprep.subr.bf16.mxu1 %v6072_v7  ;;  %5499 = vmatprep.subr.bf16.mxu0 %v6072_v7 }
 0x12f   : > { %5477 = vmatprep.mubr.msk.bf16.mxu1 %vm6073_vm0, %v6072_v7  ;;  %5501 = vmatprep.mubr.msk.bf16.mxu0 %vm6073_vm0, %v6072_v7 }
 0x131   : > { %5476 = vmatpush3.bf16.msra.mxu1 %v5832_v52  ;;  %5500 = vmatpush3.bf16.msra.mxu0 %v5833_v53  ;;  %v4833_v52 = vld [vmem:[%s7251_s6 + $0x3] ss:$0 sm:$0xff] }
 0x132   : > { %5489 = vmatprep.subr.bf16.mxu1 %v6072_v7  ;;  %5513 = vmatprep.subr.bf16.mxu0 %v6072_v7 }
 0x134   : > { %5478 = vmatmul.mubr.msk.bf16.vlgmr.msra.gmra.mrb[16].mxu1 %vm791_vm5, %v6334_v38  ;;  %5502 = vmatmul.mubr.msk.bf16.vlgmr.msra.gmra.mrb[20].mxu0 %vm791_vm5, %v6334_v38 }
 0x135   : > { %5490 = vmatpush3.bf16.msra.mxu1 %v5834_v54  ;;  %5493 = vmatprep.mubr.msk.bf16.mxu1 %vm6073_vm0, %v6072_v7 }
 0x136   : > { %5491 = vmatprep.subr.bf16.mxu1 %v6072_v7  ;;  %5515 = vmatprep.mubr.msk.bf16.mxu0 %vm6073_vm0, %v6072_v7 }
 0x139   : > { %5492 = vmatpush3.bf16.msra.mxu1 %v5835_v55 }
 0x13a   : > { %5505 = vmatprep.subr.bf16.mxu1 %v6072_v7 }
 0x13c   : > { %5494 = vmatmul.mubr.msk.bf16.vlgmr.msra.gmra.mrb[20].mxu1 %vm791_vm5, %v6334_v38 }
 0x13d   : > { %5506 = vmatpush3.bf16.msra.mxu1 %v5836_v56  ;;  %5509 = vmatprep.mubr.msk.bf16.mxu1 %vm6073_vm0, %v6072_v7 }
 0x13e   : > { %5507 = vmatprep.subr.bf16.mxu1 %v6072_v7 }
 0x141   : > { %5508 = vmatpush3.bf16.msra.mxu1 %v5837_v57 }
 0x142   : > { %5519 = vmatprep.subr.bf16.mxu1 %v6072_v7 }
 0x144   : > { %5510 = vmatmul.mubr.msk.bf16.vlgmr.msra.gmra.mrb[24].mxu1 %vm791_vm5, %v6334_v38 }
 0x145   : > { %5521 = vmatprep.mubr.msk.bf16.mxu1 %vm6073_vm0, %v6072_v7 }
 0x1e7   : > { %v829_v58 = vpop.f32.mrb[0].mxu1  ;;  %v933_v59 = vpop.f32.mrb[4].mxu0 }
 0x1e8   : > { %v5423_v60 = vpop.f32.mrb[1].mxu1  ;;  %v5439_v61 = vpop.f32.mrb[5].mxu0  ;;  %v830_v18 = vadd.f32 %v4814_v15, %v829_v58  ;;  %v934_v34 = vadd.f32 %v4816_v30, %v933_v59 }
 0x1e9   : > { %v832_v62 = vpop.f32.mrb[2].mxu1  ;;  %v936_v63 = vpop.f32.mrb[6].mxu0 }
 0x1ea   : > { %v5424_v0 = vpop.f32.mrb[3].mxu1  ;;  %v5440_v1 = vpop.f32.mrb[7].mxu0  ;;  %v1495_v26 = vpack.c.bf16 %v830_v18, %v830_v18  ;;  %v1497_v44 = vpack.c.bf16 %v934_v34, %v934_v34 }
 0x1eb   : > { %v4817_v1 = vld [vmem:[%s7301_s5 + $0x3] ss:$0 sm:$0xff] }
 0x1ef   : > { %v881_v3 = vpop.f32.mrb[4].mxu1  ;;  %v1081_v4 = vpop.f32.mrb[8].mxu0 }
 0x1f0   : > { %v1082_v5 = vadd.f32 %v4830_v2, %v1081_v4  ;;  %v5431_v6 = vpop.f32.mrb[5].mxu1  ;;  %v5455_v9 = vpop.f32.mrb[9].mxu0  ;;  %v882_v53 = vadd.f32 %v4815_v49, %v881_v3  ;;  %v4847_v3 = vld [vmem:[%s7252_s7 + $0x1] ss:$0 sm:$0xff] }
 0x1f1   : > { %v884_v10 = vpop.f32.mrb[6].mxu1  ;;  %v1084_v11 = vpop.f32.mrb[10].mxu0 }
 0x1f2   : > { %v1499_v12 = vpack.c.bf16 %v1082_v5, %v1082_v5  ;;  %v5432_v13 = vpop.f32.mrb[7].mxu1  ;;  %v5456_v14 = vpop.f32.mrb[11].mxu0  ;;  %v1496_v61 = vpack.c.bf16 %v882_v53, %v882_v53 }
 0x1f4   : > { %v1508_v16 = vsel %vm1503_vm13, %v1499_v12, 0 }
 0x1f5   : > { %5514 = vmatpush3.bf16.xpose.msra.mxu0 %v1508_v16 }
 0x1f6   : > { %5525 = vmatprep.subr.bf16.mxu0 %v6072_v7 }
 0x1f7   : > { %v985_v19 = vpop.f32.mrb[8].mxu1  ;;  %v1185_v20 = vpop.f32.mrb[12].mxu0 }
 0x1f8   : > { %v1186_v21 = vadd.f32 %v4832_v17, %v1185_v20  ;;  %v5447_v22 = vpop.f32.mrb[9].mxu1  ;;  %v5471_v23 = vpop.f32.mrb[13].mxu0  ;;  %v986_v4 = vadd.f32 %v4817_v1, %v985_v19 }
 0x1f9   : > { %v988_v24 = vpop.f32.mrb[10].mxu1  ;;  %v1188_v25 = vpop.f32.mrb[14].mxu0 }
 0x1fa   : > { %v1501_v27 = vpack.c.bf16 %v1186_v21, %v1186_v21  ;;  %v5448_v28 = vpop.f32.mrb[11].mxu1  ;;  %v5472_v29 = vpop.f32.mrb[15].mxu0  ;;  %v1498_v11 = vpack.c.bf16 %v986_v4, %v986_v4 }
 0x1fc   : > { %v1600_v31 = vsel %vm1503_vm13, %v1501_v27, 0  ;;  %5516 = vmatmul.mubr.msk.bf16.vlgmr.msra.gmra.mrb[24].mxu0 %vm1503_vm13, %v1495_v26 }
 0x1fd   : > { %5526 = vmatpush3.bf16.xpose.msra.mxu0 %v1600_v31  ;;  %5527 = vmatprep.mubr.msk.bf16.mxu0 %vm6073_vm0, %v6072_v7 }
 0x1fe   : > { %5537 = vmatprep.subr.bf16.mxu0 %v6072_v7 }
 0x1ff   : > { %v1133_v36 = vpop.f32.mrb[12].mxu1  ;;  %v1333_v37 = vpop.f32.mrb[16].mxu0 }
 0x200   : > { %v1134_v38 = vadd.f32 %v4831_v32, %v1133_v36  ;;  %v1334_v39 = vadd.f32 %v4846_v33, %v1333_v37  ;;  %v5463_v40 = vpop.f32.mrb[13].mxu1  ;;  %v5487_v41 = vpop.f32.mrb[17].mxu0 }
 0x201   : > { %v1136_v42 = vpop.f32.mrb[14].mxu1  ;;  %v1336_v43 = vpop.f32.mrb[18].mxu0 }
 0x202   : > { %v1500_v45 = vpack.c.bf16 %v1134_v38, %v1134_v38  ;;  %v1736_v46 = vpack.c.bf16 %v1334_v39, %v1334_v39  ;;  %v5464_v47 = vpop.f32.mrb[15].mxu1  ;;  %v5488_v48 = vpop.f32.mrb[19].mxu0 }
 0x204   : > { %v1554_v50 = vsel %vm1503_vm13, %v1500_v45, 0  ;;  %v1745_v51 = vsel %vm1743_vm14, %v1736_v46, 0  ;;  %5528 = vmatmul.mubr.msk.bf16.vlgmr.msra.gmra.mrb[28].mxu0 %vm1503_vm13, %v1497_v44 }
 0x205   : > { %5520 = vmatpush3.bf16.xpose.msra.mxu1 %v1554_v50  ;;  %5538 = vmatpush3.bf16.msra.mxu0 %v1745_v51 }
 0x206   : > { %5531 = vmatprep.subr.bf16.mxu1 %v6072_v7  ;;  %5539 = vmatprep.mubr.msk.bf16.mxu0 %vm6073_vm0, %v6072_v7 }
 0x207   : > { %v1237_v54 = vpop.f32.mrb[16].mxu1  ;;  %v6495_v55 = vpop.f32.mrb[20].mxu0  ;;  %5549 = vmatprep.subr.bf16.mxu0 %v6072_v7 }
 0x208   : > { %v1238_v56 = vadd.f32 %v4833_v52, %v1237_v54  ;;  %v5479_v57 = vpop.f32.mrb[17].mxu1  ;;  %v5503_v58 = vpop.f32.mrb[21].mxu0 }
 0x209   : > { %v1240_v59 = vpop.f32.mrb[18].mxu1  ;;  %v1440_v60 = vpop.f32.mrb[22].mxu0 }
 0x20a   : > { %v1502_v62 = vpack.c.bf16 %v1238_v56, %v1238_v56  ;;  %v5480_v63 = vpop.f32.mrb[19].mxu1  ;;  %v5504_v0 = vpop.f32.mrb[23].mxu0 }
 0x20c   : > { %v1646_v2 = vsel %vm1503_vm13, %v1502_v62, 0  ;;  %5522 = vmatmul.mubr.msk.bf16.vlgmr.msra.gmra.mrb[28].mxu1 %vm1503_vm13, %v1496_v61  ;;  %v4848_v62 = vld [vmem:[%s7252_s7 + $0x2] ss:$0 sm:$0xff] }
 0x20d   : > { %5532 = vmatpush3.bf16.xpose.msra.mxu1 %v1646_v2  ;;  %5533 = vmatprep.mubr.msk.bf16.mxu1 %vm6073_vm0, %v6072_v7  ;;  %v1438_v63 = vadd.f32 %v4848_v62, %v6495_v55 }
 0x20e   : > { %5543 = vmatprep.subr.bf16.mxu1 %v6072_v7 }
 0x20f   : > { %v1385_v5 = vpop.f32.mrb[20].mxu1  ;;  %v1738_v2 = vpack.c.bf16 %v1438_v63, %v1438_v63 }
 0x210   : > { %v1386_v6 = vadd.f32 %v4847_v3, %v1385_v5  ;;  %v5495_v9 = vpop.f32.mrb[21].mxu1 }
 0x211   : > { %v1388_v10 = vpop.f32.mrb[22].mxu1  ;;  %v1837_v5 = vsel %vm1743_vm14, %v1738_v2, 0 }
 0x212   : > { %v1737_v12 = vpack.c.bf16 %v1386_v6, %v1386_v6  ;;  %v5496_v13 = vpop.f32.mrb[23].mxu1  ;;  %v4849_v10 = vld [vmem:[%s7252_s7 + $0x3] ss:$0 sm:$0xff] }
 0x214   : > { %v1791_v14 = vsel %vm1743_vm14, %v1737_v12, 0  ;;  %5534 = vmatmul.mubr.msk.bf16.vlgmr.msra.gmra.mrb[32].mxu1 %vm1503_vm13, %v1498_v11 }
 0x215   : > { %5544 = vmatpush3.bf16.msra.mxu1 %v1791_v14  ;;  %5545 = vmatprep.mubr.msk.bf16.mxu1 %vm6073_vm0, %v6072_v7 }
 0x216   : > { %5555 = vmatprep.subr.bf16.mxu1 %v6072_v7 }
 0x217   : > { %v6514_v15 = vpop.f32.mrb[24].mxu1 }
 0x218   : > { %v5511_v16 = vpop.f32.mrb[25].mxu1  ;;  %v1490_v12 = vadd.f32 %v4849_v10, %v6514_v15 }
 0x219   : > { %v1492_v17 = vpop.f32.mrb[26].mxu1 }
 0x21a   : > { %v5512_v18 = vpop.f32.mrb[27].mxu1  ;;  %v1739_v16 = vpack.c.bf16 %v1490_v12, %v1490_v12 }
 0x2cf   : > { %v1544_v19 = vpop.f32.mrb[24].mxu0 }
 0x2d0   : > { %v5517_v20 = vpop.f32.mrb[25].mxu0  ;;  %v1688_v21 = vsel %vm1503_vm13, %v1544_v19, -inf }
 0x2d1   : > { %1689 = vmax.xlane.f32.xlu0 %v1688_v21  ;;  %v1547_v22 = vpop.f32.mrb[26].mxu0 }
 0x2d2   : > { %v5518_v23 = vpop.f32.mrb[27].mxu0  ;;  %v1929_v22 = vld [vmem:[%s7253_s8] sm:$0xf] }
 0x2d3   : > { %v1937_v23 = vsel %vm1743_vm14, %v1929_v22, 0  ;;  %v5843_v22 = vld [vmem:[%s7257_s12 + $0xc] ss:$16 sps:$4 sm:$0xff]  }
 0x2d7   : > { %v1636_v24 = vpop.f32.mrb[28].mxu0 }
 0x2d8   : > { %v5529_v25 = vpop.f32.mrb[29].mxu0  ;;  %v1694_v26 = vsel %vm1503_vm13, %v1636_v24, -inf }
 0x2d9   : > { %1695 = vmax.xlane.f32.xlu1 %v1694_v26  ;;  %v1639_v27 = vpop.f32.mrb[30].mxu0  ;;  %v1931_v26 = vld [vmem:[%s7253_s8 + $0x8] sm:$0xf] }
 0x2da   : > { %v5530_v28 = vpop.f32.mrb[31].mxu0 }
 0x2df   : > { %v1590_v29 = vpop.f32.mrb[28].mxu1 }
 0x2e0   : > { %v5523_v30 = vpop.f32.mrb[29].mxu1  ;;  %v1691_v31 = vsel %vm1503_vm13, %v1590_v29, -inf }
 0x2e1   : > { %v1593_v32 = vpop.f32.mrb[30].mxu1  ;;  %1692 = vmax.xlane.f32.xlu0 %v1691_v31  ;;  %v2029_v30 = vsel %vm1743_vm14, %v1931_v26, 0  ;;  %v5847_v26 = vld [vmem:[%s7257_s12 + $0x28] ss:$16 sps:$4 sm:$0xff]  }
 0x2e2   : > { %v5524_v33 = vpop.f32.mrb[31].mxu1 }
 0x2e7   : > { %v1682_v34 = vpop.f32.mrb[32].mxu1 }
 0x2e8   : > { %v5535_v36 = vpop.f32.mrb[33].mxu1  ;;  %v1697_v37 = vsel %vm1503_vm13, %v1682_v34, -inf }
 0x2e9   : > { %v1685_v38 = vpop.f32.mrb[34].mxu1  ;;  %1698 = vmax.xlane.f32.xlu1 %v1697_v37 }
 0x2ea   : > { %v5536_v39 = vpop.f32.mrb[35].mxu1 }
 0x2eb   : > { %v1932_v39 = vld [vmem:[%s7253_s8 + $0xc] sm:$0xf] }
 0x35e   : > { %v1690_v40 = vpop.xlane.xlu0 %1689 }
 0x35f   : > { %v1700_v41 = vsub.f32 %v1544_v19, %v1690_v40  ;;  %v1883_v19 = vsel %vm1743_vm14, %v1739_v16, 0 }
 0x361   : > { %v1704_v42 = vmul.f32 1.442695, %v1700_v41 }
 0x363   : > { %5952 = vpow2.f32 %v1704_v42 }
 0x366   : > { %v1696_v43 = vpop.xlane.xlu1 %1695 }
 0x367   : > { %v1702_v44 = vsub.f32 %v1636_v24, %v1696_v43  ;;  %v1930_v24 = vld [vmem:[%s7253_s8 + $0x4] sm:$0xf]  ;;  %v2075_v43 = vsel %vm1743_vm14, %v1932_v39, 0 }
 0x368   : > { %v1983_v25 = vsel %vm1743_vm14, %v1930_v24, 0  ;;  %v5844_v24 = vld [vmem:[%s7257_s12 + $0x20] ss:$16 sps:$4 sm:$0xff]  }
 0x369   : > { %v1708_v45 = vmul.f32 1.442695, %v1702_v44 }
 0x36b   : > { %5954 = vpow2.f32 %v1708_v45 }
 0x36d   : > { %v5953_v46 = vpop.eup %5952 }
 0x36e   : > { %v1693_v47 = vpop.xlane.xlu0 %1692  ;;  %v1712_v48 = vsel %vm1503_vm13, %v5953_v46, 0.0 }
 0x36f   : > { %v1701_v49 = vsub.f32 %v1590_v29, %v1693_v47  ;;  %1713 = vadd.xlane.f32.xlu0 %v1712_v48 }
 0x371   : > { %v1706_v50 = vmul.f32 1.442695, %v1701_v49 }
 0x373   : > { %5956 = vpow2.f32 %v1706_v50 }
 0x375   : > { %v5955_v51 = vpop.eup %5954 }
 0x376   : > { %v1699_v52 = vpop.xlane.xlu1 %1698  ;;  %v1718_v53 = vsel %vm1503_vm13, %v5955_v51, 0.0 }
 0x377   : > { %v1703_v54 = vsub.f32 %v1682_v34, %v1699_v52  ;;  %1719 = vadd.xlane.f32.xlu0 %v1718_v53 }
 0x379   : > { %v1710_v56 = vmul.f32 1.442695, %v1703_v54 }
 0x37b   : > { %5958 = vpow2.f32 %v1710_v56 }
 0x37d   : > { %v5957_v57 = vpop.eup %5956 }
 0x37e   : > { %v1715_v58 = vsel %vm1503_vm13, %v5957_v57, 0.0 }
 0x37f   : > { %1716 = vadd.xlane.f32.xlu1 %v1715_v58 }
 0x385   : > { %v5959_v59 = vpop.eup %5958 }
 0x386   : > { %v1721_v60 = vsel %vm1503_vm13, %v5959_v59, 0.0 }
 0x387   : > { %1722 = vadd.xlane.f32.xlu1 %v1721_v60 }
 0x3fc   : > { %v1714_v61 = vpop.xlane.xlu0 %1713 }
 0x3fd   : > { %5960 = vrcp.f32 %v1714_v61 }
 0x404   : > { %v1720_v0 = vpop.xlane.xlu0 %1719 }
 0x405   : > { %5962 = vrcp.f32 %v1720_v0 }
 0x407   : > { %v5961_v1 = vpop.eup %5960 }
 0x408   : > { %v1728_v3 = vmul.f32 %v5961_v1, %v5953_v46 }
 0x40a   : > { %v1732_v4 = vpack.c.bf16 %v1728_v3, %v1728_v3 }
 0x40c   : > { %5540 = vmatmul.mubr.msk.bf16.vlgmr.msra.gmra.mrb[32].mxu0 %vm1503_vm13, %v1732_v4  ;;  %v1717_v6 = vpop.xlane.xlu1 %1716 }
 0x40d   : > { %5550 = vmatpush3.bf16.msra.mxu0 %v1837_v5  ;;  %5964 = vrcp.f32 %v1717_v6  ;;  %5551 = vmatprep.mubr.msk.bf16.mxu0 %vm6073_vm0, %v6072_v7 }
 0x40e   : > { %5561 = vmatprep.subr.bf16.mxu0 %v6072_v7 }
 0x40f   : > { %v5963_v9 = vpop.eup %5962 }
 0x410   : > { %v1730_v55 = vmul.f32 %v5963_v9, %v5955_v51  ;;  %v4874_v9 = vld [vmem:[%s7254_s9] ss:$0 sm:$0xff] }
 0x412   : > { %v1734_v11 = vpack.c.bf16 %v1730_v55, %v1730_v55 }
 0x414   : > { %5552 = vmatmul.mubr.msk.bf16.vlgmr.msra.gmra.mrb[36].mxu0 %vm1503_vm13, %v1734_v11  ;;  %v1723_v13 = vpop.xlane.xlu1 %1722 }
 0x415   : > { %5966 = vrcp.f32 %v1723_v13  ;;  %5563 = vmatprep.mubr.msk.bf16.mxu0 %vm6073_vm0, %v6072_v7  ;;  %5562 = vmatpush3.bf16.msra.mxu0 %v1937_v23  ;;  %v5841_v23 = vld [vmem:[%s7257_s12 + $0x8] ss:$16 sps:$4 sm:$0xff]  }
 0x416   : > { %5573 = vmatprep.subr.bf16.mxu0 %v6072_v7 }
 0x417   : > { %v5965_v14 = vpop.eup %5964 }
 0x418   : > { %v1729_v17 = vmul.f32 %v5965_v14, %v5957_v57 }
 0x41a   : > { %v1733_v18 = vpack.c.bf16 %v1729_v17, %v1729_v17 }
 0x41c   : > { %5546 = vmatmul.mubr.msk.bf16.vlgmr.msra.gmra.mrb[36].mxu1 %vm1503_vm13, %v1733_v18 }
 0x41d   : > { %5556 = vmatpush3.bf16.msra.mxu1 %v1883_v19  ;;  %5557 = vmatprep.mubr.msk.bf16.mxu1 %vm6073_vm0, %v6072_v7 }
 0x41e   : > { %5567 = vmatprep.subr.bf16.mxu1 %v6072_v7 }
 0x41f   : > { %v5967_v15 = vpop.eup %5966 }
 0x420   : > { %v1731_v20 = vmul.f32 %v5967_v15, %v5959_v59 }
 0x422   : > { %v1735_v21 = vpack.c.bf16 %v1731_v20, %v1731_v20 }
 0x424   : > { %5558 = vmatmul.mubr.msk.bf16.vlgmr.msra.gmra.mrb[40].mxu1 %vm1503_vm13, %v1735_v21  ;;  %v5840_v21 = vld [vmem:[%s7257_s12 + $0x4] ss:$16 sps:$4 sm:$0xff]  }
 0x425   : > { %5569 = vmatprep.mubr.msk.bf16.mxu1 %vm6073_vm0, %v6072_v7  ;;  %5568 = vmatpush3.bf16.msra.mxu1 %v1983_v25  ;;  %v5846_v25 = vld [vmem:[%s7257_s12 + $0x24] ss:$16 sps:$4 sm:$0xff]  }
 0x426   : > { %5579 = vmatprep.subr.bf16.mxu1 %v6072_v7 }
 0x4df   : > { %v1781_v27 = vpop.f32.mrb[32].mxu0 }
 0x4e0   : > { %v1925_v28 = vpack.c.bf16 %v1781_v27, %v1781_v27  ;;  %v5541_v29 = vpop.f32.mrb[33].mxu0  ;;  %v5849_v27 = vld [vmem:[%s7257_s12 + $0x2c] ss:$16 sps:$4 sm:$0xff]  }
 0x4e1   : > { %v1784_v31 = vpop.f32.mrb[34].mxu0  ;;  %v5850_v29 = vld [vmem:[%s7259_s14 + $0x40] sm:$0xff]  }
 0x4e2   : > { %v5542_v32 = vpop.f32.mrb[35].mxu0  ;;  %5564 = vmatmul.mubr.msk.bf16.vlgmr.msra.gmra.mrb[40].mxu0 %vm1503_vm13, %v1925_v28  ;;  %v6074_v28 = vmov 0  }
 0x4e3   : > { %5574 = vmatpush3.bf16.msra.mxu0 %v2029_v30  ;;  %5575 = vmatprep.mubr.msk.bf16.mxu0 %vm6073_vm0, %v6072_v7  ;;  %v5851_v30 = vld [vmem:[%s7259_s14 + $0xc0] sm:$0xff]  }
 0x4e4   : > { %2237 = vmatprep.subr.bf16.mxu0 %v5840_v21 }
 0x4e7   : > { %v1873_v33 = vpop.f32.mrb[36].mxu0 }
 0x4e8   : > { %v1927_v34 = vpack.c.bf16 %v1873_v33, %v1873_v33  ;;  %v5553_v36 = vpop.f32.mrb[37].mxu0 }
 0x4e9   : > { %v1876_v37 = vpop.f32.mrb[38].mxu0  ;;  %v4875_v36 = vld [vmem:[%s7255_s10] ss:$0 sm:$0xff] }
 0x4ea   : > { %v5554_v38 = vpop.f32.mrb[39].mxu0  ;;  %5576 = vmatmul.mubr.msk.bf16.vlgmr.msra.gmra.mrb[44].mxu0 %vm1503_vm13, %v1927_v34 }
 0x4eb   : > { %2269 = vmatprep.mubr.bf16.mxu0 %v6074_v28  ;;  %v4876_v38 = vld [vmem:[%s7256_s11] ss:$0 sm:$0xff] }
 0x4ef   : > { %v1827_v40 = vpop.f32.mrb[36].mxu1 }
 0x4f0   : > { %v1926_v41 = vpack.c.bf16 %v1827_v40, %v1827_v40  ;;  %v5547_v42 = vpop.f32.mrb[37].mxu1 }
 0x4f1   : > { %v1830_v44 = vpop.f32.mrb[38].mxu1  ;;  %v5853_v42 = vld [vmem:[%s7259_s14 + $0x80] sm:$0xff]  }
 0x4f2   : > { %v5548_v45 = vpop.f32.mrb[39].mxu1  ;;  %5570 = vmatmul.mubr.msk.bf16.vlgmr.msra.gmra.mrb[44].mxu1 %vm1503_vm13, %v1926_v41  ;;  %v5852_v41 = vld [vmem:[%s7259_s14] sm:$0xff]   ;;  %v5854_v44 = vld [vmem:[%s7259_s14 + $0x48] sm:$0xff]  }
 0x4f3   : > { %5580 = vmatpush3.bf16.msra.mxu1 %v2075_v43  ;;  %5581 = vmatprep.mubr.msk.bf16.mxu1 %vm6073_vm0, %v6072_v7  ;;  %v5855_v45 = vld [vmem:[%s7259_s14 + $0xc8] sm:$0xff]  }
 0x4f4   : > { %2278 = vmatprep.subr.bf16.mxu1 %v5843_v22 }
 0x4f7   : > { %v1919_v46 = vpop.f32.mrb[40].mxu1 }
 0x4f8   : > { %v1928_v47 = vpack.c.bf16 %v1919_v46, %v1919_v46  ;;  %v5559_v48 = vpop.f32.mrb[41].mxu1  ;;  %v5856_v46 = vld [vmem:[%s7259_s14 + $0x8] sm:$0xff]  }
 0x4f9   : > { %v1922_v49 = vpop.f32.mrb[42].mxu1  ;;  %v5858_v48 = vld [vmem:[%s7259_s14 + $0x50] sm:$0xff]  }
 0x4fa   : > { %v5560_v50 = vpop.f32.mrb[43].mxu1  ;;  %5582 = vmatmul.mubr.msk.bf16.vlgmr.msra.gmra.mrb[48].mxu1 %vm1503_vm13, %v1928_v47  ;;  %v5857_v47 = vld [vmem:[%s7259_s14 + $0x88] sm:$0xff]   ;;  %v5859_v49 = vld [vmem:[%s7259_s14 + $0xd0] sm:$0xff]  }
 0x4fb   : > { %2279 = vmatpush1.bf16.msra.mxu1 %v5841_v23  ;;  %2310 = vmatprep.mubr.bf16.mxu1 %v6074_v28  ;;  %v5860_v50 = vld [vmem:[%s7259_s14 + $0x10] sm:$0xff]  }
 0x4fc   : > { %2280 = vmatprep.subr.bf16.mxu1 %v5849_v27 }
 0x4ff   : > { %2281 = vmatpush1.bf16.msra.mxu1 %v5847_v26 }
 0x500   : > { %5271 = vmatprep.subr.bf16.mxu1 %v5851_v30 }
 0x5b5   : > { %v1973_v51 = vpop.f32.mrb[40].mxu0 }
 0x5b6   : > { %v5565_v52 = vpop.f32.mrb[41].mxu0  ;;  %v2117_v61 = vsel %vm791_vm5, %v1973_v51, 0.0  ;;  %v5861_v51 = vld [vmem:[%s7259_s14 + $0x90] sm:$0xff]  }
 0x5b7   : > { %v1976_v53 = vpop.f32.mrb[42].mxu0  ;;  %v5862_v52 = vld [vmem:[%s7259_s14 + $0x58] sm:$0xff]  }
 0x5b8   : > { %v5566_v54 = vpop.f32.mrb[43].mxu0  ;;  %v5863_v53 = vld [vmem:[%s7259_s14 + $0xd8] sm:$0xff]  }
 0x5b9   : > { %v5864_v54 = vld [vmem:[%s7259_s14 + $0x18] sm:$0xff]  }
 0x5bd   : > { %v2065_v56 = vpop.f32.mrb[44].mxu0 }
 0x5be   : > { %v5577_v57 = vpop.f32.mrb[45].mxu0  ;;  %v2120_v2 = vsel %vm791_vm5, %v2065_v56, 0.0  ;;  %v5865_v56 = vld [vmem:[%s7259_s14 + $0x98] sm:$0xff]  }
 0x5bf   : > { %v2068_v58 = vpop.f32.mrb[46].mxu0  ;;  %v5866_v57 = vld [vmem:[%s7259_s14 + $0x60] sm:$0xff]  }
 0x5c0   : > { %v5578_v59 = vpop.f32.mrb[47].mxu0  ;;  %v5867_v58 = vld [vmem:[%s7259_s14 + $0xe0] sm:$0xff]  }
 0x5c1   : > { %v5868_v59 = vld [vmem:[%s7259_s14 + $0x20] sm:$0xff]  }
 0x5c5   : > { %v2019_v60 = vpop.f32.mrb[44].mxu1 }
 0x5c6   : > { %v2118_v62 = vsel %vm791_vm5, %v2019_v60, 0.0  ;;  %v5571_v63 = vpop.f32.mrb[45].mxu1  ;;  %v5869_v60 = vld [vmem:[%s7259_s14 + $0xa0] sm:$0xff]  }
 0x5c7   : > { %v2119_v0 = vadd.f32 %v2118_v62, %v2117_v61  ;;  %v2022_v1 = vpop.f32.mrb[46].mxu1  ;;  %v5870_v61 = vld [vmem:[%s7259_s14 + $0x68] sm:$0xff]  }
 0x5c8   : > { %v5572_v3 = vpop.f32.mrb[47].mxu1  ;;  %v5871_v62 = vld [vmem:[%s7259_s14 + $0xe8] sm:$0xff]   ;;  %v5874_v1 = vld [vmem:[%s7259_s14 + $0x70] sm:$0xff]  }
 0x5c9   : > { %v2121_v4 = vadd.f32 %v2120_v2, %v2119_v0  ;;  %v5872_v63 = vld [vmem:[%s7259_s14 + $0x28] sm:$0xff]   ;;  %v5875_v2 = vld [vmem:[%s7259_s14 + $0xf0] sm:$0xff]  }
 0x5ca   : > { %v5873_v0 = vld [vmem:[%s7259_s14 + $0xa8] sm:$0xff]   ;;  %v5876_v3 = vld [vmem:[%s7259_s14 + $0x30] sm:$0xff]  }
 0x5cd   : > { %v2111_v5 = vpop.f32.mrb[48].mxu1 }
 0x5ce   : > { %v2122_v6 = vsel %vm791_vm5, %v2111_v5, 0.0  ;;  %v5583_v55 = vpop.f32.mrb[49].mxu1  ;;  %v5878_v5 = vld [vmem:[%s7259_s14 + $0x78] sm:$0xff]  }
 0x5cf   : > { %v2123_v10 = vadd.f32 %v2122_v6, %v2121_v4  ;;  %v2114_v11 = vpop.f32.mrb[50].mxu1  ;;  %v5877_v4 = vld [vmem:[%s7259_s14 + $0xb0] sm:$0xff]   ;;  %v5879_v6 = vld [vmem:[%s7259_s14 + $0xf8] sm:$0xff]  }
 0x5d0   : > { %v5584_v12 = vpop.f32.mrb[51].mxu1  ;;  %v5881_v55 = vld [vmem:[%s7259_s14 + $0xb8] sm:$0xff]   ;;  %v2184_v11 = vsub.s32 2, %v6246_v8 }
 0x5d1   : > { %v2131_v13 = vadd.f32 %v4874_v9, %v2123_v10  ;;  %v5880_v9 = vld [vmem:[%s7259_s14 + $0x38] sm:$0xff]   ;;  %v2176_v10 = vsub.s32 0, %v6246_v8  ;;  %v2172_v12 = vld [vmem:[%s7302_s19] sm:$0xf] }
 0x5d3   : > { %v2132_v14 = vadd.f32 %v2131_v13, %v6324_v35  ;;  %v5838_v35 = vld [vmem:[%s7257_s12] ss:$16 sps:$4 sm:$0xff]   ;;  %v2180_v13 = vsub.s32 1, %v6246_v8 }
 0x5d4   : > { %2238 = vmatpush1.bf16.msra.mxu0 %v5838_v35 }
 0x5d5   : > { %v2135_v16 = vsel %vm791_vm5, %v2132_v14, 0.0  ;;  %2239 = vmatprep.subr.bf16.mxu0 %v5846_v25 }
 0x5d6   : > { %2136 = vadd.xlane.f32.xlu0 %v2135_v16  ;;  %v2177_v16 = vrot.slane %v2172_v12, %v2176_v10 }
 0x5d8   : > { %2240 = vmatpush1.bf16.msra.mxu0 %v5844_v24 }
 0x5d9   : > { %5249 = vmatprep.subr.bf16.mxu0 %v5850_v29 }
 0x663   : > { %v2137_v17 = vpop.xlane.xlu0 %2136 }
 0x664   : > { %v2139_v18 = vmul.f32 0.03125, %v2137_v17  ;;  %v2185_v17 = vrot.slane %v2172_v12, %v2184_v11 }
 0x666   : > { %v2140_v19 = vsub.f32 %v2132_v14, %v2139_v18  ;;  %v2188_v14 = vsub.s32 3, %v6246_v8  ;;  %v2181_v18 = vrot.slane %v2172_v12, %v2180_v13 }
 0x668   : > { %v2141_v15 = vmul.f32 %v2140_v19, %v2140_v19 }
 0x66a   : > { %v2142_v20 = vsel %vm791_vm5, %v2141_v15, 0.0 }
 0x66b   : > { %2143 = vadd.xlane.f32.xlu1 %v2142_v20 }
 0x6f8   : > { %v2144_v31 = vpop.xlane.xlu1 %2143 }
 0x6f9   : > { %v2145_v32 = vmul.f32 0.03125, %v2144_v31 }
 0x6fb   : > { %v2146_v33 = vadd.f32 1e-05, %v2145_v32 }
 0x6fd   : > { %5968 = vrsqrt.f32 %v2146_v33 }
 0x707   : > { %v5969_v34 = vpop.eup %5968 }
 0x708   : > { %v2148_v37 = vmul.f32 %v5969_v34, %v2140_v19  ;;  %v2189_v19 = vrot.slane %v2172_v12, %v2188_v14 }
 0x70a   : > { %v2155_v39 = vmul.f32 %v4875_v36, %v2148_v37 }
 0x70c   : > { %v6622_v40 = vadd.f32 %v4876_v38, %v2155_v39 }
 0x70e   : > { %v2163_v43 = vpack.c.bf16 %v6622_v40, %v6622_v40 }
 0x710   : > { %4885 = vmatmul.mubr.msk.bf16.vlgmr.msra.gmra.mrb[48].mxu0 %vm791_vm5, %v2163_v43  ;;  %4886 = vmatmul.mubr.msk.bf16.vlgmr.msra.gmra.mrb[52].mxu1 %vm791_vm5, %v2163_v43  ;;  %v4887_v43 = vld [vmem:[%s7260_s15] ss:$0 sm:$0xff] }
 0x711   : > { %5250 = vmatpush3.bf16.msra.mxu0 %v5852_v41  ;;  %5272 = vmatpush3.bf16.msra.mxu1 %v5853_v42 }
 0x712   : > { %5251 = vmatprep.subr.bf16.mxu0 %v5854_v44  ;;  %5273 = vmatprep.subr.bf16.mxu1 %v5855_v45 }
 0x715   : > { %5252 = vmatpush3.bf16.msra.mxu0 %v5856_v46  ;;  %5274 = vmatpush3.bf16.msra.mxu1 %v5857_v47 }
 0x716   : > { %5253 = vmatprep.subr.bf16.mxu0 %v5858_v48  ;;  %5275 = vmatprep.subr.bf16.mxu1 %v5859_v49 }
 0x719   : > { %5254 = vmatpush3.bf16.msra.mxu0 %v5860_v50  ;;  %5276 = vmatpush3.bf16.msra.mxu1 %v5861_v51 }
 0x71a   : > { %5255 = vmatprep.subr.bf16.mxu0 %v5862_v52  ;;  %5277 = vmatprep.subr.bf16.mxu1 %v5863_v53 }
 0x71d   : > { %5256 = vmatpush3.bf16.msra.mxu0 %v5864_v54  ;;  %5278 = vmatpush3.bf16.msra.mxu1 %v5865_v56 }
 0x71e   : > { %5257 = vmatprep.subr.bf16.mxu0 %v5866_v57  ;;  %5279 = vmatprep.subr.bf16.mxu1 %v5867_v58 }
 0x721   : > { %5258 = vmatpush3.bf16.msra.mxu0 %v5868_v59  ;;  %5280 = vmatpush3.bf16.msra.mxu1 %v5869_v60 }
 0x722   : > { %5259 = vmatprep.subr.bf16.mxu0 %v5870_v61  ;;  %5281 = vmatprep.subr.bf16.mxu1 %v5871_v62  ;;  %v5882_v62 = vld [vmem:[%s7297_s13 + $0x40] sm:$0xff]  }
 0x725   : > { %5260 = vmatpush3.bf16.msra.mxu0 %v5872_v63  ;;  %5282 = vmatpush3.bf16.msra.mxu1 %v5873_v0  ;;  %v5883_v63 = vld [vmem:[%s7297_s13 + $0x50] sm:$0xff]   ;;  %v5885_v0 = vld [vmem:[%s7297_s13 + $0x58] sm:$0xff]  }
 0x726   : > { %5261 = vmatprep.subr.bf16.mxu0 %v5874_v1  ;;  %5283 = vmatprep.subr.bf16.mxu1 %v5875_v2 }
 0x729   : > { %5262 = vmatpush3.bf16.msra.mxu0 %v5876_v3  ;;  %5284 = vmatpush3.bf16.msra.mxu1 %v5877_v4 }
 0x72a   : > { %5263 = vmatprep.subr.bf16.mxu0 %v5878_v5  ;;  %5285 = vmatprep.subr.bf16.mxu1 %v5879_v6  ;;  %v4920_v5 = vld [vmem:[%s7261_s16] ss:$0 sm:$0xff] }
 0x72d   : > { %5264 = vmatpush3.bf16.msra.mxu0 %v5880_v9  ;;  %5286 = vmatpush3.bf16.msra.mxu1 %v5881_v55  ;;  %v4921_v9 = vld [vmem:[%s7262_s17] ss:$0 sm:$0xff] }
 0x72e   : > { %5585 = vmatprep.subr.bf16.mxu0 %v6072_v7  ;;  %5593 = vmatprep.subr.bf16.mxu1 %v6072_v7 }
 0x7e3   : > { %v2271_v15 = vpop.f32.mrb[48].mxu0  ;;  %v2312_v20 = vpop.f32.mrb[52].mxu1 }
 0x7e4   : > { %v2272_v21 = vadd.f32 %v2271_v15, %v2177_v16  ;;  %v2313_v22 = vadd.f32 %v2312_v20, %v2185_v17  ;;  %v2273_v35 = vpop.f32.mrb[49].mxu0  ;;  %v2314_v23 = vpop.f32.mrb[53].mxu1  ;;  %v5886_v16 = vld [vmem:[%s7297_s13 + $0x60] sm:$0xff]   ;;  %v5887_v17 = vld [vmem:[%s7297_s13 + $0x70] sm:$0xff]   ;;  %v5889_v15 = vld [vmem:[%s7297_s13 + $0x78] sm:$0xff]  }
 0x7e5   : > { %v2274_v24 = vadd.f32 %v2273_v35, %v2181_v18  ;;  %v2315_v25 = vadd.f32 %v2314_v23, %v2189_v19  ;;  %v2275_v26 = vpop.f32.mrb[50].mxu0  ;;  %v2316_v27 = vpop.f32.mrb[54].mxu1  ;;  %v5888_v19 = vld [vmem:[%s7297_s13 + $0x68] sm:$0xff]   ;;  %v5890_v20 = vld [vmem:[%s7299_s28 + $0x40] sm:$0xff]   ;;  %v5893_v35 = vld [vmem:[%s7299_s28 + $0x58] sm:$0xff]  }
 0x7e6   : > { %v2319_v29 = vmax.f32 %v2272_v21, 0.0  ;;  %v2321_v30 = vmax.f32 %v2313_v22, 0.0  ;;  %v2276_v31 = vpop.f32.mrb[51].mxu0  ;;  %v2317_v32 = vpop.f32.mrb[55].mxu1  ;;  %v5891_v21 = vld [vmem:[%s7299_s28 + $0x50] sm:$0xff]   ;;  %v5892_v22 = vld [vmem:[%s7299_s28 + $0x48] sm:$0xff]  }
 0x7e7   : > { %v2320_v33 = vmax.f32 %v2274_v24, 0.0  ;;  %v2322_v34 = vmax.f32 %v2315_v25, 0.0  ;;  %v5894_v23 = vld [vmem:[%s7299_s28 + $0x60] sm:$0xff]   ;;  %v5895_v24 = vld [vmem:[%s7299_s28 + $0x70] sm:$0xff]   ;;  %v5896_v25 = vld [vmem:[%s7299_s28 + $0x68] sm:$0xff]  }
 0x7e8   : > { %v2323_v38 = vpack.c.bf16 %v2319_v29, %v2319_v29  ;;  %v2325_v39 = vpack.c.bf16 %v2321_v30, %v2321_v30  ;;  %v5897_v26 = vld [vmem:[%s7299_s28 + $0x78] sm:$0xff]   ;;  %v5898_v27 = vld [vmem:[%s7300_s22 + $0x40] sm:$0xff]   ;;  %v5899_v29 = vld [vmem:[%s7300_s22 + $0x50] sm:$0xff]  }
 0x7e9   : > { %v2324_v36 = vpack.c.bf16 %v2320_v33, %v2320_v33  ;;  %v2326_v37 = vpack.c.bf16 %v2322_v34, %v2322_v34  ;;  %v5900_v30 = vld [vmem:[%s7300_s22 + $0x48] sm:$0xff]   ;;  %v5901_v31 = vld [vmem:[%s7300_s22 + $0x58] sm:$0xff]   ;;  %v5902_v32 = vld [vmem:[%s7300_s22 + $0x60] sm:$0xff]  }
 0x7ea   : > { %v5903_v33 = vld [vmem:[%s7300_s22 + $0x70] sm:$0xff]   ;;  %v5904_v34 = vld [vmem:[%s7300_s22 + $0x68] sm:$0xff]  }
 0x7eb   : > { %2622 = vmatprep.mubr.bf16.mxu0 %v2324_v36  ;;  %2662 = vmatprep.mubr.bf16.mxu1 %v2326_v37  ;;  %v5905_v36 = vld [vmem:[%s7300_s22 + $0x78] sm:$0xff]  }
 0x7ec   : > { %2623 = vmatmul.mubr.bf16.vlgmr.msra.gmra.mrb[52].mxu0 %v2323_v38  ;;  %2663 = vmatmul.mubr.bf16.vlgmr.msra.gmra.mrb[56].mxu1 %v2325_v39 }
 0x7ed   : > { %5589 = vmatprep.mubr.msk.bf16.mxu0 %vm6073_vm0, %v6072_v7  ;;  %5597 = vmatprep.mubr.msk.bf16.mxu1 %vm6073_vm0, %v6072_v7 }
 0x7ee   : > { %5586 = vmatpush3.bf16.msra.mxu0 %v5882_v62  ;;  %5594 = vmatpush3.bf16.msra.mxu1 %v5883_v63 }
 0x7ef   : > { %5587 = vmatprep.subr.bf16.mxu0 %v6072_v7  ;;  %5595 = vmatprep.subr.bf16.mxu1 %v6072_v7 }
 0x7f2   : > { %5596 = vmatpush3.bf16.msra.mxu1 %v5885_v0 }
 0x7f3   : > { %5609 = vmatprep.subr.bf16.mxu1 %v6072_v7 }
 0x8bf   : > { %v5265_v41 = vpop.f32.mrb[52].mxu0  ;;  %v5287_v42 = vpop.f32.mrb[56].mxu1 }
 0x8c0   : > { %v5266_v44 = vpop.f32.mrb[53].mxu0  ;;  %v5288_v45 = vpop.f32.mrb[57].mxu1 }
 0x8c1   : > { %v5267_v46 = vadd.f32 %v5266_v44, %v5265_v41  ;;  %v5289_v47 = vadd.f32 %v5288_v45, %v5287_v42  ;;  %v5268_v48 = vpop.f32.mrb[54].mxu0  ;;  %v5290_v49 = vpop.f32.mrb[58].mxu1 }
 0x8c2   : > { %v5269_v50 = vpop.f32.mrb[55].mxu0  ;;  %v5291_v51 = vpop.f32.mrb[59].mxu1 }
 0x8c3   : > { %v2625_v52 = vadd.f32 %v5267_v46, %v4887_v43 }
 0x8c5   : > { %v2665_v53 = vadd.f32 %v5289_v47, %v2625_v52 }
 0x8c7   : > { %v2670_v54 = vadd.f32 %v2665_v53, %v6622_v40  ;;  %v5884_v40 = vld [vmem:[%s7297_s13 + $0x48] sm:$0xff]  }
 0x8c8   : > { %5588 = vmatpush3.bf16.msra.mxu0 %v5884_v40 }
 0x8c9   : > { %v2673_v56 = vsel %vm791_vm5, %v2670_v54, 0.0  ;;  %5601 = vmatprep.subr.bf16.mxu0 %v6072_v7 }
 0x8ca   : > { %2674 = vadd.xlane.f32.xlu0 %v2673_v56  ;;  %v4979_v56 = vld [vmem:[%s7251_s6 + $0x5] ss:$0 sm:$0xff] }
 0x957   : > { %v2675_v57 = vpop.xlane.xlu0 %2674 }
 0x958   : > { %v2676_v58 = vmul.f32 0.03125, %v2675_v57 }
 0x95a   : > { %v2677_v59 = vsub.f32 %v2670_v54, %v2676_v58  ;;  %v4978_v54 = vld [vmem:[%s7251_s6 + $0x4] ss:$0 sm:$0xff] }
 0x95c   : > { %v2678_v60 = vmul.f32 %v2677_v59, %v2677_v59 }
 0x95e   : > { %v2679_v61 = vsel %vm791_vm5, %v2678_v60, 0.0 }
 0x95f   : > { %2680 = vadd.xlane.f32.xlu1 %v2679_v61 }
 0x9ec   : > { %v2681_v1 = vpop.xlane.xlu1 %2680 }
 0x9ed   : > { %v2682_v2 = vmul.f32 0.03125, %v2681_v1 }
 0x9ef   : > { %v2683_v3 = vadd.f32 1e-05, %v2682_v2 }
 0x9f1   : > { %5970 = vrsqrt.f32 %v2683_v3 }
 0x9fb   : > { %v5971_v4 = vpop.eup %5970 }
 0x9fc   : > { %v2685_v6 = vmul.f32 %v5971_v4, %v2677_v59  ;;  %v4942_v4 = vld [vmem:[%s7301_s5 + $0x4] ss:$0 sm:$0xff] }
 0x9fe   : > { %v2692_v55 = vmul.f32 %v4920_v5, %v2685_v6  ;;  %v4943_v5 = vld [vmem:[%s7301_s5 + $0x5] ss:$0 sm:$0xff] }
 0xa00   : > { %v6767_v12 = vadd.f32 %v4921_v9, %v2692_v55  ;;  %v4980_v55 = vld [vmem:[%s7251_s6 + $0x6] ss:$0 sm:$0xff] }
 0xa02   : > { %v6777_v18 = vpack.c.bf16 %v6767_v12, %v6767_v12 }
 0xa04   : > { %5590 = vmatmul.mubr.msk.bf16.vlgmr.msra.gmra.mrb[56].mxu0 %vm791_vm5, %v6777_v18  ;;  %5598 = vmatmul.mubr.msk.bf16.vlgmr.msra.gmra.mrb[60].mxu1 %vm791_vm5, %v6777_v18 }
 0xa05   : > { %5602 = vmatpush3.bf16.msra.mxu0 %v5886_v16  ;;  %5610 = vmatpush3.bf16.msra.mxu1 %v5887_v17  ;;  %v4981_v16 = vld [vmem:[%s7251_s6 + $0x7] ss:$0 sm:$0xff] }
 0xa06   : > { %5603 = vmatprep.subr.bf16.mxu0 %v6072_v7  ;;  %5611 = vmatprep.subr.bf16.mxu1 %v6072_v7 }
 0xa07   : > { %5605 = vmatprep.mubr.msk.bf16.mxu0 %vm6073_vm0, %v6072_v7  ;;  %5613 = vmatprep.mubr.msk.bf16.mxu1 %vm6073_vm0, %v6072_v7 }
 0xa09   : > { %5604 = vmatpush3.bf16.msra.mxu0 %v5888_v19  ;;  %5612 = vmatpush3.bf16.msra.mxu1 %v5889_v15 }
 0xa0a   : > { %5617 = vmatprep.subr.bf16.mxu0 %v6072_v7  ;;  %5625 = vmatprep.subr.bf16.mxu1 %v6072_v7 }
 0xa0c   : > { %5606 = vmatmul.mubr.msk.bf16.vlgmr.msra.gmra.mrb[60].mxu0 %vm791_vm5, %v6777_v18  ;;  %5614 = vmatmul.mubr.msk.bf16.vlgmr.msra.gmra.mrb[64].mxu1 %vm791_vm5, %v6777_v18 }
 0xa0d   : > { %5618 = vmatpush3.bf16.msra.mxu0 %v5890_v20  ;;  %5626 = vmatpush3.bf16.msra.mxu1 %v5891_v21 }
 0xa0e   : > { %5619 = vmatprep.subr.bf16.mxu0 %v6072_v7  ;;  %5627 = vmatprep.subr.bf16.mxu1 %v6072_v7 }
 0xa0f   : > { %5621 = vmatprep.mubr.msk.bf16.mxu0 %vm6073_vm0, %v6072_v7  ;;  %5629 = vmatprep.mubr.msk.bf16.mxu1 %vm6073_vm0, %v6072_v7 }
 0xa11   : > { %5620 = vmatpush3.bf16.msra.mxu0 %v5892_v22  ;;  %5628 = vmatpush3.bf16.msra.mxu1 %v5893_v35 }
 0xa12   : > { %5633 = vmatprep.subr.bf16.mxu0 %v6072_v7  ;;  %5641 = vmatprep.subr.bf16.mxu1 %v6072_v7 }
 0xa14   : > { %5622 = vmatmul.mubr.msk.bf16.vlgmr.msra.gmra.mrb[64].mxu0 %vm791_vm5, %v6777_v18  ;;  %5630 = vmatmul.mubr.msk.bf16.vlgmr.msra.gmra.mrb[68].mxu1 %vm791_vm5, %v6777_v18 }
 0xa15   : > { %5634 = vmatpush3.bf16.msra.mxu0 %v5894_v23  ;;  %5642 = vmatpush3.bf16.msra.mxu1 %v5895_v24 }
 0xa16   : > { %5635 = vmatprep.subr.bf16.mxu0 %v6072_v7  ;;  %5643 = vmatprep.subr.bf16.mxu1 %v6072_v7 }
 0xa17   : > { %5637 = vmatprep.mubr.msk.bf16.mxu0 %vm6073_vm0, %v6072_v7  ;;  %5645 = vmatprep.mubr.msk.bf16.mxu1 %vm6073_vm0, %v6072_v7 }
 0xa19   : > { %5636 = vmatpush3.bf16.msra.mxu0 %v5896_v25  ;;  %5644 = vmatpush3.bf16.msra.mxu1 %v5897_v26 }
 0xa1a   : > { %5649 = vmatprep.subr.bf16.mxu0 %v6072_v7  ;;  %5657 = vmatprep.subr.bf16.mxu1 %v6072_v7 }
 0xa1c   : > { %5638 = vmatmul.mubr.msk.bf16.vlgmr.msra.gmra.mrb[68].mxu0 %vm791_vm5, %v6777_v18  ;;  %5646 = vmatmul.mubr.msk.bf16.vlgmr.msra.gmra.mrb[72].mxu1 %vm791_vm5, %v6777_v18 }
 0xa1d   : > { %5650 = vmatpush3.bf16.msra.mxu0 %v5898_v27  ;;  %5658 = vmatpush3.bf16.msra.mxu1 %v5899_v29 }
 0xa1e   : > { %5651 = vmatprep.subr.bf16.mxu0 %v6072_v7  ;;  %5659 = vmatprep.subr.bf16.mxu1 %v6072_v7 }
 0xa1f   : > { %5653 = vmatprep.mubr.msk.bf16.mxu0 %vm6073_vm0, %v6072_v7  ;;  %5661 = vmatprep.mubr.msk.bf16.mxu1 %vm6073_vm0, %v6072_v7 }
 0xa21   : > { %5652 = vmatpush3.bf16.msra.mxu0 %v5900_v30  ;;  %5660 = vmatpush3.bf16.msra.mxu1 %v5901_v31 }
 0xa22   : > { %5665 = vmatprep.subr.bf16.mxu0 %v6072_v7  ;;  %5673 = vmatprep.subr.bf16.mxu1 %v6072_v7 }
 0xa24   : > { %5654 = vmatmul.mubr.msk.bf16.vlgmr.msra.gmra.mrb[72].mxu0 %vm791_vm5, %v6777_v18  ;;  %5662 = vmatmul.mubr.msk.bf16.vlgmr.msra.gmra.mrb[76].mxu1 %vm791_vm5, %v6777_v18 }
 0xa25   : > { %5666 = vmatpush3.bf16.msra.mxu0 %v5902_v32  ;;  %5674 = vmatpush3.bf16.msra.mxu1 %v5903_v33  ;;  %v4944_v32 = vld [vmem:[%s7301_s5 + $0x6] ss:$0 sm:$0xff]  ;;  %v4945_v33 = vld [vmem:[%s7301_s5 + $0x7] ss:$0 sm:$0xff]  ;;  %s7203_s5 = scalar_lea.hbm %s7304_s30, %s6241_s4 }
 0xa26   : > { %5667 = vmatprep.subr.bf16.mxu0 %v6072_v7  ;;  %5675 = vmatprep.subr.bf16.mxu1 %v6072_v7 }
 0xa27   : > { %5669 = vmatprep.mubr.msk.bf16.mxu0 %vm6073_vm0, %v6072_v7  ;;  %5677 = vmatprep.mubr.msk.bf16.mxu1 %vm6073_vm0, %v6072_v7 }
 0xa29   : > { %5668 = vmatpush3.bf16.msra.mxu0 %v5904_v34  ;;  %5676 = vmatpush3.bf16.msra.mxu1 %v5905_v36 }
 0xa2a   : > { %5681 = vmatprep.subr.bf16.mxu0 %v6072_v7  ;;  %5687 = vmatprep.subr.bf16.mxu1 %v6072_v7 }
 0xa2c   : > { %5670 = vmatmul.mubr.msk.bf16.vlgmr.msra.gmra.mrb[76].mxu0 %vm791_vm5, %v6777_v18  ;;  %5678 = vmatmul.mubr.msk.bf16.vlgmr.msra.gmra.mrb[80].mxu1 %vm791_vm5, %v6777_v18 }
 0xa2d   : > { %5683 = vmatprep.mubr.msk.bf16.mxu0 %vm6073_vm0, %v6072_v7  ;;  %5689 = vmatprep.mubr.msk.bf16.mxu1 %vm6073_vm0, %v6072_v7 }
 0xad7   : > { %v2796_v37 = vpop.f32.mrb[56].mxu0  ;;  %v2848_v38 = vpop.f32.mrb[60].mxu1 }
 0xad8   : > { %v5591_v39 = vpop.f32.mrb[57].mxu0  ;;  %v5599_v41 = vpop.f32.mrb[61].mxu1  ;;  %v2797_v17 = vadd.f32 %v4942_v4, %v2796_v37  ;;  %v2849_v18 = vadd.f32 %v4943_v5, %v2848_v38  ;;  %v5014_v37 = vld [vmem:[%s7252_s7 + $0x4] ss:$0 sm:$0xff]  ;;  %v5015_v38 = vld [vmem:[%s7252_s7 + $0x5] ss:$0 sm:$0xff] }
 0xad9   : > { %v2799_v42 = vpop.f32.mrb[58].mxu0  ;;  %v2851_v43 = vpop.f32.mrb[62].mxu1 }
 0xada   : > { %v5592_v44 = vpop.f32.mrb[59].mxu0  ;;  %v5600_v45 = vpop.f32.mrb[63].mxu1  ;;  %v3466_v25 = vpack.c.bf16 %v2797_v17, %v2797_v17  ;;  %v3467_v26 = vpack.c.bf16 %v2849_v18, %v2849_v18 }
 0xadf   : > { %v2900_v46 = vpop.f32.mrb[60].mxu0  ;;  %v2952_v47 = vpop.f32.mrb[64].mxu1 }
 0xae0   : > { %v5607_v48 = vpop.f32.mrb[61].mxu0  ;;  %v5615_v49 = vpop.f32.mrb[65].mxu1  ;;  %v2901_v39 = vadd.f32 %v4944_v32, %v2900_v46  ;;  %v2953_v41 = vadd.f32 %v4945_v33, %v2952_v47 }
 0xae1   : > { %v2903_v50 = vpop.f32.mrb[62].mxu0  ;;  %v2955_v51 = vpop.f32.mrb[66].mxu1 }
 0xae2   : > { %v5608_v52 = vpop.f32.mrb[63].mxu0  ;;  %v5616_v53 = vpop.f32.mrb[67].mxu1  ;;  %v3468_v46 = vpack.c.bf16 %v2901_v39, %v2901_v39  ;;  %v3469_v47 = vpack.c.bf16 %v2953_v41, %v2953_v41 }
 0xae7   : > { %v3050_v57 = vpop.f32.mrb[64].mxu0  ;;  %v3102_v58 = vpop.f32.mrb[68].mxu1 }
 0xae8   : > { %v3051_v59 = vadd.f32 %v4978_v54, %v3050_v57  ;;  %v3103_v60 = vadd.f32 %v4979_v56, %v3102_v58  ;;  %v5623_v61 = vpop.f32.mrb[65].mxu0  ;;  %v5631_v62 = vpop.f32.mrb[69].mxu1 }
 0xae9   : > { %v3053_v63 = vpop.f32.mrb[66].mxu0  ;;  %v3105_v40 = vpop.f32.mrb[70].mxu1 }
 0xaea   : > { %v3470_v0 = vpack.c.bf16 %v3051_v59, %v3051_v59  ;;  %v3471_v1 = vpack.c.bf16 %v3103_v60, %v3103_v60  ;;  %v5624_v2 = vpop.f32.mrb[67].mxu0  ;;  %v5632_v3 = vpop.f32.mrb[71].mxu1 }
 0xaec   : > { %v3478_v6 = vsel %vm1503_vm13, %v3470_v0, 0  ;;  %v3524_v9 = vsel %vm1503_vm13, %v3471_v1, 0 }
 0xaed   : > { %5682 = vmatpush3.bf16.xpose.msra.mxu0 %v3478_v6  ;;  %5688 = vmatpush3.bf16.xpose.msra.mxu1 %v3524_v9 }
 0xaee   : > { %5693 = vmatprep.subr.bf16.mxu0 %v6072_v7  ;;  %5699 = vmatprep.subr.bf16.mxu1 %v6072_v7 }
 0xaef   : > { %v3154_v19 = vpop.f32.mrb[68].mxu0  ;;  %v3206_v15 = vpop.f32.mrb[72].mxu1 }
 0xaf0   : > { %v3155_v20 = vadd.f32 %v4980_v55, %v3154_v19  ;;  %v3207_v21 = vadd.f32 %v4981_v16, %v3206_v15  ;;  %v5639_v22 = vpop.f32.mrb[69].mxu0  ;;  %v5647_v35 = vpop.f32.mrb[73].mxu1 }
 0xaf1   : > { %v3157_v23 = vpop.f32.mrb[70].mxu0  ;;  %v3209_v24 = vpop.f32.mrb[74].mxu1 }
 0xaf2   : > { %v3472_v27 = vpack.c.bf16 %v3155_v20, %v3155_v20  ;;  %v3473_v29 = vpack.c.bf16 %v3207_v21, %v3207_v21  ;;  %v5640_v30 = vpop.f32.mrb[71].mxu0  ;;  %v5648_v31 = vpop.f32.mrb[75].mxu1 }
 0xaf4   : > { %v3570_v34 = vsel %vm1503_vm13, %v3472_v27, 0  ;;  %v3616_v36 = vsel %vm1503_vm13, %v3473_v29, 0  ;;  %5684 = vmatmul.mubr.msk.bf16.vlgmr.msra.gmra.mrb[80].mxu0 %vm1503_vm13, %v3466_v25  ;;  %5690 = vmatmul.mubr.msk.bf16.vlgmr.msra.gmra.mrb[84].mxu1 %vm1503_vm13, %v3467_v26 }
 0xaf5   : > { %5694 = vmatpush3.bf16.xpose.msra.mxu0 %v3570_v34  ;;  %5700 = vmatpush3.bf16.xpose.msra.mxu1 %v3616_v36 }
 0xaf6   : > { %5695 = vmatprep.mubr.msk.bf16.mxu0 %vm6073_vm0, %v6072_v7  ;;  %5701 = vmatprep.mubr.msk.bf16.mxu1 %vm6073_vm0, %v6072_v7 }
 0xaf7   : > { %v3304_v42 = vpop.f32.mrb[72].mxu0  ;;  %v3356_v43 = vpop.f32.mrb[76].mxu1  ;;  %5705 = vmatprep.subr.bf16.mxu0 %v6072_v7  ;;  %5711 = vmatprep.subr.bf16.mxu1 %v6072_v7 }
 0xaf8   : > { %v3305_v44 = vadd.f32 %v5014_v37, %v3304_v42  ;;  %v3357_v45 = vadd.f32 %v5015_v38, %v3356_v43  ;;  %v5655_v48 = vpop.f32.mrb[73].mxu0  ;;  %v5663_v49 = vpop.f32.mrb[77].mxu1 }
 0xaf9   : > { %v3307_v50 = vpop.f32.mrb[74].mxu0  ;;  %v3359_v51 = vpop.f32.mrb[78].mxu1 }
 0xafa   : > { %v3706_v52 = vpack.c.bf16 %v3305_v44, %v3305_v44  ;;  %v3707_v53 = vpack.c.bf16 %v3357_v45, %v3357_v45  ;;  %v5656_v54 = vpop.f32.mrb[75].mxu0  ;;  %v5664_v56 = vpop.f32.mrb[79].mxu1 }
 0xafc   : > { %v3714_v57 = vsel %vm1743_vm14, %v3706_v52, 0  ;;  %v3760_v58 = vsel %vm1743_vm14, %v3707_v53, 0  ;;  %5696 = vmatmul.mubr.msk.bf16.vlgmr.msra.gmra.mrb[84].mxu0 %vm1503_vm13, %v3468_v46  ;;  %5702 = vmatmul.mubr.msk.bf16.vlgmr.msra.gmra.mrb[88].mxu1 %vm1503_vm13, %v3469_v47  ;;  %v5017_v52 = vld [vmem:[%s7252_s7 + $0x7] ss:$0 sm:$0xff]  ;;  %v5016_v53 = vld [vmem:[%s7252_s7 + $0x6] ss:$0 sm:$0xff] }
 0xafd   : > { %5706 = vmatpush3.bf16.msra.mxu0 %v3714_v57  ;;  %5712 = vmatpush3.bf16.msra.mxu1 %v3760_v58 }
 0xafe   : > { %5707 = vmatprep.mubr.msk.bf16.mxu0 %vm6073_vm0, %v6072_v7  ;;  %5713 = vmatprep.mubr.msk.bf16.mxu1 %vm6073_vm0, %v6072_v7 }
 0xaff   : > { %v6953_v59 = vpop.f32.mrb[76].mxu0  ;;  %v6955_v60 = vpop.f32.mrb[80].mxu1  ;;  %5717 = vmatprep.subr.bf16.mxu0 %v6072_v7  ;;  %5723 = vmatprep.subr.bf16.mxu1 %v6072_v7 }
 0xb00   : > { %v5671_v61 = vpop.f32.mrb[77].mxu0  ;;  %v5679_v62 = vpop.f32.mrb[81].mxu1  ;;  %v3461_v54 = vadd.f32 %v5017_v52, %v6955_v60  ;;  %v3409_v57 = vadd.f32 %v5016_v53, %v6953_v59 }
 0xb01   : > { %v3411_v63 = vpop.f32.mrb[78].mxu0  ;;  %v3463_v40 = vpop.f32.mrb[82].mxu1 }
 0xb02   : > { %v5672_v0 = vpop.f32.mrb[79].mxu0  ;;  %v5680_v1 = vpop.f32.mrb[83].mxu1  ;;  %v3709_v63 = vpack.c.bf16 %v3461_v54, %v3461_v54 }
 0xb03   : > { %v3708_v0 = vpack.c.bf16 %v3409_v57, %v3409_v57 }
 0xb05   : > { %v3806_v60 = vsel %vm1743_vm14, %v3708_v0, 0 }
 0xbc7   : > { %v3514_v2 = vpop.f32.mrb[80].mxu0  ;;  %v3560_v3 = vpop.f32.mrb[84].mxu1 }
 0xbc8   : > { %v5685_v4 = vpop.f32.mrb[81].mxu0  ;;  %v5691_v5 = vpop.f32.mrb[85].mxu1  ;;  %v3661_v6 = vsel %vm1503_vm13, %v3560_v3, -inf  ;;  %v3658_v9 = vsel %vm1503_vm13, %v3514_v2, -inf }
 0xbc9   : > { %3662 = vmax.xlane.f32.xlu1 %v3661_v6  ;;  %v3563_v55 = vpop.f32.mrb[86].mxu1  ;;  %3659 = vmax.xlane.f32.xlu0 %v3658_v9  ;;  %v3517_v16 = vpop.f32.mrb[82].mxu0  ;;  %v3852_v4 = vsel %vm1743_vm14, %v3709_v63, 0  ;;  %v5039_v5 = vld [vmem:[%s7253_s8 + $0x14] sm:$0xf] }
 0xbca   : > { %v5686_v17 = vpop.f32.mrb[83].mxu0  ;;  %v5692_v18 = vpop.f32.mrb[87].mxu1  ;;  %v5038_v55 = vld [vmem:[%s7253_s8 + $0x10] sm:$0xf] }
 0xbcb   : > { %v3953_v18 = vsel %vm1743_vm14, %v5039_v5, 0 }
 0xbcf   : > { %v3606_v19 = vpop.f32.mrb[84].mxu0  ;;  %v3652_v15 = vpop.f32.mrb[88].mxu1 }
 0xbd0   : > { %v5697_v20 = vpop.f32.mrb[85].mxu0  ;;  %v5703_v21 = vpop.f32.mrb[89].mxu1  ;;  %v3667_v22 = vsel %vm1503_vm13, %v3652_v15, -inf  ;;  %v3664_v35 = vsel %vm1503_vm13, %v3606_v19, -inf }
 0xbd1   : > { %3668 = vmax.xlane.f32.xlu1 %v3667_v22  ;;  %v3655_v23 = vpop.f32.mrb[90].mxu1  ;;  %3665 = vmax.xlane.f32.xlu0 %v3664_v35  ;;  %v3609_v24 = vpop.f32.mrb[86].mxu0  ;;  %v5041_v20 = vld [vmem:[%s7253_s8 + $0x1c] sm:$0xf]  ;;  %v5040_v21 = vld [vmem:[%s7253_s8 + $0x18] sm:$0xf] }
 0xbd2   : > { %v5698_v25 = vpop.f32.mrb[87].mxu0  ;;  %v5704_v26 = vpop.f32.mrb[91].mxu1 }
 0xbd3   : > { %v4045_v25 = vsel %vm1743_vm14, %v5041_v20, 0  ;;  %v5911_v20 = vld [vmem:[%s7257_s12 + $0x4c] ss:$16 sps:$4 sm:$0xff]  }
 0xc56   : > { %v3663_v27 = vpop.xlane.xlu1 %3662  ;;  %v3660_v29 = vpop.xlane.xlu0 %3659 }
 0xc57   : > { %v3671_v30 = vsub.f32 %v3560_v3, %v3663_v27  ;;  %v3670_v31 = vsub.f32 %v3514_v2, %v3660_v29 }
 0xc59   : > { %v3676_v32 = vmul.f32 1.442695, %v3671_v30  ;;  %v3674_v33 = vmul.f32 1.442695, %v3670_v31  ;;  %v3999_v30 = vsel %vm1743_vm14, %v5040_v21, 0 }
 0xc5a   : > { %v5909_v21 = vld [vmem:[%s7257_s12 + $0x48] ss:$16 sps:$4 sm:$0xff]  }
 0xc5b   : > { %5972 = vpow2.f32 %v3676_v32 }
 0xc5c   : > { %5974 = vpow2.f32 %v3674_v33 }
 0xc5e   : > { %v3669_v34 = vpop.xlane.xlu1 %3668  ;;  %v3666_v36 = vpop.xlane.xlu0 %3665 }
 0xc5f   : > { %v3673_v37 = vsub.f32 %v3652_v15, %v3669_v34  ;;  %v3672_v38 = vsub.f32 %v3606_v19, %v3666_v36  ;;  %v3907_v15 = vsel %vm1743_vm14, %v5038_v55, 0 }
 0xc61   : > { %v3680_v39 = vmul.f32 1.442695, %v3673_v37  ;;  %v3678_v41 = vmul.f32 1.442695, %v3672_v38 }
 0xc63   : > { %5976 = vpow2.f32 %v3680_v39 }
 0xc64   : > { %5978 = vpow2.f32 %v3678_v41 }
 0xc65   : > { %v5973_v42 = vpop.eup %5972 }
 0xc66   : > { %v5975_v43 = vpop.eup %5974  ;;  %v3685_v44 = vsel %vm1503_vm13, %v5973_v42, 0.0 }
 0xc67   : > { %3686 = vadd.xlane.f32.xlu1 %v3685_v44  ;;  %v3682_v45 = vsel %vm1503_vm13, %v5975_v43, 0.0 }
 0xc68   : > { %3683 = vadd.xlane.f32.xlu0 %v3682_v45 }
 0xc6d   : > { %v5977_v48 = vpop.eup %5976 }
 0xc6e   : > { %v5979_v49 = vpop.eup %5978  ;;  %v3691_v50 = vsel %vm1503_vm13, %v5977_v48, 0.0 }
 0xc6f   : > { %3692 = vadd.xlane.f32.xlu1 %v3691_v50  ;;  %v3688_v51 = vsel %vm1503_vm13, %v5979_v49, 0.0 }
 0xc70   : > { %3689 = vadd.xlane.f32.xlu0 %v3688_v51 }
 0xcf4   : > { %v3687_v46 = vpop.xlane.xlu1 %3686 }
 0xcf5   : > { %5980 = vrcp.f32 %v3687_v46  ;;  %v3684_v47 = vpop.xlane.xlu0 %3683 }
 0xcf6   : > { %5982 = vrcp.f32 %v3684_v47 }
 0xcfc   : > { %v3693_v56 = vpop.xlane.xlu1 %3692 }
 0xcfd   : > { %5984 = vrcp.f32 %v3693_v56  ;;  %v3690_v58 = vpop.xlane.xlu0 %3689 }
 0xcfe   : > { %5986 = vrcp.f32 %v3690_v58 }
 0xcff   : > { %v5981_v61 = vpop.eup %5980 }
 0xd00   : > { %v5983_v62 = vpop.eup %5982  ;;  %v3699_v40 = vmul.f32 %v5981_v61, %v5973_v42 }
 0xd01   : > { %v3698_v1 = vmul.f32 %v5983_v62, %v5975_v43 }
 0xd02   : > { %v3703_v2 = vpack.c.bf16 %v3699_v40, %v3699_v40 }
 0xd03   : > { %v3702_v3 = vpack.c.bf16 %v3698_v1, %v3698_v1 }
 0xd04   : > { %5714 = vmatmul.mubr.msk.bf16.vlgmr.msra.gmra.mrb[92].mxu1 %vm1503_vm13, %v3703_v2 }
 0xd05   : > { %5708 = vmatmul.mubr.msk.bf16.vlgmr.msra.gmra.mrb[88].mxu0 %vm1503_vm13, %v3702_v3  ;;  %5724 = vmatpush3.bf16.msra.mxu1 %v3852_v4  ;;  %v5047_v4 = vld [vmem:[%s7254_s9 + $0x1] ss:$0 sm:$0xff] }
 0xd06   : > { %5718 = vmatpush3.bf16.msra.mxu0 %v3806_v60  ;;  %5719 = vmatprep.mubr.msk.bf16.mxu0 %vm6073_vm0, %v6072_v7 }
 0xd07   : > { %v5985_v59 = vpop.eup %5984  ;;  %5725 = vmatprep.mubr.msk.bf16.mxu1 %vm6073_vm0, %v6072_v7  ;;  %5729 = vmatprep.subr.bf16.mxu0 %v6072_v7 }
 0xd08   : > { %v5987_v6 = vpop.eup %5986  ;;  %v3701_v9 = vmul.f32 %v5985_v59, %v5977_v48  ;;  %5735 = vmatprep.subr.bf16.mxu1 %v6072_v7 }
 0xd09   : > { %v3700_v16 = vmul.f32 %v5987_v6, %v5979_v49 }
 0xd0a   : > { %v3705_v17 = vpack.c.bf16 %v3701_v9, %v3701_v9 }
 0xd0b   : > { %v3704_v19 = vpack.c.bf16 %v3700_v16, %v3700_v16 }
 0xd0c   : > { %5726 = vmatmul.mubr.msk.bf16.vlgmr.msra.gmra.mrb[96].mxu1 %vm1503_vm13, %v3705_v17 }
 0xd0d   : > { %5720 = vmatmul.mubr.msk.bf16.vlgmr.msra.gmra.mrb[92].mxu0 %vm1503_vm13, %v3704_v19  ;;  %5736 = vmatpush3.bf16.msra.mxu1 %v3953_v18 }
 0xd0e   : > { %5730 = vmatpush3.bf16.msra.mxu0 %v3907_v15  ;;  %5731 = vmatprep.mubr.msk.bf16.mxu0 %vm6073_vm0, %v6072_v7  ;;  %v5908_v15 = vld [vmem:[%s7257_s12 + $0x44] ss:$16 sps:$4 sm:$0xff]  }
 0xd0f   : > { %5737 = vmatprep.mubr.msk.bf16.mxu1 %vm6073_vm0, %v6072_v7  ;;  %5741 = vmatprep.subr.bf16.mxu0 %v6072_v7 }
 0xd10   : > { %5747 = vmatprep.subr.bf16.mxu1 %v6072_v7 }
 0xdd7   : > { %v3796_v22 = vpop.f32.mrb[92].mxu1 }
 0xdd8   : > { %v3750_v35 = vpop.f32.mrb[88].mxu0  ;;  %v3895_v23 = vpack.c.bf16 %v3796_v22, %v3796_v22  ;;  %v5715_v24 = vpop.f32.mrb[93].mxu1  ;;  %v5912_v22 = vld [vmem:[%s7257_s12 + $0x60] ss:$16 sps:$4 sm:$0xff]  }
 0xdd9   : > { %v3894_v26 = vpack.c.bf16 %v3750_v35, %v3750_v35  ;;  %v5709_v27 = vpop.f32.mrb[89].mxu0  ;;  %v3799_v29 = vpop.f32.mrb[94].mxu1  ;;  %v5914_v35 = vld [vmem:[%s7257_s12 + $0x64] ss:$16 sps:$4 sm:$0xff]   ;;  %v5917_v24 = vld [vmem:[%s7257_s12 + $0x6c] ss:$16 sps:$4 sm:$0xff]  }
 0xdda   : > { %v3753_v31 = vpop.f32.mrb[90].mxu0  ;;  %v5716_v32 = vpop.f32.mrb[95].mxu1  ;;  %5738 = vmatmul.mubr.msk.bf16.vlgmr.msra.gmra.mrb[100].mxu1 %vm1503_vm13, %v3895_v23  ;;  %v5915_v23 = vld [vmem:[%s7257_s12 + $0x68] ss:$16 sps:$4 sm:$0xff]  }
 0xddb   : > { %v5710_v33 = vpop.f32.mrb[91].mxu0  ;;  %5732 = vmatmul.mubr.msk.bf16.vlgmr.msra.gmra.mrb[96].mxu0 %vm1503_vm13, %v3894_v26  ;;  %5748 = vmatpush3.bf16.msra.mxu1 %v4045_v25  ;;  %v5918_v25 = vld [vmem:[%s7259_s14 + $0x140] sm:$0xff]  }
 0xddc   : > { %5742 = vmatpush3.bf16.msra.mxu0 %v3999_v30  ;;  %5743 = vmatprep.mubr.msk.bf16.mxu0 %vm6073_vm0, %v6072_v7  ;;  %v5919_v26 = vld [vmem:[%s7259_s14 + $0x1c0] sm:$0xff]  }
 0xddd   : > { %5749 = vmatprep.mubr.msk.bf16.mxu1 %vm6073_vm0, %v6072_v7  ;;  %4211 = vmatprep.subr.bf16.mxu0 %v5908_v15  ;;  %v5050_v32 = vld [vmem:[%s7255_s10 + $0x1] ss:$0 sm:$0xff] }
 0xdde   : > { %4252 = vmatprep.subr.bf16.mxu1 %v5911_v20 }
 0xddf   : > { %v3888_v34 = vpop.f32.mrb[96].mxu1 }
 0xde0   : > { %v3842_v36 = vpop.f32.mrb[92].mxu0  ;;  %v3897_v37 = vpack.c.bf16 %v3888_v34, %v3888_v34  ;;  %v5727_v38 = vpop.f32.mrb[97].mxu1  ;;  %v5051_v34 = vld [vmem:[%s7256_s11 + $0x1] ss:$0 sm:$0xff] }
 0xde1   : > { %v3896_v39 = vpack.c.bf16 %v3842_v36, %v3842_v36  ;;  %v5721_v41 = vpop.f32.mrb[93].mxu0  ;;  %v3891_v42 = vpop.f32.mrb[98].mxu1  ;;  %v5920_v38 = vld [vmem:[%s7259_s14 + $0x100] sm:$0xff]  }
 0xde2   : > { %v3845_v43 = vpop.f32.mrb[94].mxu0  ;;  %v5728_v44 = vpop.f32.mrb[99].mxu1  ;;  %5750 = vmatmul.mubr.msk.bf16.vlgmr.msra.gmra.mrb[104].mxu1 %vm1503_vm13, %v3897_v37  ;;  %v5922_v42 = vld [vmem:[%s7259_s14 + $0x148] sm:$0xff]  }
 0xde3   : > { %v5722_v45 = vpop.f32.mrb[95].mxu0  ;;  %5744 = vmatmul.mubr.msk.bf16.vlgmr.msra.gmra.mrb[100].mxu0 %vm1503_vm13, %v3896_v39  ;;  %4284 = vmatprep.mubr.bf16.mxu1 %v6074_v28  ;;  %v5921_v39 = vld [vmem:[%s7259_s14 + $0x180] sm:$0xff]   ;;  %v5923_v43 = vld [vmem:[%s7259_s14 + $0x1c8] sm:$0xff]  }
 0xde4   : > { %4243 = vmatprep.mubr.bf16.mxu0 %v6074_v28  ;;  %4253 = vmatpush1.bf16.msra.mxu1 %v5909_v21  ;;  %v5924_v44 = vld [vmem:[%s7259_s14 + $0x108] sm:$0xff]  }
 0xde5   : > { %4254 = vmatprep.subr.bf16.mxu1 %v5917_v24  ;;  %v5925_v45 = vld [vmem:[%s7259_s14 + $0x188] sm:$0xff]  }
 0xde8   : > { %4255 = vmatpush1.bf16.msra.mxu1 %v5915_v23 }
 0xde9   : > { %5375 = vmatprep.subr.bf16.mxu1 %v5919_v26 }
 0xead   : > { %v3989_v48 = vpop.f32.mrb[100].mxu1 }
 0xeae   : > { %v3943_v49 = vpop.f32.mrb[96].mxu0  ;;  %v4088_v50 = vsel %vm791_vm5, %v3989_v48, 0.0  ;;  %v5739_v51 = vpop.f32.mrb[101].mxu1  ;;  %v5926_v48 = vld [vmem:[%s7259_s14 + $0x150] sm:$0xff]  }
 0xeaf   : > { %v4087_v46 = vsel %vm791_vm5, %v3943_v49, 0.0  ;;  %v5733_v47 = vpop.f32.mrb[97].mxu0  ;;  %v3992_v52 = vpop.f32.mrb[102].mxu1  ;;  %v5927_v49 = vld [vmem:[%s7259_s14 + $0x1d0] sm:$0xff]  }
 0xeb0   : > { %v4089_v53 = vadd.f32 %v4088_v50, %v4087_v46  ;;  %v3946_v54 = vpop.f32.mrb[98].mxu0  ;;  %v5740_v56 = vpop.f32.mrb[103].mxu1  ;;  %v5928_v50 = vld [vmem:[%s7259_s14 + $0x110] sm:$0xff]   ;;  %v5930_v46 = vld [vmem:[%s7259_s14 + $0x158] sm:$0xff]  }
 0xeb1   : > { %v5734_v57 = vpop.f32.mrb[99].mxu0  ;;  %v5929_v51 = vld [vmem:[%s7259_s14 + $0x190] sm:$0xff]   ;;  %v5931_v47 = vld [vmem:[%s7259_s14 + $0x1d8] sm:$0xff]   ;;  %v5934_v54 = vld [vmem:[%s7259_s14 + $0x160] sm:$0xff]  }
 0xeb2   : > { %v5932_v52 = vld [vmem:[%s7259_s14 + $0x118] sm:$0xff]   ;;  %v5935_v56 = vld [vmem:[%s7259_s14 + $0x1e0] sm:$0xff]  }
 0xeb3   : > { %v5936_v57 = vld [vmem:[%s7259_s14 + $0x120] sm:$0xff]  }
 0xeb5   : > { %v4081_v58 = vpop.f32.mrb[104].mxu1 }
 0xeb6   : > { %v4035_v61 = vpop.f32.mrb[100].mxu0  ;;  %v5751_v62 = vpop.f32.mrb[105].mxu1  ;;  %v4092_v3 = vsel %vm791_vm5, %v4081_v58, 0.0  ;;  %v5937_v58 = vld [vmem:[%s7259_s14 + $0x1a0] sm:$0xff]  }
 0xeb7   : > { %v4090_v63 = vsel %vm791_vm5, %v4035_v61, 0.0  ;;  %v5745_v40 = vpop.f32.mrb[101].mxu0  ;;  %v4084_v28 = vpop.f32.mrb[106].mxu1  ;;  %v5938_v61 = vld [vmem:[%s7259_s14 + $0x168] sm:$0xff]  }
 0xeb8   : > { %v4091_v0 = vadd.f32 %v4090_v63, %v4089_v53  ;;  %v4038_v1 = vpop.f32.mrb[102].mxu0  ;;  %v5752_v2 = vpop.f32.mrb[107].mxu1  ;;  %v5933_v53 = vld [vmem:[%s7259_s14 + $0x198] sm:$0xff]   ;;  %v5939_v62 = vld [vmem:[%s7259_s14 + $0x1e8] sm:$0xff]   ;;  %v5942_v28 = vld [vmem:[%s7259_s14 + $0x170] sm:$0xff]  }
 0xeb9   : > { %v5746_v60 = vpop.f32.mrb[103].mxu0  ;;  %v5940_v63 = vld [vmem:[%s7259_s14 + $0x128] sm:$0xff]   ;;  %v5944_v1 = vld [vmem:[%s7259_s14 + $0x130] sm:$0xff]  }
 0xeba   : > { %v4093_v59 = vadd.f32 %v4092_v3, %v4091_v0  ;;  %v5941_v40 = vld [vmem:[%s7259_s14 + $0x1a8] sm:$0xff]   ;;  %v5943_v0 = vld [vmem:[%s7259_s14 + $0x1f0] sm:$0xff]   ;;  %v5946_v3 = vld [vmem:[%s7259_s14 + $0x178] sm:$0xff]  }
 0xebb   : > { %v5945_v2 = vld [vmem:[%s7259_s14 + $0x1b0] sm:$0xff]   ;;  %v5948_v60 = vld [vmem:[%s7259_s14 + $0x138] sm:$0xff]  }
 0xebc   : > { %v4102_v5 = vadd.f32 %v5047_v4, %v4093_v59  ;;  %v5947_v4 = vld [vmem:[%s7259_s14 + $0x1f8] sm:$0xff]  }
 0xebd   : > { %v5949_v59 = vld [vmem:[%s7259_s14 + $0x1b8] sm:$0xff]  }
 0xebe   : > { %v4103_v6 = vadd.f32 %v4102_v5, %v6767_v12  ;;  %v5906_v12 = vld [vmem:[%s7257_s12 + $0x40] ss:$16 sps:$4 sm:$0xff]   ;;  %v5060_v5 = vld [vmem:[%s7302_s19 + $0x4] sm:$0xf] }
 0xebf   : > { %4212 = vmatpush1.bf16.msra.mxu0 %v5906_v12 }
 0xec0   : > { %v4108_v9 = vsel %vm791_vm5, %v4103_v6, 0.0  ;;  %4213 = vmatprep.subr.bf16.mxu0 %v5914_v35 }
 0xec1   : > { %4109 = vadd.xlane.f32.xlu0 %v4108_v9  ;;  %v4159_v9 = vrot.slane %v5060_v5, %v2184_v11 }
 0xec3   : > { %4214 = vmatpush1.bf16.msra.mxu0 %v5912_v22 }
 0xec4   : > { %5353 = vmatprep.subr.bf16.mxu0 %v5918_v25 }
 0xf4e   : > { %v4110_v55 = vpop.xlane.xlu0 %4109 }
 0xf4f   : > { %v4111_v16 = vmul.f32 0.03125, %v4110_v55  ;;  %v4155_v55 = vrot.slane %v5060_v5, %v2180_v13 }
 0xf51   : > { %v4112_v17 = vsub.f32 %v4103_v6, %v4111_v16  ;;  %v4151_v6 = vrot.slane %v5060_v5, %v2176_v10  ;;  %v4163_v16 = vrot.slane %v5060_v5, %v2188_v14 }
 0xf53   : > { %v4113_v18 = vmul.f32 %v4112_v17, %v4112_v17 }
 0xf55   : > { %v4114_v19 = vsel %vm791_vm5, %v4113_v18, 0.0 }
 0xf56   : > { %4115 = vadd.xlane.f32.xlu1 %v4114_v19 }
 0xfe3   : > { %v4116_v27 = vpop.xlane.xlu1 %4115 }
 0xfe4   : > { %v4117_v29 = vmul.f32 0.03125, %v4116_v27 }
 0xfe6   : > { %v4118_v30 = vadd.f32 1e-05, %v4117_v29 }
 0xfe8   : > { %5988 = vrsqrt.f32 %v4118_v30 }
 0xff2   : > { %v5989_v31 = vpop.eup %5988 }
 0xff3   : > { %v4120_v33 = vmul.f32 %v5989_v31, %v4112_v17 }
 0xff5   : > { %v4127_v36 = vmul.f32 %v5050_v32, %v4120_v33  ;;  %v5136_v32 = vld [vmem:[%s7260_s15 + $0x1] ss:$0 sm:$0xff] }
 0xff7   : > { %v7065_v37 = vadd.f32 %v5051_v34, %v4127_v36 }
 0xff9   : > { %v4135_v41 = vpack.c.bf16 %v7065_v37, %v7065_v37 }
 0xffb   : > { %5069 = vmatmul.mubr.msk.bf16.vlgmr.msra.gmra.mrb[104].mxu0 %vm791_vm5, %v4135_v41  ;;  %5070 = vmatmul.mubr.msk.bf16.vlgmr.msra.gmra.mrb[108].mxu1 %vm791_vm5, %v4135_v41 }
 0xffc   : > { %5354 = vmatpush3.bf16.msra.mxu0 %v5920_v38  ;;  %5376 = vmatpush3.bf16.msra.mxu1 %v5921_v39 }
 0xffd   : > { %5355 = vmatprep.subr.bf16.mxu0 %v5922_v42  ;;  %5377 = vmatprep.subr.bf16.mxu1 %v5923_v43 }
0x1000   : > { %5356 = vmatpush3.bf16.msra.mxu0 %v5924_v44  ;;  %5378 = vmatpush3.bf16.msra.mxu1 %v5925_v45 }
0x1001   : > { %5357 = vmatprep.subr.bf16.mxu0 %v5926_v48  ;;  %5379 = vmatprep.subr.bf16.mxu1 %v5927_v49 }
0x1004   : > { %5358 = vmatpush3.bf16.msra.mxu0 %v5928_v50  ;;  %5380 = vmatpush3.bf16.msra.mxu1 %v5929_v51 }
0x1005   : > { %5359 = vmatprep.subr.bf16.mxu0 %v5930_v46  ;;  %5381 = vmatprep.subr.bf16.mxu1 %v5931_v47 }
0x1008   : > { %5360 = vmatpush3.bf16.msra.mxu0 %v5932_v52  ;;  %5382 = vmatpush3.bf16.msra.mxu1 %v5933_v53  ;;  %v5950_v53 = vld [vmem:[%s7263_s18] sm:$0xff]  }
0x1009   : > { %5361 = vmatprep.subr.bf16.mxu0 %v5934_v54  ;;  %5383 = vmatprep.subr.bf16.mxu1 %v5935_v56 }
0x100c   : > { %5362 = vmatpush3.bf16.msra.mxu0 %v5936_v57  ;;  %5384 = vmatpush3.bf16.msra.mxu1 %v5937_v58 }
0x100d   : > { %5363 = vmatprep.subr.bf16.mxu0 %v5938_v61  ;;  %5385 = vmatprep.subr.bf16.mxu1 %v5939_v62  ;;  %v5171_v61 = vld [vmem:[%s7261_s16 + $0x1] ss:$0 sm:$0xff] }
0x1010   : > { %5364 = vmatpush3.bf16.msra.mxu0 %v5940_v63  ;;  %5386 = vmatpush3.bf16.msra.mxu1 %v5941_v40  ;;  %v5172_v63 = vld [vmem:[%s7262_s17 + $0x1] ss:$0 sm:$0xff] }
0x1011   : > { %5365 = vmatprep.subr.bf16.mxu0 %v5942_v28  ;;  %5387 = vmatprep.subr.bf16.mxu1 %v5943_v0 }
0x1014   : > { %5366 = vmatpush3.bf16.msra.mxu0 %v5944_v1  ;;  %5388 = vmatpush3.bf16.msra.mxu1 %v5945_v2 }
0x1015   : > { %5367 = vmatprep.subr.bf16.mxu0 %v5946_v3  ;;  %5389 = vmatprep.subr.bf16.mxu1 %v5947_v4 }
0x1018   : > { %5368 = vmatpush3.bf16.msra.mxu0 %v5948_v60  ;;  %5390 = vmatpush3.bf16.msra.mxu1 %v5949_v59 }
0x1019   : > { %5753 = vmatprep.subr.bf16.mxu0 %v6072_v7 }
0x10ce   : > { %v4245_v17 = vpop.f32.mrb[104].mxu0  ;;  %v4286_v18 = vpop.f32.mrb[108].mxu1 }
0x10cf   : > { %v4246_v19 = vadd.f32 %v4245_v17, %v4151_v6  ;;  %v4287_v15 = vadd.f32 %v4286_v18, %v4159_v9  ;;  %v4247_v20 = vpop.f32.mrb[105].mxu0  ;;  %v4288_v12 = vpop.f32.mrb[109].mxu1 }
0x10d0   : > { %v4248_v21 = vadd.f32 %v4247_v20, %v4155_v55  ;;  %v4289_v22 = vadd.f32 %v4288_v12, %v4163_v16  ;;  %v4249_v35 = vpop.f32.mrb[106].mxu0  ;;  %v4290_v23 = vpop.f32.mrb[110].mxu1 }
0x10d1   : > { %v4293_v10 = vmax.f32 %v4246_v19, 0.0  ;;  %v4295_v24 = vmax.f32 %v4287_v15, 0.0  ;;  %v4250_v25 = vpop.f32.mrb[107].mxu0  ;;  %v4291_v11 = vpop.f32.mrb[111].mxu1 }
0x10d2   : > { %v4294_v26 = vmax.f32 %v4248_v21, 0.0  ;;  %v4296_v27 = vmax.f32 %v4289_v22, 0.0 }
0x10d3   : > { %v4297_v8 = vpack.c.bf16 %v4293_v10, %v4293_v10  ;;  %v4299_v14 = vpack.c.bf16 %v4295_v24, %v4295_v24 }
0x10d4   : > { %v4298_v13 = vpack.c.bf16 %v4294_v26, %v4294_v26  ;;  %v4300_v29 = vpack.c.bf16 %v4296_v27, %v4296_v27 }
0x10d6   : > { %4598 = vmatprep.mubr.bf16.mxu0 %v4298_v13  ;;  %4638 = vmatprep.mubr.bf16.mxu1 %v4300_v29 }
0x10d7   : > { %4599 = vmatmul.mubr.bf16.vlgmr.msra.gmra.mrb[108].mxu0 %v4297_v8  ;;  %4639 = vmatmul.mubr.bf16.vlgmr.msra.gmra.mrb[112].mxu1 %v4299_v14 }
0x10d8   : > { %5757 = vmatprep.mubr.msk.bf16.mxu0 %vm6073_vm0, %v6072_v7  ;;  %5754 = vmatpush3.bf16.msra.mxu0 %v5950_v53 }
0x10d9   : > { %5755 = vmatprep.subr.bf16.mxu0 %v6072_v7  ;;  %v5173_v7 = vld [vmem:[%s7303_s25] ss:$0 sm:$0xff]  ;;  %s6008_s25 = sshll.u32 %s6075_s0, 4  ;;  %s6009_s25 = int_to_ptr.vmem [resolvable:$false] %s6008_s25 }
0x10da   : > { %s6010_s27 = scalar_lea.vmem %s6009_s25, 256  ;;  %p6011_p4 = scmp.lt.s32.totalorder %s7205_s20, %s6009_s25 }
0x10db   : > { %p6012_p5 = scmp.lt.s32.totalorder %s6010_s27, %s6004_s1 }
0x10dd   : > { %p6013_p6 = por %p6012_p5, %p6011_p4 }
0x10df   : > { %p6014_p7 = pnand %p6013_p6, %p6007_p3 }
0x11aa   : > { %v5369_v30 = vpop.f32.mrb[108].mxu0  ;;  %v5391_v31 = vpop.f32.mrb[112].mxu1 }
0x11ab   : > { %v5370_v33 = vpop.f32.mrb[109].mxu0  ;;  %v5392_v34 = vpop.f32.mrb[113].mxu1 }
0x11ac   : > { %v5371_v36 = vadd.f32 %v5370_v33, %v5369_v30  ;;  %v5393_v38 = vadd.f32 %v5392_v34, %v5391_v31  ;;  %v5372_v39 = vpop.f32.mrb[110].mxu0  ;;  %v5394_v41 = vpop.f32.mrb[114].mxu1 }
0x11ad   : > { %v5373_v42 = vpop.f32.mrb[111].mxu0  ;;  %v5395_v43 = vpop.f32.mrb[115].mxu1 }
0x11ae   : > { %v4601_v44 = vadd.f32 %v5371_v36, %v5136_v32 }
0x11b0   : > { %v4641_v45 = vadd.f32 %v5393_v38, %v4601_v44 }
0x11b2   : > { %v4646_v48 = vadd.f32 %v4641_v45, %v7065_v37  ;;  %v5951_v37 = vld [vmem:[%s7263_s18 + $0x8] sm:$0xff]  }
0x11b3   : > { %5756 = vmatpush3.bf16.msra.mxu0 %v5951_v37 }
0x11b4   : > { %v4651_v49 = vsel %vm791_vm5, %v4646_v48, 0.0 }
0x11b5   : > { %4652 = vadd.xlane.f32.xlu0 %v4651_v49 }
0x1242   : > { %v4653_v50 = vpop.xlane.xlu0 %4652 }
0x1243   : > { %v4654_v51 = vmul.f32 0.03125, %v4653_v50 }
0x1245   : > { %v4655_v46 = vsub.f32 %v4646_v48, %v4654_v51 }
0x1247   : > { %v4656_v47 = vmul.f32 %v4655_v46, %v4655_v46 }
0x1249   : > { %v4657_v52 = vsel %vm791_vm5, %v4656_v47, 0.0 }
0x124a   : > { %4658 = vadd.xlane.f32.xlu1 %v4657_v52 }
0x12d7   : > { %v4659_v54 = vpop.xlane.xlu1 %4658 }
0x12d8   : > { %v4660_v56 = vmul.f32 0.03125, %v4659_v54 }
0x12da   : > { %v4661_v57 = vadd.f32 1e-05, %v4660_v56 }
0x12dc   : > { %5990 = vrsqrt.f32 %v4661_v57 }
0x12e6   : > { %v5991_v58 = vpop.eup %5990 }
0x12e7   : > { %v4663_v62 = vmul.f32 %v5991_v58, %v4655_v46 }
0x12e9   : > { %v4670_v40 = vmul.f32 %v5171_v61, %v4663_v62 }
0x12eb   : > { %v4677_v28 = vadd.f32 %v5172_v63, %v4670_v40 }
0x12ed   : > { %v4678_v0 = vpack.c.bf16 %v4677_v28, %v4677_v28 }
0x12ef   : > { %5758 = vmatmul.mubr.msk.bf16.vlgmr.msra.gmra.mrb[112].mxu0 %vm791_vm5, %v4678_v0 }
0x13c2   : > { %v4739_v1 = vpop.f32.mrb[112].mxu0 }
0x13c3   : > { %v4740_v2 = vadd.f32 %v5173_v7, %v4739_v1  ;;  %v5759_v3 = vpop.f32.mrb[113].mxu0 }
0x13c4   : > { %v4742_v4 = vpop.f32.mrb[114].mxu0 }
0x13c5   : > { %4745 = vst [vmem:[%s587_s29] sm:$0xff] %v4740_v2  ;;  %v5760_v60 = vpop.f32.mrb[115].mxu0 }
0x13c6   : > { %6017 = shalt.err (!%p6014_p7)
}
0x13c7   : > { %s6018_s4 = scalar_lea.hbm %s7203_s5, 128  ;;  %s6022_s26 = scalar_lea.hbm %s7304_s30, 256 }
0x13c8   : > { %p6019_p8 = scmp.ne.s32.totalorder %s7203_s5, %s6018_s4  ;;  %p6023_p13 = scmp.lt.u32.totalorder %s7203_s5, %s7304_s30 }
0x13c9   : > { %p6024_p0 = scmp.lt.u32.totalorder %s6022_s26, %s6018_s4  ;;  %p6026_p2 = scmp.lt.u32.totalorder %s6018_s4, %s7203_s5 }
0x13ca   : > { %p6020_p9 = pnand %p6019_p8, %p6219_p10 }
0x13cb   : > { %p6025_p1 = por %p6024_p0, %p6023_p13 }
0x13cc   : > { %p6021_p12 = pneg %p6020_p9 }
0x13cd   : > { %p6027_p3 = por %p6026_p2, %p6025_p1 }
0x13cf   : > { %p6028_p4 = pnand %p6027_p3, %p6021_p12 }
0x13d1   : > { %6031 = shalt.err (!%p6028_p4)
}
0x13d2   : > { %5770 = dma.vmem_to_hbm [thread:$0]  (%p6219_p10), %s7205_s20, 128, %s7203_s5, %s4747_s2  }
0x13d3 PF: > { %s7305_s1 = sld [smem:[#allocation10_spill]]  ;;  %s7306_s27 = sld [smem:[#allocation8_spill]] }
0x13d9   : > { %p5776_p5 = scmp.ge.s32.totalorder %s7305_s1, 2  ;;  %s4772_s29 = sand.u32 1, %s7306_s27  }
0x13da   : > { %s4773_s0 = scalar_lea.sflag [#allocation5], %s4772_s29 }
0x13db   : > { %p5773_p6 = pnand %p5776_p5, %p6223_p11 }
0x13dd   : > { %6051 = dma.done.wait (!%p5773_p6), %s4773_s0, 128  }
0x13de   : > { %6053 = vsyncadd (!%p5773_p6), %s4773_s0, 4294967168  ;;  %s7308_s27 = sld [smem:[#allocation11_spill]]  ;;  %s7309_s4 = sld [smem:[#allocation9_spill]] }
0x13df   : > { %s7310_s26 = sld [smem:[#allocation12_spill]]  ;;  %s7311_s25 = smov %s6060_s3 }
0x13e4   : > { %p36_p7 = scmp.ge.s32.totalorder %s7308_s27, 4   ;;  %s7312_s3 = smov %s7309_s4 }
0x13e6   :  { %38 = sbr.rel (!%p36_p7) target bundleno = 26 (0x1a), region = 144 }
0x13ed   :  { %4778 = vsyncpa [#allocation5], 1 }
0x13ee   :  { %4780 = vsyncpa [#allocation5 + $0x1], 1 }

</bundles_post_ra>
